<compile_context>
chip_gen: v7x
topology: tpu7x:2x2x1
jax: 0.10.0
libtpu: 0.0.40
codegen_flags: <defaults>
</compile_context>

<pallas_src>
import functools
import math

import numpy as np

import jax
import jax.numpy as jnp
from jax.experimental import pallas as pl
from jax.experimental.pallas import tpu as pltpu

LEAKY_SLOPE = 0.01  # F.leaky_relu default


# ----------------------------------------------------------------------------
# The fused kernel: one grid step == `batch_block` batch elements.
# ----------------------------------------------------------------------------
def _pncn_kernel(
    x_ref, ct_ref, cs_ref, mask_ref,
    fc_w_ref, fc_b_ref,
    p2t_ref, t2p_ref, pfc_w_ref, pfc_b_ref,
    fp2t_ref,
    wq_ref, bq_ref, wk_ref, bk_ref, wv_ref, bv_ref, wo_ref, bo_ref,
    ln1g_ref, ln1b_ref, wi_ref, bi_ref, wo2_ref, bo2_ref, ln2g_ref, ln2b_ref,
    fin_w_ref, fin_b_ref,
    o_ref,
    h_scr, tf_scr, dp_scr,
    *, nh,
):
    f32 = jnp.float32
    Bb, G, TP, P = ct_ref.shape          # batch block, groups (2*num_classes), padded T, places
    H = fc_w_ref.shape[1]
    E = t2p_ref.shape[1]
    Lp = p2t_ref.shape[0]
    Lb = wq_ref.shape[0]
    dh = H // nh
    RT = Bb * TP                          # transition rows (first RT rows of h)
    scale = f32(1.0 / math.sqrt(dh))

    def mm(a, b):
        return jnp.dot(a, b, preferred_element_type=jnp.float32)

    def leaky(v):
        return jnp.where(v >= 0, v, f32(LEAKY_SLOPE) * v)

    def rownorm(v, eps, gamma=None, beta=None):
        # normalize over the last dim per row: F.instance_norm on (B,P,H) and Bert LN.
        mean = jnp.mean(v, axis=-1, keepdims=True)
        var = jnp.mean(jnp.square(v - mean), axis=-1, keepdims=True)
        out = (v - mean) * jax.lax.rsqrt(var + f32(eps))
        if gamma is not None:
            out = out * gamma + beta
        return out

    def erf(v):
        # Abramowitz & Stegun 7.1.26, max abs err ~1.5e-7; only exp (EUP slot).
        a1, a2, a3 = 0.254829592, -0.284496736, 1.421413741
        a4, a5, pc = -1.453152027, 1.061405429, 0.3275911
        sgn = jnp.where(v >= 0, f32(1.0), f32(-1.0))
        av = jnp.abs(v)
        t = 1.0 / (1.0 + f32(pc) * av)
        poly = ((((f32(a5) * t + f32(a4)) * t + f32(a3)) * t + f32(a2)) * t + f32(a1)) * t
        return sgn * (1.0 - poly * jnp.exp(-av * av))

    def gelu(v):  # exact (erf) GELU — HF Bert default hidden_act="gelu"
        return f32(0.5) * v * (1.0 + erf(v * f32(0.7071067811865476)))

    # ---- stem: x = act(fc(x)) over all folded rows --------------------------
    pf = leaky(mm(x_ref[...], fc_w_ref[...]) + fc_b_ref[...])        # (Bb*P, H)

    # ---- PNC layers ----------------------------------------------------------
    for l in range(Lp):
        pfn = rownorm(pf, 1e-5)                                       # instance_norm
        # place -> transition: lane-dense projection for ALL folded rows at once,
        # then per-(element, group) C_t contraction accumulated into VMEM scratch.
        proj = mm(pfn, p2t_ref[l])                                    # (Bb*P, G*E)
        for b in range(Bb):
            acc = mm(ct_ref[b, 0], proj[b * P:(b + 1) * P, 0:E])
            for g in range(1, G):
                acc = acc + mm(ct_ref[b, g],
                               proj[b * P:(b + 1) * P, g * E:(g + 1) * E])
            tf_scr[b * TP:(b + 1) * TP, :] = acc                      # 8-aligned rows
        tfeat = leaky(tf_scr[...])                                    # (RT, E), pad rows 0
        # transition -> place: same structure with C_stack.
        proj2 = mm(tfeat, t2p_ref[l])                                 # (RT, G*H)
        for b in range(Bb):
            acc = mm(cs_ref[b, 0], proj2[b * TP:(b + 1) * TP, 0:H])
            for g in range(1, G):
                acc = acc + mm(cs_ref[b, g],
                               proj2[b * TP:(b + 1) * TP, g * H:(g + 1) * H])
            dp_scr[b * P:(b + 1) * P, :] = acc
        pfn = leaky(dp_scr[...] + pfn)                                # residual on normed feats
        pf = leaky(mm(pfn, pfc_w_ref[l]) + pfc_b_ref[l])              # (Bb*P, H)

    # ---- FinalP2TLayer: x_t rows written straight into the transformer input ---
    pfn = rownorm(pf, 1e-5)
    projf = mm(pfn, fp2t_ref[...])                                    # (Bb*P, G*H)
    for b in range(Bb):
        acc = mm(ct_ref[b, 0], projf[b * P:(b + 1) * P, 0:H])
        for g in range(1, G):
            acc = acc + mm(ct_ref[b, g],
                           projf[b * P:(b + 1) * P, g * H:(g + 1) * H])
        h_scr[b * TP:(b + 1) * TP, :] = acc                           # x_t rows of element b
    h_scr[RT:, :] = pf                                                # place rows (all elems)
    h = h_scr[...]                                                    # (R, H), R = RT + Bb*P

    # Block-diagonal additive mask (built host-side, loaded once; no per-head
    # broadcasts inside the unrolled loops).
    add_mask = mask_ref[0]                                            # (R, R)

    # ---- BERT encoder over the folded [x_t ; x] rows -------------------------
    for l in range(Lb):
        q = mm(h, wq_ref[l]) + bq_ref[l]                              # (R, H) merged heads
        k = mm(h, wk_ref[l]) + bk_ref[l]
        v = mm(h, wv_ref[l]) + bv_ref[l]
        ctx_heads = []
        for hd in range(nh):                                          # tiny score/ctx matmuls
            sl = slice(hd * dh, (hd + 1) * dh)
            s = jax.lax.dot_general(q[:, sl], k[:, sl], (((1,), (1,)), ((), ())),
                                    preferred_element_type=jnp.float32) * scale
            s = s + add_mask                                          # block-diag + pad mask
            s = s - jnp.max(s, axis=-1, keepdims=True)
            p = jnp.exp(s)
            p = p * pl.reciprocal(jnp.sum(p, axis=-1, keepdims=True), approx=True)
            ctx_heads.append(mm(p, v[:, sl]))                         # (R, dh)
        ctx = jnp.concatenate(ctx_heads, axis=-1)                     # lane-stacked (R, H)
        attn_out = mm(ctx, wo_ref[l]) + bo_ref[l]                     # ONE (H,H) out proj
        h1 = rownorm(attn_out + h, 1e-12, ln1g_ref[l], ln1b_ref[l])
        inter = gelu(mm(h1, wi_ref[l]) + bi_ref[l])                   # (R, I)
        ffo = mm(inter, wo2_ref[l]) + bo2_ref[l]                      # (R, H)
        h = rownorm(ffo + h1, 1e-12, ln2g_ref[l], ln2b_ref[l])

    # ---- final head, lane-dense: logits only for the transition rows ---------
    o_row = jax.lax.dot_general(fin_w_ref[...], h[0:RT, :], (((1,), (1,)), ((), ())),
                                preferred_element_type=jnp.float32)  # (1, RT)
    o_ref[0] = o_row + fin_b_ref[...]


# ----------------------------------------------------------------------------
# Host wrapper
# ----------------------------------------------------------------------------
_WEIGHT_NAMES = (
    "fc_w", "fc_b",
    "pnc_p2t", "pnc_t2p", "pnc_fc_w", "pnc_fc_b",
    "final_p2t_w",
    "wq", "bq", "wk", "bk", "wv", "bv", "wo", "bo",
    "ln1_g", "ln1_b", "wi", "bi", "wo2", "bo2", "ln2_g", "ln2_b",
    "final_fc_w", "final_fc_b",
)


def _pick_batch_block(B, P, SP):
    """Largest batch block such that (a) blocks tile B, (b) folded rows stay
    8-aligned, (c) the folded sequence stays <= ~128 rows (block-diag attention
    waste stays free on the MXU), and (d) the grid keeps >= 2 parallel steps
    whenever possible (both v7x TensorCores)."""
    cap = max(1, 128 // SP)
    ok = [d for d in range(1, B + 1)
          if B % d == 0 and d <= cap and (d == B or (d * P) % 8 == 0)]
    multi = [d for d in ok if B // d >= 2]
    if multi:
        return max(multi)
    if ok:
        return max(ok)
    return B


def pncn_forward(params, x, C_t_stack, C_stack, attention_mask,
                 *, num_attention_heads=4, batch_block=None):
    f32 = jnp.float32
    NEG = jnp.float32(-1e9)

    B, P, Cin = x.shape
    G, T = C_t_stack.shape[1], C_t_stack.shape[2]
    H = params["fc_w"].shape[1]
    E = params["pnc_t2p"].shape[1]
    assert H % num_attention_heads == 0
    TP = ((T + 7) // 8) * 8              # pad transition axis to a sublane multiple
    SP = TP + P

    if batch_block is None:
        batch_block = _pick_batch_block(B, P, SP)
    assert B % batch_block == 0
    Bb = batch_block
    NB = B // Bb                          # grid steps (>= 2 where possible, for v7x)
    R = Bb * SP                           # folded sequence rows per step
    RT = Bb * TP                          # folded transition rows per step

    # One-time host-side re-layout (cheap XLA reshapes/pads, amortized).
    x2d = x.astype(f32).reshape(B * P, Cin)
    ct = jnp.pad(C_t_stack.astype(f32), ((0, 0), (0, 0), (0, TP - T), (0, 0)))
    cs = jnp.pad(C_stack.astype(f32), ((0, 0), (0, 0), (0, 0), (0, TP - T)))

    # Block-diagonal additive attention mask per grid step.  Row/col ordering
    # inside a step is [x_t chunk of elem 0..Bb-1 (TP rows each) ; place chunk of
    # elem 0..Bb-1 (P rows each)].  Cross-element and padded-transition keys get
    # -1e9; within an element the caller-supplied ADDITIVE mask value of the key
    # is used (0 = attend), matching attention_mask.unsqueeze(1).unsqueeze(2).
    elem = np.concatenate([np.repeat(np.arange(Bb), TP), np.repeat(np.arange(Bb), P)])
    same = jnp.asarray(elem[:, None] == elem[None, :])                        # (R, R)
    am = attention_mask.astype(f32).reshape(NB, Bb, T + P)
    t_part = jnp.concatenate(
        [am[..., :T], jnp.full((NB, Bb, TP - T), NEG, f32)], axis=-1).reshape(NB, Bb * TP)
    p_part = am[..., T:].reshape(NB, Bb * P)
    kv = jnp.concatenate([t_part, p_part], axis=-1)                           # (NB, R)
    big_mask = jnp.where(same[None], kv[:, None, :], NEG)                     # (NB, R, R)

    data = [x2d, ct, cs, big_mask]
    weights = [params[n] for n in _WEIGHT_NAMES]

    data_specs = [
        pl.BlockSpec((Bb * P, Cin), lambda nb: (nb, 0)),
        pl.BlockSpec((Bb, G, TP, P), lambda nb: (nb, 0, 0, 0)),
        pl.BlockSpec((Bb, G, P, TP), lambda nb: (nb, 0, 0, 0)),
        pl.BlockSpec((1, R, R), lambda nb: (nb, 0, 0)),
    ]

    # Grid-invariant weights: full blocks, constant index map.
    # TODO(synk): at production sizes use pipeline_mode=pl.Buffered(1) (or a one-time
    #             pl.ANY DMA) so these are not double-buffered on v7x's 64 MiB VMEM.
    def full_spec(a):
        n = a.ndim
        return pl.BlockSpec(a.shape, lambda nb, n=n: (0,) * n)

    in_specs = data_specs + [full_spec(w) for w in weights]

    out = pl.pallas_call(
        functools.partial(_pncn_kernel, nh=num_attention_heads),
        grid=(NB,),
        in_specs=in_specs,
        out_specs=pl.BlockSpec((1, 1, RT), lambda nb: (nb, 0, 0)),
        out_shape=jax.ShapeDtypeStruct((NB, 1, RT), f32),
        scratch_shapes=[
            pltpu.VMEM((R, H), f32),        # transformer input [x_t ; x] assembly
            pltpu.VMEM((RT, E), f32),       # PNC transition features assembly
            pltpu.VMEM((Bb * P, H), f32),   # PNC place-update assembly
        ],
        compiler_params=pltpu.CompilerParams(
            dimension_semantics=("parallel",),
            vmem_limit_bytes=32 * 1024 * 1024,
        ),
    )(*data, *weights)

    # (NB, 1, Bb*TP) -> (B, TP) -> logits for the T transition tokens.
    logits = out.reshape(B, TP)[:, :T]
    return logits[..., None]


# ----------------------------------------------------------------------------
# Deterministic synthetic parameters (shapes follow the PyTorch __init__).
# Layouts vs. the PyTorch weights W[out, in] (all linears stored transposed):
#   pnc_p2t[l]     (H, G*E)  == pnc_layers[l].fc_p2t.weight.T
#   pnc_t2p[l]     (E, G*H)  == pnc_layers[l].fc_t2p.weight.T
#   final_p2t_w    (H, G*H)  == final_p2t.fc_p2t.weight.T
#   wq/wk/wv[l]    (H, H)    == ...query/key/value.weight.T   (heads contiguous in cols)
#   wo[l]          (H, H)    == ...attention.output.dense.weight.T
#   wi[l] (H, I), wo2[l] (I, H), fc/pnc_fc transposed to (in, out); biases (.., 1, out)
#   final_fc_w     (1, H)    == final_fc.weight (row vector), final_fc_b (1, 1)
# ----------------------------------------------------------------------------
def init_params(key, *, num_classes, in_channel, num_pnc_layers, hidden_channel,
                expand_ratio, num_transformer_layers, num_attention_heads,
                intermediate_size):
    G = 2 * num_classes
    H = hidden_channel
    E = int(hidden_channel * expand_ratio)
    inter = intermediate_size
    Lp, Lb = num_pnc_layers, num_transformer_layers

    keys = iter(jax.random.split(key, 64))

    def w(shape):
        return jax.random.normal(next(keys), shape, jnp.float32) * 0.02

    return {
        "fc_w": w((in_channel, H)), "fc_b": w((1, H)),
        "pnc_p2t": w((Lp, H, G * E)),
        "pnc_t2p": w((Lp, E, G * H)),
        "pnc_fc_w": w((Lp, H, H)), "pnc_fc_b": w((Lp, 1, H)),
        "final_p2t_w": w((H, G * H)),
        "wq": w((Lb, H, H)), "bq": w((Lb, 1, H)),
        "wk": w((Lb, H, H)), "bk": w((Lb, 1, H)),
        "wv": w((Lb, H, H)), "bv": w((Lb, 1, H)),
        "wo": w((Lb, H, H)), "bo": w((Lb, 1, H)),
        "ln1_g": jnp.ones((Lb, 1, H), jnp.float32),
        "ln1_b": jnp.zeros((Lb, 1, H), jnp.float32),
        "wi": w((Lb, H, inter)), "bi": w((Lb, 1, inter)),
        "wo2": w((Lb, inter, H)), "bo2": w((Lb, 1, H)),
        "ln2_g": jnp.ones((Lb, 1, H), jnp.float32),
        "ln2_b": jnp.zeros((Lb, 1, H), jnp.float32),
        "final_fc_w": w((1, H)), "final_fc_b": w((1, 1)),
    }


# ----------------------------------------------------------------------------
if __name__ == "__main__":
    NUM_CLASSES = 2              # -> G = 4
    IN_CHANNEL = 16
    HIDDEN = 32
    EXPAND_RATIO = 1.0           # -> E = 32
    NUM_PNC_LAYERS = 2
    NUM_TRANSFORMER_LAYERS = 2
    NUM_HEADS = 4                # head_dim = 8
    INTERMEDIATE = 64
    B, P, T = 4, 8, 6            # batch, places, transitions (B=4 -> 2 elems/grid step)
    G = 2 * NUM_CLASSES

    root = jax.random.PRNGKey(0)
    kx, kct, kc, kp = jax.random.split(root, 4)

    x = jax.random.normal(kx, (B, P, IN_CHANNEL), jnp.float32)
    C_t_stack = jax.random.normal(kct, (B, G, T, P), jnp.float32)
    C_stack = jax.random.normal(kc, (B, G, P, T), jnp.float32)
    attention_mask = jnp.zeros((B, T + P), jnp.float32)  # additive: 0 = attend

    params = init_params(
        kp,
        num_classes=NUM_CLASSES,
        in_channel=IN_CHANNEL,
        num_pnc_layers=NUM_PNC_LAYERS,
        hidden_channel=HIDDEN,
        expand_ratio=EXPAND_RATIO,
        num_transformer_layers=NUM_TRANSFORMER_LAYERS,
        num_attention_heads=NUM_HEADS,
        intermediate_size=INTERMEDIATE,
    )

    fwd = jax.jit(functools.partial(pncn_forward, num_attention_heads=NUM_HEADS))
    logits = jax.block_until_ready(fwd(params, x, C_t_stack, C_stack, attention_mask))
    assert logits.shape == (B, T, 1), logits.shape
    assert bool(jnp.all(jnp.isfinite(logits)))
    print("KERNEL_OK")
</pallas_src>

<mosaic_0001>
module attributes {stable_mosaic.version = 11 : i64} {
  func.func @_pncn_kernel(%arg0: i32, %arg1: memref<16x16xf32, #tpu.memory_space<vmem>>, %arg2: memref<2x4x8x8xf32, #tpu.memory_space<vmem>>, %arg3: memref<2x4x8x8xf32, #tpu.memory_space<vmem>>, %arg4: memref<1x32x32xf32, #tpu.memory_space<vmem>>, %arg5: memref<16x32xf32, #tpu.memory_space<vmem>>, %arg6: memref<1x32xf32, #tpu.memory_space<vmem>>, %arg7: memref<2x32x128xf32, #tpu.memory_space<vmem>>, %arg8: memref<2x32x128xf32, #tpu.memory_space<vmem>>, %arg9: memref<2x32x32xf32, #tpu.memory_space<vmem>>, %arg10: memref<2x1x32xf32, #tpu.memory_space<vmem>>, %arg11: memref<32x128xf32, #tpu.memory_space<vmem>>, %arg12: memref<2x32x32xf32, #tpu.memory_space<vmem>>, %arg13: memref<2x1x32xf32, #tpu.memory_space<vmem>>, %arg14: memref<2x32x32xf32, #tpu.memory_space<vmem>>, %arg15: memref<2x1x32xf32, #tpu.memory_space<vmem>>, %arg16: memref<2x32x32xf32, #tpu.memory_space<vmem>>, %arg17: memref<2x1x32xf32, #tpu.memory_space<vmem>>, %arg18: memref<2x32x32xf32, #tpu.memory_space<vmem>>, %arg19: memref<2x1x32xf32, #tpu.memory_space<vmem>>, %arg20: memref<2x1x32xf32, #tpu.memory_space<vmem>>, %arg21: memref<2x1x32xf32, #tpu.memory_space<vmem>>, %arg22: memref<2x32x64xf32, #tpu.memory_space<vmem>>, %arg23: memref<2x1x64xf32, #tpu.memory_space<vmem>>, %arg24: memref<2x64x32xf32, #tpu.memory_space<vmem>>, %arg25: memref<2x1x32xf32, #tpu.memory_space<vmem>>, %arg26: memref<2x1x32xf32, #tpu.memory_space<vmem>>, %arg27: memref<2x1x32xf32, #tpu.memory_space<vmem>>, %arg28: memref<1x32xf32, #tpu.memory_space<vmem>>, %arg29: memref<1x1xf32, #tpu.memory_space<vmem>>, %arg30: memref<1x1x16xf32, #tpu.memory_space<vmem>>, %arg31: memref<32x32xf32, #tpu.memory_space<vmem>>, %arg32: memref<16x32xf32, #tpu.memory_space<vmem>>, %arg33: memref<16x32xf32, #tpu.memory_space<vmem>>) attributes {dimension_semantics = [#tpu.dimension_semantics<parallel>], iteration_bounds = array<i64: 2>, scalar_prefetch = 0 : i64, scratch_operands = 3 : i64, tpu.core_type = #tpu.core_type<tc>, window_params = [{transform_indices = @transform_0, window_bounds = array<i64: 16, 16>}, {transform_indices = @transform_1, window_bounds = array<i64: 2, 4, 8, 8>}, {transform_indices = @transform_2, window_bounds = array<i64: 2, 4, 8, 8>}, {transform_indices = @transform_3, window_bounds = array<i64: 1, 32, 32>}, {pipeline_mode = #tpu.pipeline_mode<synchronous>, transform_indices = @transform_4, window_bounds = array<i64: 16, 32>}, {pipeline_mode = #tpu.pipeline_mode<synchronous>, transform_indices = @transform_5, window_bounds = array<i64: 1, 32>}, {pipeline_mode = #tpu.pipeline_mode<synchronous>, transform_indices = @transform_6, window_bounds = array<i64: 2, 32, 128>}, {pipeline_mode = #tpu.pipeline_mode<synchronous>, transform_indices = @transform_7, window_bounds = array<i64: 2, 32, 128>}, {pipeline_mode = #tpu.pipeline_mode<synchronous>, transform_indices = @transform_8, window_bounds = array<i64: 2, 32, 32>}, {pipeline_mode = #tpu.pipeline_mode<synchronous>, transform_indices = @transform_9, window_bounds = array<i64: 2, 1, 32>}, {pipeline_mode = #tpu.pipeline_mode<synchronous>, transform_indices = @transform_10, window_bounds = array<i64: 32, 128>}, {pipeline_mode = #tpu.pipeline_mode<synchronous>, transform_indices = @transform_11, window_bounds = array<i64: 2, 32, 32>}, {pipeline_mode = #tpu.pipeline_mode<synchronous>, transform_indices = @transform_12, window_bounds = array<i64: 2, 1, 32>}, {pipeline_mode = #tpu.pipeline_mode<synchronous>, transform_indices = @transform_13, window_bounds = array<i64: 2, 32, 32>}, {pipeline_mode = #tpu.pipeline_mode<synchronous>, transform_indices = @transform_14, window_bounds = array<i64: 2, 1, 32>}, {pipeline_mode = #tpu.pipeline_mode<synchronous>, transform_indices = @transform_15, window_bounds = array<i64: 2, 32, 32>}, {pipeline_mode = #tpu.pipeline_mode<synchronous>, transform_indices = @transform_16, window_bounds = array<i64: 2, 1, 32>}, {pipeline_mode = #tpu.pipeline_mode<synchronous>, transform_indices = @transform_17, window_bounds = array<i64: 2, 32, 32>}, {pipeline_mode = #tpu.pipeline_mode<synchronous>, transform_indices = @transform_18, window_bounds = array<i64: 2, 1, 32>}, {pipeline_mode = #tpu.pipeline_mode<synchronous>, transform_indices = @transform_19, window_bounds = array<i64: 2, 1, 32>}, {pipeline_mode = #tpu.pipeline_mode<synchronous>, transform_indices = @transform_20, window_bounds = array<i64: 2, 1, 32>}, {pipeline_mode = #tpu.pipeline_mode<synchronous>, transform_indices = @transform_21, window_bounds = array<i64: 2, 32, 64>}, {pipeline_mode = #tpu.pipeline_mode<synchronous>, transform_indices = @transform_22, window_bounds = array<i64: 2, 1, 64>}, {pipeline_mode = #tpu.pipeline_mode<synchronous>, transform_indices = @transform_23, window_bounds = array<i64: 2, 64, 32>}, {pipeline_mode = #tpu.pipeline_mode<synchronous>, transform_indices = @transform_24, window_bounds = array<i64: 2, 1, 32>}, {pipeline_mode = #tpu.pipeline_mode<synchronous>, transform_indices = @transform_25, window_bounds = array<i64: 2, 1, 32>}, {pipeline_mode = #tpu.pipeline_mode<synchronous>, transform_indices = @transform_26, window_bounds = array<i64: 2, 1, 32>}, {pipeline_mode = #tpu.pipeline_mode<synchronous>, transform_indices = @transform_27, window_bounds = array<i64: 1, 32>}, {pipeline_mode = #tpu.pipeline_mode<synchronous>, transform_indices = @transform_28, window_bounds = array<i64: 1, 1>}, {transform_indices = @transform_29, window_bounds = array<i64: 1, 1, 16>}]} {
    %c0 = arith.constant 0 : index
    %c0_0 = arith.constant 0 : index
    %0 = vector.load %arg1[%c0, %c0_0] : memref<16x16xf32, #tpu.memory_space<vmem>>, vector<16x16xf32>
    %c0_1 = arith.constant 0 : index
    %c0_2 = arith.constant 0 : index
    %1 = vector.load %arg5[%c0_1, %c0_2] : memref<16x32xf32, #tpu.memory_space<vmem>>, vector<16x32xf32>
    %cst = arith.constant dense<0.000000e+00> : vector<16x32xf32>
    %2 = tpu.matmul %0, %1, %cst {dimension_numbers = #tpu.dot_dimension_numbers<[1], [0], [0], [1], [0, 0, 1, 1], [], []>} : vector<16x16xf32>, vector<16x32xf32>, vector<16x32xf32> -> vector<16x32xf32>
    %c0_3 = arith.constant 0 : index
    %c0_4 = arith.constant 0 : index
    %3 = vector.load %arg6[%c0_3, %c0_4] : memref<1x32xf32, #tpu.memory_space<vmem>>, vector<1x32xf32>
    %4 = vector.broadcast %3 : vector<1x32xf32> to vector<16x32xf32>
    %5 = arith.addf %2, %4 : vector<16x32xf32>
    %cst_5 = arith.constant 0.000000e+00 : f32
    %6 = vector.broadcast %cst_5 : f32 to vector<16x32xf32>
    %7 = arith.cmpf oge, %5, %6 : vector<16x32xf32>
    %cst_6 = arith.constant 0.00999999977 : f32
    %8 = vector.broadcast %cst_6 : f32 to vector<16x32xf32>
    %9 = arith.mulf %8, %5 : vector<16x32xf32>
    %10 = arith.select %7, %5, %9 : vector<16x32xi1>, vector<16x32xf32>
    %cst_7 = arith.constant dense<0.000000e+00> : vector<16xf32>
    %11 = vector.multi_reduction <add>, %10, %cst_7 [1] : vector<16x32xf32> to vector<16xf32>
    %12 = vector.shape_cast %11 : vector<16xf32> to vector<16x1xf32>
    %cst_8 = arith.constant 3.200000e+01 : f32
    %13 = vector.broadcast %cst_8 : f32 to vector<16x1xf32>
    %14 = arith.divf %12, %13 : vector<16x1xf32>
    %15 = vector.broadcast %14 : vector<16x1xf32> to vector<16x32xf32>
    %16 = arith.subf %10, %15 : vector<16x32xf32>
    %17 = arith.mulf %16, %16 : vector<16x32xf32>
    %cst_9 = arith.constant dense<0.000000e+00> : vector<16xf32>
    %18 = vector.multi_reduction <add>, %17, %cst_9 [1] : vector<16x32xf32> to vector<16xf32>
    %19 = vector.shape_cast %18 : vector<16xf32> to vector<16x1xf32>
    %cst_10 = arith.constant 3.200000e+01 : f32
    %20 = vector.broadcast %cst_10 : f32 to vector<16x1xf32>
    %21 = arith.divf %19, %20 : vector<16x1xf32>
    %22 = vector.broadcast %14 : vector<16x1xf32> to vector<16x32xf32>
    %23 = arith.subf %10, %22 : vector<16x32xf32>
    %cst_11 = arith.constant 9.99999974E-6 : f32
    %24 = vector.broadcast %cst_11 : f32 to vector<16x1xf32>
    %25 = arith.addf %21, %24 : vector<16x1xf32>
    %26 = math.rsqrt %25 : vector<16x1xf32>
    %27 = vector.broadcast %26 : vector<16x1xf32> to vector<16x32xf32>
    %28 = arith.mulf %23, %27 : vector<16x32xf32>
    %c0_12 = arith.constant 0 : index
    %c0_13 = arith.constant 0 : index
    %c0_14 = arith.constant 0 : index
    %29 = vector.load %arg7[%c0_12, %c0_13, %c0_14] : memref<2x32x128xf32, #tpu.memory_space<vmem>>, vector<1x32x128xf32>
    %30 = vector.shape_cast %29 : vector<1x32x128xf32> to vector<32x128xf32>
    %cst_15 = arith.constant dense<0.000000e+00> : vector<16x128xf32>
    %31 = tpu.matmul %28, %30, %cst_15 {dimension_numbers = #tpu.dot_dimension_numbers<[1], [0], [0], [1], [0, 0, 1, 1], [], []>} : vector<16x32xf32>, vector<32x128xf32>, vector<16x128xf32> -> vector<16x128xf32>
    %c0_16 = arith.constant 0 : index
    %c0_17 = arith.constant 0 : index
    %c0_18 = arith.constant 0 : index
    %c0_19 = arith.constant 0 : index
    %32 = vector.load %arg2[%c0_16, %c0_17, %c0_18, %c0_19] : memref<2x4x8x8xf32, #tpu.memory_space<vmem>>, vector<1x1x8x8xf32>
    %33 = vector.shape_cast %32 : vector<1x1x8x8xf32> to vector<8x8xf32>
    %34 = vector.extract_strided_slice %31 {offsets = [0, 0], sizes = [8, 32], strides = [1, 1]} : vector<16x128xf32> to vector<8x32xf32>
    %cst_20 = arith.constant dense<0.000000e+00> : vector<8x32xf32>
    %35 = tpu.matmul %33, %34, %cst_20 {dimension_numbers = #tpu.dot_dimension_numbers<[1], [0], [0], [1], [0, 0, 1, 1], [], []>} : vector<8x8xf32>, vector<8x32xf32>, vector<8x32xf32> -> vector<8x32xf32>
    %c0_21 = arith.constant 0 : index
    %c1 = arith.constant 1 : index
    %c0_22 = arith.constant 0 : index
    %c0_23 = arith.constant 0 : index
    %36 = vector.load %arg2[%c0_21, %c1, %c0_22, %c0_23] : memref<2x4x8x8xf32, #tpu.memory_space<vmem>>, vector<1x1x8x8xf32>
    %37 = vector.shape_cast %36 : vector<1x1x8x8xf32> to vector<8x8xf32>
    %38 = vector.extract_strided_slice %31 {offsets = [0, 32], sizes = [8, 32], strides = [1, 1]} : vector<16x128xf32> to vector<8x32xf32>
    %cst_24 = arith.constant dense<0.000000e+00> : vector<8x32xf32>
    %39 = tpu.matmul %37, %38, %cst_24 {dimension_numbers = #tpu.dot_dimension_numbers<[1], [0], [0], [1], [0, 0, 1, 1], [], []>} : vector<8x8xf32>, vector<8x32xf32>, vector<8x32xf32> -> vector<8x32xf32>
    %40 = arith.addf %35, %39 : vector<8x32xf32>
    %c0_25 = arith.constant 0 : index
    %c2 = arith.constant 2 : index
    %c0_26 = arith.constant 0 : index
    %c0_27 = arith.constant 0 : index
    %41 = vector.load %arg2[%c0_25, %c2, %c0_26, %c0_27] : memref<2x4x8x8xf32, #tpu.memory_space<vmem>>, vector<1x1x8x8xf32>
    %42 = vector.shape_cast %41 : vector<1x1x8x8xf32> to vector<8x8xf32>
    %43 = vector.extract_strided_slice %31 {offsets = [0, 64], sizes = [8, 32], strides = [1, 1]} : vector<16x128xf32> to vector<8x32xf32>
    %cst_28 = arith.constant dense<0.000000e+00> : vector<8x32xf32>
    %44 = tpu.matmul %42, %43, %cst_28 {dimension_numbers = #tpu.dot_dimension_numbers<[1], [0], [0], [1], [0, 0, 1, 1], [], []>} : vector<8x8xf32>, vector<8x32xf32>, vector<8x32xf32> -> vector<8x32xf32>
    %45 = arith.addf %40, %44 : vector<8x32xf32>
    %c0_29 = arith.constant 0 : index
    %c3 = arith.constant 3 : index
    %c0_30 = arith.constant 0 : index
    %c0_31 = arith.constant 0 : index
    %46 = vector.load %arg2[%c0_29, %c3, %c0_30, %c0_31] : memref<2x4x8x8xf32, #tpu.memory_space<vmem>>, vector<1x1x8x8xf32>
    %47 = vector.shape_cast %46 : vector<1x1x8x8xf32> to vector<8x8xf32>
    %48 = vector.extract_strided_slice %31 {offsets = [0, 96], sizes = [8, 32], strides = [1, 1]} : vector<16x128xf32> to vector<8x32xf32>
    %cst_32 = arith.constant dense<0.000000e+00> : vector<8x32xf32>
    %49 = tpu.matmul %47, %48, %cst_32 {dimension_numbers = #tpu.dot_dimension_numbers<[1], [0], [0], [1], [0, 0, 1, 1], [], []>} : vector<8x8xf32>, vector<8x32xf32>, vector<8x32xf32> -> vector<8x32xf32>
    %50 = arith.addf %45, %49 : vector<8x32xf32>
    %c0_33 = arith.constant 0 : index
    %c0_34 = arith.constant 0 : index
    %51 = vector.load %arg32[%c0_33, %c0_34] : memref<16x32xf32, #tpu.memory_space<vmem>>, vector<8x32xf32>
    tpu.vector_store %arg32[%c0_33, %c0_34], %50 {strides = array<i32>} : memref<16x32xf32, #tpu.memory_space<vmem>>, vector<8x32xf32>,
    %c1_35 = arith.constant 1 : index
    %c0_36 = arith.constant 0 : index
    %c0_37 = arith.constant 0 : index
    %c0_38 = arith.constant 0 : index
    %52 = vector.load %arg2[%c1_35, %c0_36, %c0_37, %c0_38] : memref<2x4x8x8xf32, #tpu.memory_space<vmem>>, vector<1x1x8x8xf32>
    %53 = vector.shape_cast %52 : vector<1x1x8x8xf32> to vector<8x8xf32>
    %54 = vector.extract_strided_slice %31 {offsets = [8, 0], sizes = [8, 32], strides = [1, 1]} : vector<16x128xf32> to vector<8x32xf32>
    %cst_39 = arith.constant dense<0.000000e+00> : vector<8x32xf32>
    %55 = tpu.matmul %53, %54, %cst_39 {dimension_numbers = #tpu.dot_dimension_numbers<[1], [0], [0], [1], [0, 0, 1, 1], [], []>} : vector<8x8xf32>, vector<8x32xf32>, vector<8x32xf32> -> vector<8x32xf32>
    %c1_40 = arith.constant 1 : index
    %c1_41 = arith.constant 1 : index
    %c0_42 = arith.constant 0 : index
    %c0_43 = arith.constant 0 : index
    %56 = vector.load %arg2[%c1_40, %c1_41, %c0_42, %c0_43] : memref<2x4x8x8xf32, #tpu.memory_space<vmem>>, vector<1x1x8x8xf32>
    %57 = vector.shape_cast %56 : vector<1x1x8x8xf32> to vector<8x8xf32>
    %58 = vector.extract_strided_slice %31 {offsets = [8, 32], sizes = [8, 32], strides = [1, 1]} : vector<16x128xf32> to vector<8x32xf32>
    %cst_44 = arith.constant dense<0.000000e+00> : vector<8x32xf32>
    %59 = tpu.matmul %57, %58, %cst_44 {dimension_numbers = #tpu.dot_dimension_numbers<[1], [0], [0], [1], [0, 0, 1, 1], [], []>} : vector<8x8xf32>, vector<8x32xf32>, vector<8x32xf32> -> vector<8x32xf32>
    %60 = arith.addf %55, %59 : vector<8x32xf32>
    %c1_45 = arith.constant 1 : index
    %c2_46 = arith.constant 2 : index
    %c0_47 = arith.constant 0 : index
    %c0_48 = arith.constant 0 : index
    %61 = vector.load %arg2[%c1_45, %c2_46, %c0_47, %c0_48] : memref<2x4x8x8xf32, #tpu.memory_space<vmem>>, vector<1x1x8x8xf32>
    %62 = vector.shape_cast %61 : vector<1x1x8x8xf32> to vector<8x8xf32>
    %63 = vector.extract_strided_slice %31 {offsets = [8, 64], sizes = [8, 32], strides = [1, 1]} : vector<16x128xf32> to vector<8x32xf32>
    %cst_49 = arith.constant dense<0.000000e+00> : vector<8x32xf32>
    %64 = tpu.matmul %62, %63, %cst_49 {dimension_numbers = #tpu.dot_dimension_numbers<[1], [0], [0], [1], [0, 0, 1, 1], [], []>} : vector<8x8xf32>, vector<8x32xf32>, vector<8x32xf32> -> vector<8x32xf32>
    %65 = arith.addf %60, %64 : vector<8x32xf32>
    %c1_50 = arith.constant 1 : index
    %c3_51 = arith.constant 3 : index
    %c0_52 = arith.constant 0 : index
    %c0_53 = arith.constant 0 : index
    %66 = vector.load %arg2[%c1_50, %c3_51, %c0_52, %c0_53] : memref<2x4x8x8xf32, #tpu.memory_space<vmem>>, vector<1x1x8x8xf32>
    %67 = vector.shape_cast %66 : vector<1x1x8x8xf32> to vector<8x8xf32>
    %68 = vector.extract_strided_slice %31 {offsets = [8, 96], sizes = [8, 32], strides = [1, 1]} : vector<16x128xf32> to vector<8x32xf32>
    %cst_54 = arith.constant dense<0.000000e+00> : vector<8x32xf32>
    %69 = tpu.matmul %67, %68, %cst_54 {dimension_numbers = #tpu.dot_dimension_numbers<[1], [0], [0], [1], [0, 0, 1, 1], [], []>} : vector<8x8xf32>, vector<8x32xf32>, vector<8x32xf32> -> vector<8x32xf32>
    %70 = arith.addf %65, %69 : vector<8x32xf32>
    %c8 = arith.constant 8 : index
    %c0_55 = arith.constant 0 : index
    %71 = vector.load %arg32[%c8, %c0_55] : memref<16x32xf32, #tpu.memory_space<vmem>>, vector<8x32xf32>
    tpu.vector_store %arg32[%c8, %c0_55], %70 {strides = array<i32>} : memref<16x32xf32, #tpu.memory_space<vmem>>, vector<8x32xf32>,
    %c0_56 = arith.constant 0 : index
    %c0_57 = arith.constant 0 : index
    %72 = vector.load %arg32[%c0_56, %c0_57] : memref<16x32xf32, #tpu.memory_space<vmem>>, vector<16x32xf32>
    %cst_58 = arith.constant 0.000000e+00 : f32
    %73 = vector.broadcast %cst_58 : f32 to vector<16x32xf32>
    %74 = arith.cmpf oge, %72, %73 : vector<16x32xf32>
    %cst_59 = arith.constant 0.00999999977 : f32
    %75 = vector.broadcast %cst_59 : f32 to vector<16x32xf32>
    %76 = arith.mulf %75, %72 : vector<16x32xf32>
    %77 = arith.select %74, %72, %76 : vector<16x32xi1>, vector<16x32xf32>
    %c0_60 = arith.constant 0 : index
    %c0_61 = arith.constant 0 : index
    %c0_62 = arith.constant 0 : index
    %78 = vector.load %arg8[%c0_60, %c0_61, %c0_62] : memref<2x32x128xf32, #tpu.memory_space<vmem>>, vector<1x32x128xf32>
    %79 = vector.shape_cast %78 : vector<1x32x128xf32> to vector<32x128xf32>
    %cst_63 = arith.constant dense<0.000000e+00> : vector<16x128xf32>
    %80 = tpu.matmul %77, %79, %cst_63 {dimension_numbers = #tpu.dot_dimension_numbers<[1], [0], [0], [1], [0, 0, 1, 1], [], []>} : vector<16x32xf32>, vector<32x128xf32>, vector<16x128xf32> -> vector<16x128xf32>
    %c0_64 = arith.constant 0 : index
    %c0_65 = arith.constant 0 : index
    %c0_66 = arith.constant 0 : index
    %c0_67 = arith.constant 0 : index
    %81 = vector.load %arg3[%c0_64, %c0_65, %c0_66, %c0_67] : memref<2x4x8x8xf32, #tpu.memory_space<vmem>>, vector<1x1x8x8xf32>
    %82 = vector.shape_cast %81 : vector<1x1x8x8xf32> to vector<8x8xf32>
    %83 = vector.extract_strided_slice %80 {offsets = [0, 0], sizes = [8, 32], strides = [1, 1]} : vector<16x128xf32> to vector<8x32xf32>
    %cst_68 = arith.constant dense<0.000000e+00> : vector<8x32xf32>
    %84 = tpu.matmul %82, %83, %cst_68 {dimension_numbers = #tpu.dot_dimension_numbers<[1], [0], [0], [1], [0, 0, 1, 1], [], []>} : vector<8x8xf32>, vector<8x32xf32>, vector<8x32xf32> -> vector<8x32xf32>
    %c0_69 = arith.constant 0 : index
    %c1_70 = arith.constant 1 : index
    %c0_71 = arith.constant 0 : index
    %c0_72 = arith.constant 0 : index
    %85 = vector.load %arg3[%c0_69, %c1_70, %c0_71, %c0_72] : memref<2x4x8x8xf32, #tpu.memory_space<vmem>>, vector<1x1x8x8xf32>
    %86 = vector.shape_cast %85 : vector<1x1x8x8xf32> to vector<8x8xf32>
    %87 = vector.extract_strided_slice %80 {offsets = [0, 32], sizes = [8, 32], strides = [1, 1]} : vector<16x128xf32> to vector<8x32xf32>
    %cst_73 = arith.constant dense<0.000000e+00> : vector<8x32xf32>
    %88 = tpu.matmul %86, %87, %cst_73 {dimension_numbers = #tpu.dot_dimension_numbers<[1], [0], [0], [1], [0, 0, 1, 1], [], []>} : vector<8x8xf32>, vector<8x32xf32>, vector<8x32xf32> -> vector<8x32xf32>
    %89 = arith.addf %84, %88 : vector<8x32xf32>
    %c0_74 = arith.constant 0 : index
    %c2_75 = arith.constant 2 : index
    %c0_76 = arith.constant 0 : index
    %c0_77 = arith.constant 0 : index
    %90 = vector.load %arg3[%c0_74, %c2_75, %c0_76, %c0_77] : memref<2x4x8x8xf32, #tpu.memory_space<vmem>>, vector<1x1x8x8xf32>
    %91 = vector.shape_cast %90 : vector<1x1x8x8xf32> to vector<8x8xf32>
    %92 = vector.extract_strided_slice %80 {offsets = [0, 64], sizes = [8, 32], strides = [1, 1]} : vector<16x128xf32> to vector<8x32xf32>
    %cst_78 = arith.constant dense<0.000000e+00> : vector<8x32xf32>
    %93 = tpu.matmul %91, %92, %cst_78 {dimension_numbers = #tpu.dot_dimension_numbers<[1], [0], [0], [1], [0, 0, 1, 1], [], []>} : vector<8x8xf32>, vector<8x32xf32>, vector<8x32xf32> -> vector<8x32xf32>
    %94 = arith.addf %89, %93 : vector<8x32xf32>
    %c0_79 = arith.constant 0 : index
    %c3_80 = arith.constant 3 : index
    %c0_81 = arith.constant 0 : index
    %c0_82 = arith.constant 0 : index
    %95 = vector.load %arg3[%c0_79, %c3_80, %c0_81, %c0_82] : memref<2x4x8x8xf32, #tpu.memory_space<vmem>>, vector<1x1x8x8xf32>
    %96 = vector.shape_cast %95 : vector<1x1x8x8xf32> to vector<8x8xf32>
    %97 = vector.extract_strided_slice %80 {offsets = [0, 96], sizes = [8, 32], strides = [1, 1]} : vector<16x128xf32> to vector<8x32xf32>
    %cst_83 = arith.constant dense<0.000000e+00> : vector<8x32xf32>
    %98 = tpu.matmul %96, %97, %cst_83 {dimension_numbers = #tpu.dot_dimension_numbers<[1], [0], [0], [1], [0, 0, 1, 1], [], []>} : vector<8x8xf32>, vector<8x32xf32>, vector<8x32xf32> -> vector<8x32xf32>
    %99 = arith.addf %94, %98 : vector<8x32xf32>
    %c0_84 = arith.constant 0 : index
    %c0_85 = arith.constant 0 : index
    %100 = vector.load %arg33[%c0_84, %c0_85] : memref<16x32xf32, #tpu.memory_space<vmem>>, vector<8x32xf32>
    tpu.vector_store %arg33[%c0_84, %c0_85], %99 {strides = array<i32>} : memref<16x32xf32, #tpu.memory_space<vmem>>, vector<8x32xf32>,
    %c1_86 = arith.constant 1 : index
    %c0_87 = arith.constant 0 : index
    %c0_88 = arith.constant 0 : index
    %c0_89 = arith.constant 0 : index
    %101 = vector.load %arg3[%c1_86, %c0_87, %c0_88, %c0_89] : memref<2x4x8x8xf32, #tpu.memory_space<vmem>>, vector<1x1x8x8xf32>
    %102 = vector.shape_cast %101 : vector<1x1x8x8xf32> to vector<8x8xf32>
    %103 = vector.extract_strided_slice %80 {offsets = [8, 0], sizes = [8, 32], strides = [1, 1]} : vector<16x128xf32> to vector<8x32xf32>
    %cst_90 = arith.constant dense<0.000000e+00> : vector<8x32xf32>
    %104 = tpu.matmul %102, %103, %cst_90 {dimension_numbers = #tpu.dot_dimension_numbers<[1], [0], [0], [1], [0, 0, 1, 1], [], []>} : vector<8x8xf32>, vector<8x32xf32>, vector<8x32xf32> -> vector<8x32xf32>
    %c1_91 = arith.constant 1 : index
    %c1_92 = arith.constant 1 : index
    %c0_93 = arith.constant 0 : index
    %c0_94 = arith.constant 0 : index
    %105 = vector.load %arg3[%c1_91, %c1_92, %c0_93, %c0_94] : memref<2x4x8x8xf32, #tpu.memory_space<vmem>>, vector<1x1x8x8xf32>
    %106 = vector.shape_cast %105 : vector<1x1x8x8xf32> to vector<8x8xf32>
    %107 = vector.extract_strided_slice %80 {offsets = [8, 32], sizes = [8, 32], strides = [1, 1]} : vector<16x128xf32> to vector<8x32xf32>
    %cst_95 = arith.constant dense<0.000000e+00> : vector<8x32xf32>
    %108 = tpu.matmul %106, %107, %cst_95 {dimension_numbers = #tpu.dot_dimension_numbers<[1], [0], [0], [1], [0, 0, 1, 1], [], []>} : vector<8x8xf32>, vector<8x32xf32>, vector<8x32xf32> -> vector<8x32xf32>
    %109 = arith.addf %104, %108 : vector<8x32xf32>
    %c1_96 = arith.constant 1 : index
    %c2_97 = arith.constant 2 : index
    %c0_98 = arith.constant 0 : index
    %c0_99 = arith.constant 0 : index
    %110 = vector.load %arg3[%c1_96, %c2_97, %c0_98, %c0_99] : memref<2x4x8x8xf32, #tpu.memory_space<vmem>>, vector<1x1x8x8xf32>
    %111 = vector.shape_cast %110 : vector<1x1x8x8xf32> to vector<8x8xf32>
    %112 = vector.extract_strided_slice %80 {offsets = [8, 64], sizes = [8, 32], strides = [1, 1]} : vector<16x128xf32> to vector<8x32xf32>
    %cst_100 = arith.constant dense<0.000000e+00> : vector<8x32xf32>
    %113 = tpu.matmul %111, %112, %cst_100 {dimension_numbers = #tpu.dot_dimension_numbers<[1], [0], [0], [1], [0, 0, 1, 1], [], []>} : vector<8x8xf32>, vector<8x32xf32>, vector<8x32xf32> -> vector<8x32xf32>
    %114 = arith.addf %109, %113 : vector<8x32xf32>
    %c1_101 = arith.constant 1 : index
    %c3_102 = arith.constant 3 : index
    %c0_103 = arith.constant 0 : index
    %c0_104 = arith.constant 0 : index
    %115 = vector.load %arg3[%c1_101, %c3_102, %c0_103, %c0_104] : memref<2x4x8x8xf32, #tpu.memory_space<vmem>>, vector<1x1x8x8xf32>
    %116 = vector.shape_cast %115 : vector<1x1x8x8xf32> to vector<8x8xf32>
    %117 = vector.extract_strided_slice %80 {offsets = [8, 96], sizes = [8, 32], strides = [1, 1]} : vector<16x128xf32> to vector<8x32xf32>
    %cst_105 = arith.constant dense<0.000000e+00> : vector<8x32xf32>
    %118 = tpu.matmul %116, %117, %cst_105 {dimension_numbers = #tpu.dot_dimension_numbers<[1], [0], [0], [1], [0, 0, 1, 1], [], []>} : vector<8x8xf32>, vector<8x32xf32>, vector<8x32xf32> -> vector<8x32xf32>
    %119 = arith.addf %114, %118 : vector<8x32xf32>
    %c8_106 = arith.constant 8 : index
    %c0_107 = arith.constant 0 : index
    %120 = vector.load %arg33[%c8_106, %c0_107] : memref<16x32xf32, #tpu.memory_space<vmem>>, vector<8x32xf32>
    tpu.vector_store %arg33[%c8_106, %c0_107], %119 {strides = array<i32>} : memref<16x32xf32, #tpu.memory_space<vmem>>, vector<8x32xf32>,
    %c0_108 = arith.constant 0 : index
    %c0_109 = arith.constant 0 : index
    %121 = vector.load %arg33[%c0_108, %c0_109] : memref<16x32xf32, #tpu.memory_space<vmem>>, vector<16x32xf32>
    %122 = arith.addf %121, %28 : vector<16x32xf32>
    %cst_110 = arith.constant 0.000000e+00 : f32
    %123 = vector.broadcast %cst_110 : f32 to vector<16x32xf32>
    %124 = arith.cmpf oge, %122, %123 : vector<16x32xf32>
    %cst_111 = arith.constant 0.00999999977 : f32
    %125 = vector.broadcast %cst_111 : f32 to vector<16x32xf32>
    %126 = arith.mulf %125, %122 : vector<16x32xf32>
    %127 = arith.select %124, %122, %126 : vector<16x32xi1>, vector<16x32xf32>
    %c0_112 = arith.constant 0 : index
    %c0_113 = arith.constant 0 : index
    %c0_114 = arith.constant 0 : index
    %128 = vector.load %arg9[%c0_112, %c0_113, %c0_114] : memref<2x32x32xf32, #tpu.memory_space<vmem>>, vector<1x32x32xf32>
    %129 = vector.shape_cast %128 : vector<1x32x32xf32> to vector<32x32xf32>
    %cst_115 = arith.constant dense<0.000000e+00> : vector<16x32xf32>
    %130 = tpu.matmul %127, %129, %cst_115 {dimension_numbers = #tpu.dot_dimension_numbers<[1], [0], [0], [1], [0, 0, 1, 1], [], []>} : vector<16x32xf32>, vector<32x32xf32>, vector<16x32xf32> -> vector<16x32xf32>
    %c0_116 = arith.constant 0 : index
    %c0_117 = arith.constant 0 : index
    %c0_118 = arith.constant 0 : index
    %131 = vector.load %arg10[%c0_116, %c0_117, %c0_118] : memref<2x1x32xf32, #tpu.memory_space<vmem>>, vector<1x1x32xf32>
    %132 = vector.shape_cast %131 : vector<1x1x32xf32> to vector<1x32xf32>
    %133 = vector.broadcast %132 : vector<1x32xf32> to vector<16x32xf32>
    %134 = arith.addf %130, %133 : vector<16x32xf32>
    %cst_119 = arith.constant 0.000000e+00 : f32
    %135 = vector.broadcast %cst_119 : f32 to vector<16x32xf32>
    %136 = arith.cmpf oge, %134, %135 : vector<16x32xf32>
    %cst_120 = arith.constant 0.00999999977 : f32
    %137 = vector.broadcast %cst_120 : f32 to vector<16x32xf32>
    %138 = arith.mulf %137, %134 : vector<16x32xf32>
    %139 = arith.select %136, %134, %138 : vector<16x32xi1>, vector<16x32xf32>
    %cst_121 = arith.constant dense<0.000000e+00> : vector<16xf32>
    %140 = vector.multi_reduction <add>, %139, %cst_121 [1] : vector<16x32xf32> to vector<16xf32>
    %141 = vector.shape_cast %140 : vector<16xf32> to vector<16x1xf32>
    %cst_122 = arith.constant 3.200000e+01 : f32
    %142 = vector.broadcast %cst_122 : f32 to vector<16x1xf32>
    %143 = arith.divf %141, %142 : vector<16x1xf32>
    %144 = vector.broadcast %143 : vector<16x1xf32> to vector<16x32xf32>
    %145 = arith.subf %139, %144 : vector<16x32xf32>
    %146 = arith.mulf %145, %145 : vector<16x32xf32>
    %cst_123 = arith.constant dense<0.000000e+00> : vector<16xf32>
    %147 = vector.multi_reduction <add>, %146, %cst_123 [1] : vector<16x32xf32> to vector<16xf32>
    %148 = vector.shape_cast %147 : vector<16xf32> to vector<16x1xf32>
    %cst_124 = arith.constant 3.200000e+01 : f32
    %149 = vector.broadcast %cst_124 : f32 to vector<16x1xf32>
    %150 = arith.divf %148, %149 : vector<16x1xf32>
    %151 = vector.broadcast %143 : vector<16x1xf32> to vector<16x32xf32>
    %152 = arith.subf %139, %151 : vector<16x32xf32>
    %cst_125 = arith.constant 9.99999974E-6 : f32
    %153 = vector.broadcast %cst_125 : f32 to vector<16x1xf32>
    %154 = arith.addf %150, %153 : vector<16x1xf32>
    %155 = math.rsqrt %154 : vector<16x1xf32>
    %156 = vector.broadcast %155 : vector<16x1xf32> to vector<16x32xf32>
    %157 = arith.mulf %152, %156 : vector<16x32xf32>
    %c1_126 = arith.constant 1 : index
    %c0_127 = arith.constant 0 : index
    %c0_128 = arith.constant 0 : index
    %158 = vector.load %arg7[%c1_126, %c0_127, %c0_128] : memref<2x32x128xf32, #tpu.memory_space<vmem>>, vector<1x32x128xf32>
    %159 = vector.shape_cast %158 : vector<1x32x128xf32> to vector<32x128xf32>
    %cst_129 = arith.constant dense<0.000000e+00> : vector<16x128xf32>
    %160 = tpu.matmul %157, %159, %cst_129 {dimension_numbers = #tpu.dot_dimension_numbers<[1], [0], [0], [1], [0, 0, 1, 1], [], []>} : vector<16x32xf32>, vector<32x128xf32>, vector<16x128xf32> -> vector<16x128xf32>
    %c0_130 = arith.constant 0 : index
    %c0_131 = arith.constant 0 : index
    %c0_132 = arith.constant 0 : index
    %c0_133 = arith.constant 0 : index
    %161 = vector.load %arg2[%c0_130, %c0_131, %c0_132, %c0_133] : memref<2x4x8x8xf32, #tpu.memory_space<vmem>>, vector<1x1x8x8xf32>
    %162 = vector.shape_cast %161 : vector<1x1x8x8xf32> to vector<8x8xf32>
    %163 = vector.extract_strided_slice %160 {offsets = [0, 0], sizes = [8, 32], strides = [1, 1]} : vector<16x128xf32> to vector<8x32xf32>
    %cst_134 = arith.constant dense<0.000000e+00> : vector<8x32xf32>
    %164 = tpu.matmul %162, %163, %cst_134 {dimension_numbers = #tpu.dot_dimension_numbers<[1], [0], [0], [1], [0, 0, 1, 1], [], []>} : vector<8x8xf32>, vector<8x32xf32>, vector<8x32xf32> -> vector<8x32xf32>
    %c0_135 = arith.constant 0 : index
    %c1_136 = arith.constant 1 : index
    %c0_137 = arith.constant 0 : index
    %c0_138 = arith.constant 0 : index
    %165 = vector.load %arg2[%c0_135, %c1_136, %c0_137, %c0_138] : memref<2x4x8x8xf32, #tpu.memory_space<vmem>>, vector<1x1x8x8xf32>
    %166 = vector.shape_cast %165 : vector<1x1x8x8xf32> to vector<8x8xf32>
    %167 = vector.extract_strided_slice %160 {offsets = [0, 32], sizes = [8, 32], strides = [1, 1]} : vector<16x128xf32> to vector<8x32xf32>
    %cst_139 = arith.constant dense<0.000000e+00> : vector<8x32xf32>
    %168 = tpu.matmul %166, %167, %cst_139 {dimension_numbers = #tpu.dot_dimension_numbers<[1], [0], [0], [1], [0, 0, 1, 1], [], []>} : vector<8x8xf32>, vector<8x32xf32>, vector<8x32xf32> -> vector<8x32xf32>
    %169 = arith.addf %164, %168 : vector<8x32xf32>
    %c0_140 = arith.constant 0 : index
    %c2_141 = arith.constant 2 : index
    %c0_142 = arith.constant 0 : index
    %c0_143 = arith.constant 0 : index
    %170 = vector.load %arg2[%c0_140, %c2_141, %c0_142, %c0_143] : memref<2x4x8x8xf32, #tpu.memory_space<vmem>>, vector<1x1x8x8xf32>
    %171 = vector.shape_cast %170 : vector<1x1x8x8xf32> to vector<8x8xf32>
    %172 = vector.extract_strided_slice %160 {offsets = [0, 64], sizes = [8, 32], strides = [1, 1]} : vector<16x128xf32> to vector<8x32xf32>
    %cst_144 = arith.constant dense<0.000000e+00> : vector<8x32xf32>
    %173 = tpu.matmul %171, %172, %cst_144 {dimension_numbers = #tpu.dot_dimension_numbers<[1], [0], [0], [1], [0, 0, 1, 1], [], []>} : vector<8x8xf32>, vector<8x32xf32>, vector<8x32xf32> -> vector<8x32xf32>
    %174 = arith.addf %169, %173 : vector<8x32xf32>
    %c0_145 = arith.constant 0 : index
    %c3_146 = arith.constant 3 : index
    %c0_147 = arith.constant 0 : index
    %c0_148 = arith.constant 0 : index
    %175 = vector.load %arg2[%c0_145, %c3_146, %c0_147, %c0_148] : memref<2x4x8x8xf32, #tpu.memory_space<vmem>>, vector<1x1x8x8xf32>
    %176 = vector.shape_cast %175 : vector<1x1x8x8xf32> to vector<8x8xf32>
    %177 = vector.extract_strided_slice %160 {offsets = [0, 96], sizes = [8, 32], strides = [1, 1]} : vector<16x128xf32> to vector<8x32xf32>
    %cst_149 = arith.constant dense<0.000000e+00> : vector<8x32xf32>
    %178 = tpu.matmul %176, %177, %cst_149 {dimension_numbers = #tpu.dot_dimension_numbers<[1], [0], [0], [1], [0, 0, 1, 1], [], []>} : vector<8x8xf32>, vector<8x32xf32>, vector<8x32xf32> -> vector<8x32xf32>
    %179 = arith.addf %174, %178 : vector<8x32xf32>
    %c0_150 = arith.constant 0 : index
    %c0_151 = arith.constant 0 : index
    %180 = vector.load %arg32[%c0_150, %c0_151] : memref<16x32xf32, #tpu.memory_space<vmem>>, vector<8x32xf32>
    tpu.vector_store %arg32[%c0_150, %c0_151], %179 {strides = array<i32>} : memref<16x32xf32, #tpu.memory_space<vmem>>, vector<8x32xf32>,
    %c1_152 = arith.constant 1 : index
    %c0_153 = arith.constant 0 : index
    %c0_154 = arith.constant 0 : index
    %c0_155 = arith.constant 0 : index
    %181 = vector.load %arg2[%c1_152, %c0_153, %c0_154, %c0_155] : memref<2x4x8x8xf32, #tpu.memory_space<vmem>>, vector<1x1x8x8xf32>
    %182 = vector.shape_cast %181 : vector<1x1x8x8xf32> to vector<8x8xf32>
    %183 = vector.extract_strided_slice %160 {offsets = [8, 0], sizes = [8, 32], strides = [1, 1]} : vector<16x128xf32> to vector<8x32xf32>
    %cst_156 = arith.constant dense<0.000000e+00> : vector<8x32xf32>
    %184 = tpu.matmul %182, %183, %cst_156 {dimension_numbers = #tpu.dot_dimension_numbers<[1], [0], [0], [1], [0, 0, 1, 1], [], []>} : vector<8x8xf32>, vector<8x32xf32>, vector<8x32xf32> -> vector<8x32xf32>
    %c1_157 = arith.constant 1 : index
    %c1_158 = arith.constant 1 : index
    %c0_159 = arith.constant 0 : index
    %c0_160 = arith.constant 0 : index
    %185 = vector.load %arg2[%c1_157, %c1_158, %c0_159, %c0_160] : memref<2x4x8x8xf32, #tpu.memory_space<vmem>>, vector<1x1x8x8xf32>
    %186 = vector.shape_cast %185 : vector<1x1x8x8xf32> to vector<8x8xf32>
    %187 = vector.extract_strided_slice %160 {offsets = [8, 32], sizes = [8, 32], strides = [1, 1]} : vector<16x128xf32> to vector<8x32xf32>
    %cst_161 = arith.constant dense<0.000000e+00> : vector<8x32xf32>
    %188 = tpu.matmul %186, %187, %cst_161 {dimension_numbers = #tpu.dot_dimension_numbers<[1], [0], [0], [1], [0, 0, 1, 1], [], []>} : vector<8x8xf32>, vector<8x32xf32>, vector<8x32xf32> -> vector<8x32xf32>
    %189 = arith.addf %184, %188 : vector<8x32xf32>
    %c1_162 = arith.constant 1 : index
    %c2_163 = arith.constant 2 : index
    %c0_164 = arith.constant 0 : index
    %c0_165 = arith.constant 0 : index
    %190 = vector.load %arg2[%c1_162, %c2_163, %c0_164, %c0_165] : memref<2x4x8x8xf32, #tpu.memory_space<vmem>>, vector<1x1x8x8xf32>
    %191 = vector.shape_cast %190 : vector<1x1x8x8xf32> to vector<8x8xf32>
    %192 = vector.extract_strided_slice %160 {offsets = [8, 64], sizes = [8, 32], strides = [1, 1]} : vector<16x128xf32> to vector<8x32xf32>
    %cst_166 = arith.constant dense<0.000000e+00> : vector<8x32xf32>
    %193 = tpu.matmul %191, %192, %cst_166 {dimension_numbers = #tpu.dot_dimension_numbers<[1], [0], [0], [1], [0, 0, 1, 1], [], []>} : vector<8x8xf32>, vector<8x32xf32>, vector<8x32xf32> -> vector<8x32xf32>
    %194 = arith.addf %189, %193 : vector<8x32xf32>
    %c1_167 = arith.constant 1 : index
    %c3_168 = arith.constant 3 : index
    %c0_169 = arith.constant 0 : index
    %c0_170 = arith.constant 0 : index
    %195 = vector.load %arg2[%c1_167, %c3_168, %c0_169, %c0_170] : memref<2x4x8x8xf32, #tpu.memory_space<vmem>>, vector<1x1x8x8xf32>
    %196 = vector.shape_cast %195 : vector<1x1x8x8xf32> to vector<8x8xf32>
    %197 = vector.extract_strided_slice %160 {offsets = [8, 96], sizes = [8, 32], strides = [1, 1]} : vector<16x128xf32> to vector<8x32xf32>
    %cst_171 = arith.constant dense<0.000000e+00> : vector<8x32xf32>
    %198 = tpu.matmul %196, %197, %cst_171 {dimension_numbers = #tpu.dot_dimension_numbers<[1], [0], [0], [1], [0, 0, 1, 1], [], []>} : vector<8x8xf32>, vector<8x32xf32>, vector<8x32xf32> -> vector<8x32xf32>
    %199 = arith.addf %194, %198 : vector<8x32xf32>
    %c8_172 = arith.constant 8 : index
    %c0_173 = arith.constant 0 : index
    %200 = vector.load %arg32[%c8_172, %c0_173] : memref<16x32xf32, #tpu.memory_space<vmem>>, vector<8x32xf32>
    tpu.vector_store %arg32[%c8_172, %c0_173], %199 {strides = array<i32>} : memref<16x32xf32, #tpu.memory_space<vmem>>, vector<8x32xf32>,
    %c0_174 = arith.constant 0 : index
    %c0_175 = arith.constant 0 : index
    %201 = vector.load %arg32[%c0_174, %c0_175] : memref<16x32xf32, #tpu.memory_space<vmem>>, vector<16x32xf32>
    %cst_176 = arith.constant 0.000000e+00 : f32
    %202 = vector.broadcast %cst_176 : f32 to vector<16x32xf32>
    %203 = arith.cmpf oge, %201, %202 : vector<16x32xf32>
    %cst_177 = arith.constant 0.00999999977 : f32
    %204 = vector.broadcast %cst_177 : f32 to vector<16x32xf32>
    %205 = arith.mulf %204, %201 : vector<16x32xf32>
    %206 = arith.select %203, %201, %205 : vector<16x32xi1>, vector<16x32xf32>
    %c1_178 = arith.constant 1 : index
    %c0_179 = arith.constant 0 : index
    %c0_180 = arith.constant 0 : index
    %207 = vector.load %arg8[%c1_178, %c0_179, %c0_180] : memref<2x32x128xf32, #tpu.memory_space<vmem>>, vector<1x32x128xf32>
    %208 = vector.shape_cast %207 : vector<1x32x128xf32> to vector<32x128xf32>
    %cst_181 = arith.constant dense<0.000000e+00> : vector<16x128xf32>
    %209 = tpu.matmul %206, %208, %cst_181 {dimension_numbers = #tpu.dot_dimension_numbers<[1], [0], [0], [1], [0, 0, 1, 1], [], []>} : vector<16x32xf32>, vector<32x128xf32>, vector<16x128xf32> -> vector<16x128xf32>
    %c0_182 = arith.constant 0 : index
    %c0_183 = arith.constant 0 : index
    %c0_184 = arith.constant 0 : index
    %c0_185 = arith.constant 0 : index
    %210 = vector.load %arg3[%c0_182, %c0_183, %c0_184, %c0_185] : memref<2x4x8x8xf32, #tpu.memory_space<vmem>>, vector<1x1x8x8xf32>
    %211 = vector.shape_cast %210 : vector<1x1x8x8xf32> to vector<8x8xf32>
    %212 = vector.extract_strided_slice %209 {offsets = [0, 0], sizes = [8, 32], strides = [1, 1]} : vector<16x128xf32> to vector<8x32xf32>
    %cst_186 = arith.constant dense<0.000000e+00> : vector<8x32xf32>
    %213 = tpu.matmul %211, %212, %cst_186 {dimension_numbers = #tpu.dot_dimension_numbers<[1], [0], [0], [1], [0, 0, 1, 1], [], []>} : vector<8x8xf32>, vector<8x32xf32>, vector<8x32xf32> -> vector<8x32xf32>
    %c0_187 = arith.constant 0 : index
    %c1_188 = arith.constant 1 : index
    %c0_189 = arith.constant 0 : index
    %c0_190 = arith.constant 0 : index
    %214 = vector.load %arg3[%c0_187, %c1_188, %c0_189, %c0_190] : memref<2x4x8x8xf32, #tpu.memory_space<vmem>>, vector<1x1x8x8xf32>
    %215 = vector.shape_cast %214 : vector<1x1x8x8xf32> to vector<8x8xf32>
    %216 = vector.extract_strided_slice %209 {offsets = [0, 32], sizes = [8, 32], strides = [1, 1]} : vector<16x128xf32> to vector<8x32xf32>
    %cst_191 = arith.constant dense<0.000000e+00> : vector<8x32xf32>
    %217 = tpu.matmul %215, %216, %cst_191 {dimension_numbers = #tpu.dot_dimension_numbers<[1], [0], [0], [1], [0, 0, 1, 1], [], []>} : vector<8x8xf32>, vector<8x32xf32>, vector<8x32xf32> -> vector<8x32xf32>
    %218 = arith.addf %213, %217 : vector<8x32xf32>
    %c0_192 = arith.constant 0 : index
    %c2_193 = arith.constant 2 : index
    %c0_194 = arith.constant 0 : index
    %c0_195 = arith.constant 0 : index
    %219 = vector.load %arg3[%c0_192, %c2_193, %c0_194, %c0_195] : memref<2x4x8x8xf32, #tpu.memory_space<vmem>>, vector<1x1x8x8xf32>
    %220 = vector.shape_cast %219 : vector<1x1x8x8xf32> to vector<8x8xf32>
    %221 = vector.extract_strided_slice %209 {offsets = [0, 64], sizes = [8, 32], strides = [1, 1]} : vector<16x128xf32> to vector<8x32xf32>
    %cst_196 = arith.constant dense<0.000000e+00> : vector<8x32xf32>
    %222 = tpu.matmul %220, %221, %cst_196 {dimension_numbers = #tpu.dot_dimension_numbers<[1], [0], [0], [1], [0, 0, 1, 1], [], []>} : vector<8x8xf32>, vector<8x32xf32>, vector<8x32xf32> -> vector<8x32xf32>
    %223 = arith.addf %218, %222 : vector<8x32xf32>
    %c0_197 = arith.constant 0 : index
    %c3_198 = arith.constant 3 : index
    %c0_199 = arith.constant 0 : index
    %c0_200 = arith.constant 0 : index
    %224 = vector.load %arg3[%c0_197, %c3_198, %c0_199, %c0_200] : memref<2x4x8x8xf32, #tpu.memory_space<vmem>>, vector<1x1x8x8xf32>
    %225 = vector.shape_cast %224 : vector<1x1x8x8xf32> to vector<8x8xf32>
    %226 = vector.extract_strided_slice %209 {offsets = [0, 96], sizes = [8, 32], strides = [1, 1]} : vector<16x128xf32> to vector<8x32xf32>
    %cst_201 = arith.constant dense<0.000000e+00> : vector<8x32xf32>
    %227 = tpu.matmul %225, %226, %cst_201 {dimension_numbers = #tpu.dot_dimension_numbers<[1], [0], [0], [1], [0, 0, 1, 1], [], []>} : vector<8x8xf32>, vector<8x32xf32>, vector<8x32xf32> -> vector<8x32xf32>
    %228 = arith.addf %223, %227 : vector<8x32xf32>
    %c0_202 = arith.constant 0 : index
    %c0_203 = arith.constant 0 : index
    %229 = vector.load %arg33[%c0_202, %c0_203] : memref<16x32xf32, #tpu.memory_space<vmem>>, vector<8x32xf32>
    tpu.vector_store %arg33[%c0_202, %c0_203], %228 {strides = array<i32>} : memref<16x32xf32, #tpu.memory_space<vmem>>, vector<8x32xf32>,
    %c1_204 = arith.constant 1 : index
    %c0_205 = arith.constant 0 : index
    %c0_206 = arith.constant 0 : index
    %c0_207 = arith.constant 0 : index
    %230 = vector.load %arg3[%c1_204, %c0_205, %c0_206, %c0_207] : memref<2x4x8x8xf32, #tpu.memory_space<vmem>>, vector<1x1x8x8xf32>
    %231 = vector.shape_cast %230 : vector<1x1x8x8xf32> to vector<8x8xf32>
    %232 = vector.extract_strided_slice %209 {offsets = [8, 0], sizes = [8, 32], strides = [1, 1]} : vector<16x128xf32> to vector<8x32xf32>
    %cst_208 = arith.constant dense<0.000000e+00> : vector<8x32xf32>
    %233 = tpu.matmul %231, %232, %cst_208 {dimension_numbers = #tpu.dot_dimension_numbers<[1], [0], [0], [1], [0, 0, 1, 1], [], []>} : vector<8x8xf32>, vector<8x32xf32>, vector<8x32xf32> -> vector<8x32xf32>
    %c1_209 = arith.constant 1 : index
    %c1_210 = arith.constant 1 : index
    %c0_211 = arith.constant 0 : index
    %c0_212 = arith.constant 0 : index
    %234 = vector.load %arg3[%c1_209, %c1_210, %c0_211, %c0_212] : memref<2x4x8x8xf32, #tpu.memory_space<vmem>>, vector<1x1x8x8xf32>
    %235 = vector.shape_cast %234 : vector<1x1x8x8xf32> to vector<8x8xf32>
    %236 = vector.extract_strided_slice %209 {offsets = [8, 32], sizes = [8, 32], strides = [1, 1]} : vector<16x128xf32> to vector<8x32xf32>
    %cst_213 = arith.constant dense<0.000000e+00> : vector<8x32xf32>
    %237 = tpu.matmul %235, %236, %cst_213 {dimension_numbers = #tpu.dot_dimension_numbers<[1], [0], [0], [1], [0, 0, 1, 1], [], []>} : vector<8x8xf32>, vector<8x32xf32>, vector<8x32xf32> -> vector<8x32xf32>
    %238 = arith.addf %233, %237 : vector<8x32xf32>
    %c1_214 = arith.constant 1 : index
    %c2_215 = arith.constant 2 : index
    %c0_216 = arith.constant 0 : index
    %c0_217 = arith.constant 0 : index
    %239 = vector.load %arg3[%c1_214, %c2_215, %c0_216, %c0_217] : memref<2x4x8x8xf32, #tpu.memory_space<vmem>>, vector<1x1x8x8xf32>
    %240 = vector.shape_cast %239 : vector<1x1x8x8xf32> to vector<8x8xf32>
    %241 = vector.extract_strided_slice %209 {offsets = [8, 64], sizes = [8, 32], strides = [1, 1]} : vector<16x128xf32> to vector<8x32xf32>
    %cst_218 = arith.constant dense<0.000000e+00> : vector<8x32xf32>
    %242 = tpu.matmul %240, %241, %cst_218 {dimension_numbers = #tpu.dot_dimension_numbers<[1], [0], [0], [1], [0, 0, 1, 1], [], []>} : vector<8x8xf32>, vector<8x32xf32>, vector<8x32xf32> -> vector<8x32xf32>
    %243 = arith.addf %238, %242 : vector<8x32xf32>
    %c1_219 = arith.constant 1 : index
    %c3_220 = arith.constant 3 : index
    %c0_221 = arith.constant 0 : index
    %c0_222 = arith.constant 0 : index
    %244 = vector.load %arg3[%c1_219, %c3_220, %c0_221, %c0_222] : memref<2x4x8x8xf32, #tpu.memory_space<vmem>>, vector<1x1x8x8xf32>
    %245 = vector.shape_cast %244 : vector<1x1x8x8xf32> to vector<8x8xf32>
    %246 = vector.extract_strided_slice %209 {offsets = [8, 96], sizes = [8, 32], strides = [1, 1]} : vector<16x128xf32> to vector<8x32xf32>
    %cst_223 = arith.constant dense<0.000000e+00> : vector<8x32xf32>
    %247 = tpu.matmul %245, %246, %cst_223 {dimension_numbers = #tpu.dot_dimension_numbers<[1], [0], [0], [1], [0, 0, 1, 1], [], []>} : vector<8x8xf32>, vector<8x32xf32>, vector<8x32xf32> -> vector<8x32xf32>
    %248 = arith.addf %243, %247 : vector<8x32xf32>
    %c8_224 = arith.constant 8 : index
    %c0_225 = arith.constant 0 : index
    %249 = vector.load %arg33[%c8_224, %c0_225] : memref<16x32xf32, #tpu.memory_space<vmem>>, vector<8x32xf32>
    tpu.vector_store %arg33[%c8_224, %c0_225], %248 {strides = array<i32>} : memref<16x32xf32, #tpu.memory_space<vmem>>, vector<8x32xf32>,
    %c0_226 = arith.constant 0 : index
    %c0_227 = arith.constant 0 : index
    %250 = vector.load %arg33[%c0_226, %c0_227] : memref<16x32xf32, #tpu.memory_space<vmem>>, vector<16x32xf32>
    %251 = arith.addf %250, %157 : vector<16x32xf32>
    %cst_228 = arith.constant 0.000000e+00 : f32
    %252 = vector.broadcast %cst_228 : f32 to vector<16x32xf32>
    %253 = arith.cmpf oge, %251, %252 : vector<16x32xf32>
    %cst_229 = arith.constant 0.00999999977 : f32
    %254 = vector.broadcast %cst_229 : f32 to vector<16x32xf32>
    %255 = arith.mulf %254, %251 : vector<16x32xf32>
    %256 = arith.select %253, %251, %255 : vector<16x32xi1>, vector<16x32xf32>
    %c1_230 = arith.constant 1 : index
    %c0_231 = arith.constant 0 : index
    %c0_232 = arith.constant 0 : index
    %257 = vector.load %arg9[%c1_230, %c0_231, %c0_232] : memref<2x32x32xf32, #tpu.memory_space<vmem>>, vector<1x32x32xf32>
    %258 = vector.shape_cast %257 : vector<1x32x32xf32> to vector<32x32xf32>
    %cst_233 = arith.constant dense<0.000000e+00> : vector<16x32xf32>
    %259 = tpu.matmul %256, %258, %cst_233 {dimension_numbers = #tpu.dot_dimension_numbers<[1], [0], [0], [1], [0, 0, 1, 1], [], []>} : vector<16x32xf32>, vector<32x32xf32>, vector<16x32xf32> -> vector<16x32xf32>
    %c1_234 = arith.constant 1 : index
    %c0_235 = arith.constant 0 : index
    %c0_236 = arith.constant 0 : index
    %260 = vector.load %arg10[%c1_234, %c0_235, %c0_236] : memref<2x1x32xf32, #tpu.memory_space<vmem>>, vector<1x1x32xf32>
    %261 = vector.shape_cast %260 : vector<1x1x32xf32> to vector<1x32xf32>
    %262 = vector.broadcast %261 : vector<1x32xf32> to vector<16x32xf32>
    %263 = arith.addf %259, %262 : vector<16x32xf32>
    %cst_237 = arith.constant 0.000000e+00 : f32
    %264 = vector.broadcast %cst_237 : f32 to vector<16x32xf32>
    %265 = arith.cmpf oge, %263, %264 : vector<16x32xf32>
    %cst_238 = arith.constant 0.00999999977 : f32
    %266 = vector.broadcast %cst_238 : f32 to vector<16x32xf32>
    %267 = arith.mulf %266, %263 : vector<16x32xf32>
    %268 = arith.select %265, %263, %267 : vector<16x32xi1>, vector<16x32xf32>
    %cst_239 = arith.constant dense<0.000000e+00> : vector<16xf32>
    %269 = vector.multi_reduction <add>, %268, %cst_239 [1] : vector<16x32xf32> to vector<16xf32>
    %270 = vector.shape_cast %269 : vector<16xf32> to vector<16x1xf32>
    %cst_240 = arith.constant 3.200000e+01 : f32
    %271 = vector.broadcast %cst_240 : f32 to vector<16x1xf32>
    %272 = arith.divf %270, %271 : vector<16x1xf32>
    %273 = vector.broadcast %272 : vector<16x1xf32> to vector<16x32xf32>
    %274 = arith.subf %268, %273 : vector<16x32xf32>
    %275 = arith.mulf %274, %274 : vector<16x32xf32>
    %cst_241 = arith.constant dense<0.000000e+00> : vector<16xf32>
    %276 = vector.multi_reduction <add>, %275, %cst_241 [1] : vector<16x32xf32> to vector<16xf32>
    %277 = vector.shape_cast %276 : vector<16xf32> to vector<16x1xf32>
    %cst_242 = arith.constant 3.200000e+01 : f32
    %278 = vector.broadcast %cst_242 : f32 to vector<16x1xf32>
    %279 = arith.divf %277, %278 : vector<16x1xf32>
    %280 = vector.broadcast %272 : vector<16x1xf32> to vector<16x32xf32>
    %281 = arith.subf %268, %280 : vector<16x32xf32>
    %cst_243 = arith.constant 9.99999974E-6 : f32
    %282 = vector.broadcast %cst_243 : f32 to vector<16x1xf32>
    %283 = arith.addf %279, %282 : vector<16x1xf32>
    %284 = math.rsqrt %283 : vector<16x1xf32>
    %285 = vector.broadcast %284 : vector<16x1xf32> to vector<16x32xf32>
    %286 = arith.mulf %281, %285 : vector<16x32xf32>
    %c0_244 = arith.constant 0 : index
    %c0_245 = arith.constant 0 : index
    %287 = vector.load %arg11[%c0_244, %c0_245] : memref<32x128xf32, #tpu.memory_space<vmem>>, vector<32x128xf32>
    %cst_246 = arith.constant dense<0.000000e+00> : vector<16x128xf32>
    %288 = tpu.matmul %286, %287, %cst_246 {dimension_numbers = #tpu.dot_dimension_numbers<[1], [0], [0], [1], [0, 0, 1, 1], [], []>} : vector<16x32xf32>, vector<32x128xf32>, vector<16x128xf32> -> vector<16x128xf32>
    %c0_247 = arith.constant 0 : index
    %c0_248 = arith.constant 0 : index
    %c0_249 = arith.constant 0 : index
    %c0_250 = arith.constant 0 : index
    %289 = vector.load %arg2[%c0_247, %c0_248, %c0_249, %c0_250] : memref<2x4x8x8xf32, #tpu.memory_space<vmem>>, vector<1x1x8x8xf32>
    %290 = vector.shape_cast %289 : vector<1x1x8x8xf32> to vector<8x8xf32>
    %291 = vector.extract_strided_slice %288 {offsets = [0, 0], sizes = [8, 32], strides = [1, 1]} : vector<16x128xf32> to vector<8x32xf32>
    %cst_251 = arith.constant dense<0.000000e+00> : vector<8x32xf32>
    %292 = tpu.matmul %290, %291, %cst_251 {dimension_numbers = #tpu.dot_dimension_numbers<[1], [0], [0], [1], [0, 0, 1, 1], [], []>} : vector<8x8xf32>, vector<8x32xf32>, vector<8x32xf32> -> vector<8x32xf32>
    %c0_252 = arith.constant 0 : index
    %c1_253 = arith.constant 1 : index
    %c0_254 = arith.constant 0 : index
    %c0_255 = arith.constant 0 : index
    %293 = vector.load %arg2[%c0_252, %c1_253, %c0_254, %c0_255] : memref<2x4x8x8xf32, #tpu.memory_space<vmem>>, vector<1x1x8x8xf32>
    %294 = vector.shape_cast %293 : vector<1x1x8x8xf32> to vector<8x8xf32>
    %295 = vector.extract_strided_slice %288 {offsets = [0, 32], sizes = [8, 32], strides = [1, 1]} : vector<16x128xf32> to vector<8x32xf32>
    %cst_256 = arith.constant dense<0.000000e+00> : vector<8x32xf32>
    %296 = tpu.matmul %294, %295, %cst_256 {dimension_numbers = #tpu.dot_dimension_numbers<[1], [0], [0], [1], [0, 0, 1, 1], [], []>} : vector<8x8xf32>, vector<8x32xf32>, vector<8x32xf32> -> vector<8x32xf32>
    %297 = arith.addf %292, %296 : vector<8x32xf32>
    %c0_257 = arith.constant 0 : index
    %c2_258 = arith.constant 2 : index
    %c0_259 = arith.constant 0 : index
    %c0_260 = arith.constant 0 : index
    %298 = vector.load %arg2[%c0_257, %c2_258, %c0_259, %c0_260] : memref<2x4x8x8xf32, #tpu.memory_space<vmem>>, vector<1x1x8x8xf32>
    %299 = vector.shape_cast %298 : vector<1x1x8x8xf32> to vector<8x8xf32>
    %300 = vector.extract_strided_slice %288 {offsets = [0, 64], sizes = [8, 32], strides = [1, 1]} : vector<16x128xf32> to vector<8x32xf32>
    %cst_261 = arith.constant dense<0.000000e+00> : vector<8x32xf32>
    %301 = tpu.matmul %299, %300, %cst_261 {dimension_numbers = #tpu.dot_dimension_numbers<[1], [0], [0], [1], [0, 0, 1, 1], [], []>} : vector<8x8xf32>, vector<8x32xf32>, vector<8x32xf32> -> vector<8x32xf32>
    %302 = arith.addf %297, %301 : vector<8x32xf32>
    %c0_262 = arith.constant 0 : index
    %c3_263 = arith.constant 3 : index
    %c0_264 = arith.constant 0 : index
    %c0_265 = arith.constant 0 : index
    %303 = vector.load %arg2[%c0_262, %c3_263, %c0_264, %c0_265] : memref<2x4x8x8xf32, #tpu.memory_space<vmem>>, vector<1x1x8x8xf32>
    %304 = vector.shape_cast %303 : vector<1x1x8x8xf32> to vector<8x8xf32>
    %305 = vector.extract_strided_slice %288 {offsets = [0, 96], sizes = [8, 32], strides = [1, 1]} : vector<16x128xf32> to vector<8x32xf32>
    %cst_266 = arith.constant dense<0.000000e+00> : vector<8x32xf32>
    %306 = tpu.matmul %304, %305, %cst_266 {dimension_numbers = #tpu.dot_dimension_numbers<[1], [0], [0], [1], [0, 0, 1, 1], [], []>} : vector<8x8xf32>, vector<8x32xf32>, vector<8x32xf32> -> vector<8x32xf32>
    %307 = arith.addf %302, %306 : vector<8x32xf32>
    %c0_267 = arith.constant 0 : index
    %c0_268 = arith.constant 0 : index
    %308 = vector.load %arg31[%c0_267, %c0_268] : memref<32x32xf32, #tpu.memory_space<vmem>>, vector<8x32xf32>
    tpu.vector_store %arg31[%c0_267, %c0_268], %307 {strides = array<i32>} : memref<32x32xf32, #tpu.memory_space<vmem>>, vector<8x32xf32>,
    %c1_269 = arith.constant 1 : index
    %c0_270 = arith.constant 0 : index
    %c0_271 = arith.constant 0 : index
    %c0_272 = arith.constant 0 : index
    %309 = vector.load %arg2[%c1_269, %c0_270, %c0_271, %c0_272] : memref<2x4x8x8xf32, #tpu.memory_space<vmem>>, vector<1x1x8x8xf32>
    %310 = vector.shape_cast %309 : vector<1x1x8x8xf32> to vector<8x8xf32>
    %311 = vector.extract_strided_slice %288 {offsets = [8, 0], sizes = [8, 32], strides = [1, 1]} : vector<16x128xf32> to vector<8x32xf32>
    %cst_273 = arith.constant dense<0.000000e+00> : vector<8x32xf32>
    %312 = tpu.matmul %310, %311, %cst_273 {dimension_numbers = #tpu.dot_dimension_numbers<[1], [0], [0], [1], [0, 0, 1, 1], [], []>} : vector<8x8xf32>, vector<8x32xf32>, vector<8x32xf32> -> vector<8x32xf32>
    %c1_274 = arith.constant 1 : index
    %c1_275 = arith.constant 1 : index
    %c0_276 = arith.constant 0 : index
    %c0_277 = arith.constant 0 : index
    %313 = vector.load %arg2[%c1_274, %c1_275, %c0_276, %c0_277] : memref<2x4x8x8xf32, #tpu.memory_space<vmem>>, vector<1x1x8x8xf32>
    %314 = vector.shape_cast %313 : vector<1x1x8x8xf32> to vector<8x8xf32>
    %315 = vector.extract_strided_slice %288 {offsets = [8, 32], sizes = [8, 32], strides = [1, 1]} : vector<16x128xf32> to vector<8x32xf32>
    %cst_278 = arith.constant dense<0.000000e+00> : vector<8x32xf32>
    %316 = tpu.matmul %314, %315, %cst_278 {dimension_numbers = #tpu.dot_dimension_numbers<[1], [0], [0], [1], [0, 0, 1, 1], [], []>} : vector<8x8xf32>, vector<8x32xf32>, vector<8x32xf32> -> vector<8x32xf32>
    %317 = arith.addf %312, %316 : vector<8x32xf32>
    %c1_279 = arith.constant 1 : index
    %c2_280 = arith.constant 2 : index
    %c0_281 = arith.constant 0 : index
    %c0_282 = arith.constant 0 : index
    %318 = vector.load %arg2[%c1_279, %c2_280, %c0_281, %c0_282] : memref<2x4x8x8xf32, #tpu.memory_space<vmem>>, vector<1x1x8x8xf32>
    %319 = vector.shape_cast %318 : vector<1x1x8x8xf32> to vector<8x8xf32>
    %320 = vector.extract_strided_slice %288 {offsets = [8, 64], sizes = [8, 32], strides = [1, 1]} : vector<16x128xf32> to vector<8x32xf32>
    %cst_283 = arith.constant dense<0.000000e+00> : vector<8x32xf32>
    %321 = tpu.matmul %319, %320, %cst_283 {dimension_numbers = #tpu.dot_dimension_numbers<[1], [0], [0], [1], [0, 0, 1, 1], [], []>} : vector<8x8xf32>, vector<8x32xf32>, vector<8x32xf32> -> vector<8x32xf32>
    %322 = arith.addf %317, %321 : vector<8x32xf32>
    %c1_284 = arith.constant 1 : index
    %c3_285 = arith.constant 3 : index
    %c0_286 = arith.constant 0 : index
    %c0_287 = arith.constant 0 : index
    %323 = vector.load %arg2[%c1_284, %c3_285, %c0_286, %c0_287] : memref<2x4x8x8xf32, #tpu.memory_space<vmem>>, vector<1x1x8x8xf32>
    %324 = vector.shape_cast %323 : vector<1x1x8x8xf32> to vector<8x8xf32>
    %325 = vector.extract_strided_slice %288 {offsets = [8, 96], sizes = [8, 32], strides = [1, 1]} : vector<16x128xf32> to vector<8x32xf32>
    %cst_288 = arith.constant dense<0.000000e+00> : vector<8x32xf32>
    %326 = tpu.matmul %324, %325, %cst_288 {dimension_numbers = #tpu.dot_dimension_numbers<[1], [0], [0], [1], [0, 0, 1, 1], [], []>} : vector<8x8xf32>, vector<8x32xf32>, vector<8x32xf32> -> vector<8x32xf32>
    %327 = arith.addf %322, %326 : vector<8x32xf32>
    %c8_289 = arith.constant 8 : index
    %c0_290 = arith.constant 0 : index
    %328 = vector.load %arg31[%c8_289, %c0_290] : memref<32x32xf32, #tpu.memory_space<vmem>>, vector<8x32xf32>
    tpu.vector_store %arg31[%c8_289, %c0_290], %327 {strides = array<i32>} : memref<32x32xf32, #tpu.memory_space<vmem>>, vector<8x32xf32>,
    %c16 = arith.constant 16 : index
    %c0_291 = arith.constant 0 : index
    %329 = vector.load %arg31[%c16, %c0_291] : memref<32x32xf32, #tpu.memory_space<vmem>>, vector<16x32xf32>
    tpu.vector_store %arg31[%c16, %c0_291], %268 {strides = array<i32>} : memref<32x32xf32, #tpu.memory_space<vmem>>, vector<16x32xf32>,
    %c0_292 = arith.constant 0 : index
    %c0_293 = arith.constant 0 : index
    %330 = vector.load %arg31[%c0_292, %c0_293] : memref<32x32xf32, #tpu.memory_space<vmem>>, vector<32x32xf32>
    %c0_294 = arith.constant 0 : index
    %c0_295 = arith.constant 0 : index
    %c0_296 = arith.constant 0 : index
    %331 = vector.load %arg4[%c0_294, %c0_295, %c0_296] : memref<1x32x32xf32, #tpu.memory_space<vmem>>, vector<1x32x32xf32>
    %332 = vector.shape_cast %331 : vector<1x32x32xf32> to vector<32x32xf32>
    %c0_297 = arith.constant 0 : index
    %c0_298 = arith.constant 0 : index
    %c0_299 = arith.constant 0 : index
    %333 = vector.load %arg12[%c0_297, %c0_298, %c0_299] : memref<2x32x32xf32, #tpu.memory_space<vmem>>, vector<1x32x32xf32>
    %334 = vector.shape_cast %333 : vector<1x32x32xf32> to vector<32x32xf32>
    %cst_300 = arith.constant dense<0.000000e+00> : vector<32x32xf32>
    %335 = tpu.matmul %330, %334, %cst_300 {dimension_numbers = #tpu.dot_dimension_numbers<[1], [0], [0], [1], [0, 0, 1, 1], [], []>} : vector<32x32xf32>, vector<32x32xf32>, vector<32x32xf32> -> vector<32x32xf32>
    %c0_301 = arith.constant 0 : index
    %c0_302 = arith.constant 0 : index
    %c0_303 = arith.constant 0 : index
    %336 = vector.load %arg13[%c0_301, %c0_302, %c0_303] : memref<2x1x32xf32, #tpu.memory_space<vmem>>, vector<1x1x32xf32>
    %337 = vector.shape_cast %336 : vector<1x1x32xf32> to vector<1x32xf32>
    %338 = vector.broadcast %337 : vector<1x32xf32> to vector<32x32xf32>
    %339 = arith.addf %335, %338 : vector<32x32xf32>
    %c0_304 = arith.constant 0 : index
    %c0_305 = arith.constant 0 : index
    %c0_306 = arith.constant 0 : index
    %340 = vector.load %arg14[%c0_304, %c0_305, %c0_306] : memref<2x32x32xf32, #tpu.memory_space<vmem>>, vector<1x32x32xf32>
    %341 = vector.shape_cast %340 : vector<1x32x32xf32> to vector<32x32xf32>
    %cst_307 = arith.constant dense<0.000000e+00> : vector<32x32xf32>
    %342 = tpu.matmul %330, %341, %cst_307 {dimension_numbers = #tpu.dot_dimension_numbers<[1], [0], [0], [1], [0, 0, 1, 1], [], []>} : vector<32x32xf32>, vector<32x32xf32>, vector<32x32xf32> -> vector<32x32xf32>
    %c0_308 = arith.constant 0 : index
    %c0_309 = arith.constant 0 : index
    %c0_310 = arith.constant 0 : index
    %343 = vector.load %arg15[%c0_308, %c0_309, %c0_310] : memref<2x1x32xf32, #tpu.memory_space<vmem>>, vector<1x1x32xf32>
    %344 = vector.shape_cast %343 : vector<1x1x32xf32> to vector<1x32xf32>
    %345 = vector.broadcast %344 : vector<1x32xf32> to vector<32x32xf32>
    %346 = arith.addf %342, %345 : vector<32x32xf32>
    %c0_311 = arith.constant 0 : index
    %c0_312 = arith.constant 0 : index
    %c0_313 = arith.constant 0 : index
    %347 = vector.load %arg16[%c0_311, %c0_312, %c0_313] : memref<2x32x32xf32, #tpu.memory_space<vmem>>, vector<1x32x32xf32>
    %348 = vector.shape_cast %347 : vector<1x32x32xf32> to vector<32x32xf32>
    %cst_314 = arith.constant dense<0.000000e+00> : vector<32x32xf32>
    %349 = tpu.matmul %330, %348, %cst_314 {dimension_numbers = #tpu.dot_dimension_numbers<[1], [0], [0], [1], [0, 0, 1, 1], [], []>} : vector<32x32xf32>, vector<32x32xf32>, vector<32x32xf32> -> vector<32x32xf32>
    %c0_315 = arith.constant 0 : index
    %c0_316 = arith.constant 0 : index
    %c0_317 = arith.constant 0 : index
    %350 = vector.load %arg17[%c0_315, %c0_316, %c0_317] : memref<2x1x32xf32, #tpu.memory_space<vmem>>, vector<1x1x32xf32>
    %351 = vector.shape_cast %350 : vector<1x1x32xf32> to vector<1x32xf32>
    %352 = vector.broadcast %351 : vector<1x32xf32> to vector<32x32xf32>
    %353 = arith.addf %349, %352 : vector<32x32xf32>
    %354 = vector.extract_strided_slice %339 {offsets = [0, 0], sizes = [32, 8], strides = [1, 1]} : vector<32x32xf32> to vector<32x8xf32>
    %355 = vector.extract_strided_slice %346 {offsets = [0, 0], sizes = [32, 8], strides = [1, 1]} : vector<32x32xf32> to vector<32x8xf32>
    %cst_318 = arith.constant dense<0.000000e+00> : vector<32x32xf32>
    %356 = tpu.matmul %354, %355, %cst_318 {dimension_numbers = #tpu.dot_dimension_numbers<[1], [1], [0], [0], [0, 0, 1, 0], [], []>} : vector<32x8xf32>, vector<32x8xf32>, vector<32x32xf32> -> vector<32x32xf32>
    %cst_319 = arith.constant 0.353553385 : f32
    %357 = vector.broadcast %cst_319 : f32 to vector<32x32xf32>
    %358 = arith.mulf %356, %357 : vector<32x32xf32>
    %359 = arith.addf %358, %332 : vector<32x32xf32>
    %cst_320 = arith.constant dense<0xFF800000> : vector<32xf32>
    %360 = vector.multi_reduction <maximumf>, %359, %cst_320 [1] : vector<32x32xf32> to vector<32xf32>
    %361 = vector.shape_cast %360 : vector<32xf32> to vector<32x1xf32>
    %362 = vector.broadcast %361 : vector<32x1xf32> to vector<32x32xf32>
    %363 = arith.subf %359, %362 : vector<32x32xf32>
    %364 = math.exp %363 : vector<32x32xf32>
    %cst_321 = arith.constant dense<0.000000e+00> : vector<32xf32>
    %365 = vector.multi_reduction <add>, %364, %cst_321 [1] : vector<32x32xf32> to vector<32xf32>
    %366 = vector.shape_cast %365 : vector<32xf32> to vector<32x1xf32>
    %367 = tpu.reciprocal %366 {approx = true} : vector<32x1xf32> -> vector<32x1xf32>
    %368 = vector.broadcast %367 : vector<32x1xf32> to vector<32x32xf32>
    %369 = arith.mulf %364, %368 : vector<32x32xf32>
    %370 = vector.extract_strided_slice %353 {offsets = [0, 0], sizes = [32, 8], strides = [1, 1]} : vector<32x32xf32> to vector<32x8xf32>
    %cst_322 = arith.constant dense<0.000000e+00> : vector<32x8xf32>
    %371 = tpu.matmul %369, %370, %cst_322 {dimension_numbers = #tpu.dot_dimension_numbers<[1], [0], [0], [1], [0, 0, 1, 1], [], []>} : vector<32x32xf32>, vector<32x8xf32>, vector<32x8xf32> -> vector<32x8xf32>
    %372 = vector.extract_strided_slice %339 {offsets = [0, 8], sizes = [32, 8], strides = [1, 1]} : vector<32x32xf32> to vector<32x8xf32>
    %373 = vector.extract_strided_slice %346 {offsets = [0, 8], sizes = [32, 8], strides = [1, 1]} : vector<32x32xf32> to vector<32x8xf32>
    %cst_323 = arith.constant dense<0.000000e+00> : vector<32x32xf32>
    %374 = tpu.matmul %372, %373, %cst_323 {dimension_numbers = #tpu.dot_dimension_numbers<[1], [1], [0], [0], [0, 0, 1, 0], [], []>} : vector<32x8xf32>, vector<32x8xf32>, vector<32x32xf32> -> vector<32x32xf32>
    %cst_324 = arith.constant 0.353553385 : f32
    %375 = vector.broadcast %cst_324 : f32 to vector<32x32xf32>
    %376 = arith.mulf %374, %375 : vector<32x32xf32>
    %377 = arith.addf %376, %332 : vector<32x32xf32>
    %cst_325 = arith.constant dense<0xFF800000> : vector<32xf32>
    %378 = vector.multi_reduction <maximumf>, %377, %cst_325 [1] : vector<32x32xf32> to vector<32xf32>
    %379 = vector.shape_cast %378 : vector<32xf32> to vector<32x1xf32>
    %380 = vector.broadcast %379 : vector<32x1xf32> to vector<32x32xf32>
    %381 = arith.subf %377, %380 : vector<32x32xf32>
    %382 = math.exp %381 : vector<32x32xf32>
    %cst_326 = arith.constant dense<0.000000e+00> : vector<32xf32>
    %383 = vector.multi_reduction <add>, %382, %cst_326 [1] : vector<32x32xf32> to vector<32xf32>
    %384 = vector.shape_cast %383 : vector<32xf32> to vector<32x1xf32>
    %385 = tpu.reciprocal %384 {approx = true} : vector<32x1xf32> -> vector<32x1xf32>
    %386 = vector.broadcast %385 : vector<32x1xf32> to vector<32x32xf32>
    %387 = arith.mulf %382, %386 : vector<32x32xf32>
    %388 = vector.extract_strided_slice %353 {offsets = [0, 8], sizes = [32, 8], strides = [1, 1]} : vector<32x32xf32> to vector<32x8xf32>
    %cst_327 = arith.constant dense<0.000000e+00> : vector<32x8xf32>
    %389 = tpu.matmul %387, %388, %cst_327 {dimension_numbers = #tpu.dot_dimension_numbers<[1], [0], [0], [1], [0, 0, 1, 1], [], []>} : vector<32x32xf32>, vector<32x8xf32>, vector<32x8xf32> -> vector<32x8xf32>
    %390 = vector.extract_strided_slice %339 {offsets = [0, 16], sizes = [32, 8], strides = [1, 1]} : vector<32x32xf32> to vector<32x8xf32>
    %391 = vector.extract_strided_slice %346 {offsets = [0, 16], sizes = [32, 8], strides = [1, 1]} : vector<32x32xf32> to vector<32x8xf32>
    %cst_328 = arith.constant dense<0.000000e+00> : vector<32x32xf32>
    %392 = tpu.matmul %390, %391, %cst_328 {dimension_numbers = #tpu.dot_dimension_numbers<[1], [1], [0], [0], [0, 0, 1, 0], [], []>} : vector<32x8xf32>, vector<32x8xf32>, vector<32x32xf32> -> vector<32x32xf32>
    %cst_329 = arith.constant 0.353553385 : f32
    %393 = vector.broadcast %cst_329 : f32 to vector<32x32xf32>
    %394 = arith.mulf %392, %393 : vector<32x32xf32>
    %395 = arith.addf %394, %332 : vector<32x32xf32>
    %cst_330 = arith.constant dense<0xFF800000> : vector<32xf32>
    %396 = vector.multi_reduction <maximumf>, %395, %cst_330 [1] : vector<32x32xf32> to vector<32xf32>
    %397 = vector.shape_cast %396 : vector<32xf32> to vector<32x1xf32>
    %398 = vector.broadcast %397 : vector<32x1xf32> to vector<32x32xf32>
    %399 = arith.subf %395, %398 : vector<32x32xf32>
    %400 = math.exp %399 : vector<32x32xf32>
    %cst_331 = arith.constant dense<0.000000e+00> : vector<32xf32>
    %401 = vector.multi_reduction <add>, %400, %cst_331 [1] : vector<32x32xf32> to vector<32xf32>
    %402 = vector.shape_cast %401 : vector<32xf32> to vector<32x1xf32>
    %403 = tpu.reciprocal %402 {approx = true} : vector<32x1xf32> -> vector<32x1xf32>
    %404 = vector.broadcast %403 : vector<32x1xf32> to vector<32x32xf32>
    %405 = arith.mulf %400, %404 : vector<32x32xf32>
    %406 = vector.extract_strided_slice %353 {offsets = [0, 16], sizes = [32, 8], strides = [1, 1]} : vector<32x32xf32> to vector<32x8xf32>
    %cst_332 = arith.constant dense<0.000000e+00> : vector<32x8xf32>
    %407 = tpu.matmul %405, %406, %cst_332 {dimension_numbers = #tpu.dot_dimension_numbers<[1], [0], [0], [1], [0, 0, 1, 1], [], []>} : vector<32x32xf32>, vector<32x8xf32>, vector<32x8xf32> -> vector<32x8xf32>
    %408 = vector.extract_strided_slice %339 {offsets = [0, 24], sizes = [32, 8], strides = [1, 1]} : vector<32x32xf32> to vector<32x8xf32>
    %409 = vector.extract_strided_slice %346 {offsets = [0, 24], sizes = [32, 8], strides = [1, 1]} : vector<32x32xf32> to vector<32x8xf32>
    %cst_333 = arith.constant dense<0.000000e+00> : vector<32x32xf32>
    %410 = tpu.matmul %408, %409, %cst_333 {dimension_numbers = #tpu.dot_dimension_numbers<[1], [1], [0], [0], [0, 0, 1, 0], [], []>} : vector<32x8xf32>, vector<32x8xf32>, vector<32x32xf32> -> vector<32x32xf32>
    %cst_334 = arith.constant 0.353553385 : f32
    %411 = vector.broadcast %cst_334 : f32 to vector<32x32xf32>
    %412 = arith.mulf %410, %411 : vector<32x32xf32>
    %413 = arith.addf %412, %332 : vector<32x32xf32>
    %cst_335 = arith.constant dense<0xFF800000> : vector<32xf32>
    %414 = vector.multi_reduction <maximumf>, %413, %cst_335 [1] : vector<32x32xf32> to vector<32xf32>
    %415 = vector.shape_cast %414 : vector<32xf32> to vector<32x1xf32>
    %416 = vector.broadcast %415 : vector<32x1xf32> to vector<32x32xf32>
    %417 = arith.subf %413, %416 : vector<32x32xf32>
    %418 = math.exp %417 : vector<32x32xf32>
    %cst_336 = arith.constant dense<0.000000e+00> : vector<32xf32>
    %419 = vector.multi_reduction <add>, %418, %cst_336 [1] : vector<32x32xf32> to vector<32xf32>
    %420 = vector.shape_cast %419 : vector<32xf32> to vector<32x1xf32>
    %421 = tpu.reciprocal %420 {approx = true} : vector<32x1xf32> -> vector<32x1xf32>
    %422 = vector.broadcast %421 : vector<32x1xf32> to vector<32x32xf32>
    %423 = arith.mulf %418, %422 : vector<32x32xf32>
    %424 = vector.extract_strided_slice %353 {offsets = [0, 24], sizes = [32, 8], strides = [1, 1]} : vector<32x32xf32> to vector<32x8xf32>
    %cst_337 = arith.constant dense<0.000000e+00> : vector<32x8xf32>
    %425 = tpu.matmul %423, %424, %cst_337 {dimension_numbers = #tpu.dot_dimension_numbers<[1], [0], [0], [1], [0, 0, 1, 1], [], []>} : vector<32x32xf32>, vector<32x8xf32>, vector<32x8xf32> -> vector<32x8xf32>
    %426 = tpu.concatenate %371, %389, %407, %425 in 1 : vector<32x8xf32>, vector<32x8xf32>, vector<32x8xf32>, vector<32x8xf32> -> vector<32x32xf32>
    %c0_338 = arith.constant 0 : index
    %c0_339 = arith.constant 0 : index
    %c0_340 = arith.constant 0 : index
    %427 = vector.load %arg18[%c0_338, %c0_339, %c0_340] : memref<2x32x32xf32, #tpu.memory_space<vmem>>, vector<1x32x32xf32>
    %428 = vector.shape_cast %427 : vector<1x32x32xf32> to vector<32x32xf32>
    %cst_341 = arith.constant dense<0.000000e+00> : vector<32x32xf32>
    %429 = tpu.matmul %426, %428, %cst_341 {dimension_numbers = #tpu.dot_dimension_numbers<[1], [0], [0], [1], [0, 0, 1, 1], [], []>} : vector<32x32xf32>, vector<32x32xf32>, vector<32x32xf32> -> vector<32x32xf32>
    %c0_342 = arith.constant 0 : index
    %c0_343 = arith.constant 0 : index
    %c0_344 = arith.constant 0 : index
    %430 = vector.load %arg19[%c0_342, %c0_343, %c0_344] : memref<2x1x32xf32, #tpu.memory_space<vmem>>, vector<1x1x32xf32>
    %431 = vector.shape_cast %430 : vector<1x1x32xf32> to vector<1x32xf32>
    %432 = vector.broadcast %431 : vector<1x32xf32> to vector<32x32xf32>
    %433 = arith.addf %429, %432 : vector<32x32xf32>
    %434 = arith.addf %433, %330 : vector<32x32xf32>
    %c0_345 = arith.constant 0 : index
    %c0_346 = arith.constant 0 : index
    %c0_347 = arith.constant 0 : index
    %435 = vector.load %arg20[%c0_345, %c0_346, %c0_347] : memref<2x1x32xf32, #tpu.memory_space<vmem>>, vector<1x1x32xf32>
    %436 = vector.shape_cast %435 : vector<1x1x32xf32> to vector<1x32xf32>
    %c0_348 = arith.constant 0 : index
    %c0_349 = arith.constant 0 : index
    %c0_350 = arith.constant 0 : index
    %437 = vector.load %arg21[%c0_348, %c0_349, %c0_350] : memref<2x1x32xf32, #tpu.memory_space<vmem>>, vector<1x1x32xf32>
    %438 = vector.shape_cast %437 : vector<1x1x32xf32> to vector<1x32xf32>
    %cst_351 = arith.constant dense<0.000000e+00> : vector<32xf32>
    %439 = vector.multi_reduction <add>, %434, %cst_351 [1] : vector<32x32xf32> to vector<32xf32>
    %440 = vector.shape_cast %439 : vector<32xf32> to vector<32x1xf32>
    %cst_352 = arith.constant 3.200000e+01 : f32
    %441 = vector.broadcast %cst_352 : f32 to vector<32x1xf32>
    %442 = arith.divf %440, %441 : vector<32x1xf32>
    %443 = vector.broadcast %442 : vector<32x1xf32> to vector<32x32xf32>
    %444 = arith.subf %434, %443 : vector<32x32xf32>
    %445 = arith.mulf %444, %444 : vector<32x32xf32>
    %cst_353 = arith.constant dense<0.000000e+00> : vector<32xf32>
    %446 = vector.multi_reduction <add>, %445, %cst_353 [1] : vector<32x32xf32> to vector<32xf32>
    %447 = vector.shape_cast %446 : vector<32xf32> to vector<32x1xf32>
    %cst_354 = arith.constant 3.200000e+01 : f32
    %448 = vector.broadcast %cst_354 : f32 to vector<32x1xf32>
    %449 = arith.divf %447, %448 : vector<32x1xf32>
    %450 = vector.broadcast %442 : vector<32x1xf32> to vector<32x32xf32>
    %451 = arith.subf %434, %450 : vector<32x32xf32>
    %cst_355 = arith.constant 9.99999996E-13 : f32
    %452 = vector.broadcast %cst_355 : f32 to vector<32x1xf32>
    %453 = arith.addf %449, %452 : vector<32x1xf32>
    %454 = math.rsqrt %453 : vector<32x1xf32>
    %455 = vector.broadcast %454 : vector<32x1xf32> to vector<32x32xf32>
    %456 = arith.mulf %451, %455 : vector<32x32xf32>
    %457 = vector.broadcast %436 : vector<1x32xf32> to vector<32x32xf32>
    %458 = arith.mulf %456, %457 : vector<32x32xf32>
    %459 = vector.broadcast %438 : vector<1x32xf32> to vector<32x32xf32>
    %460 = arith.addf %458, %459 : vector<32x32xf32>
    %c0_356 = arith.constant 0 : index
    %c0_357 = arith.constant 0 : index
    %c0_358 = arith.constant 0 : index
    %461 = vector.load %arg22[%c0_356, %c0_357, %c0_358] : memref<2x32x64xf32, #tpu.memory_space<vmem>>, vector<1x32x64xf32>
    %462 = vector.shape_cast %461 : vector<1x32x64xf32> to vector<32x64xf32>
    %cst_359 = arith.constant dense<0.000000e+00> : vector<32x64xf32>
    %463 = tpu.matmul %460, %462, %cst_359 {dimension_numbers = #tpu.dot_dimension_numbers<[1], [0], [0], [1], [0, 0, 1, 1], [], []>} : vector<32x32xf32>, vector<32x64xf32>, vector<32x64xf32> -> vector<32x64xf32>
    %c0_360 = arith.constant 0 : index
    %c0_361 = arith.constant 0 : index
    %c0_362 = arith.constant 0 : index
    %464 = vector.load %arg23[%c0_360, %c0_361, %c0_362] : memref<2x1x64xf32, #tpu.memory_space<vmem>>, vector<1x1x64xf32>
    %465 = vector.shape_cast %464 : vector<1x1x64xf32> to vector<1x64xf32>
    %466 = vector.broadcast %465 : vector<1x64xf32> to vector<32x64xf32>
    %467 = arith.addf %463, %466 : vector<32x64xf32>
    %cst_363 = arith.constant 5.000000e-01 : f32
    %468 = vector.broadcast %cst_363 : f32 to vector<32x64xf32>
    %469 = arith.mulf %468, %467 : vector<32x64xf32>
    %cst_364 = arith.constant 0.707106769 : f32
    %470 = vector.broadcast %cst_364 : f32 to vector<32x64xf32>
    %471 = arith.mulf %467, %470 : vector<32x64xf32>
    %cst_365 = arith.constant 0.000000e+00 : f32
    %472 = vector.broadcast %cst_365 : f32 to vector<32x64xf32>
    %473 = arith.cmpf oge, %471, %472 : vector<32x64xf32>
    %cst_366 = arith.constant 1.000000e+00 : f32
    %cst_367 = arith.constant -1.000000e+00 : f32
    %474 = vector.broadcast %cst_366 : f32 to vector<32x64xf32>
    %475 = vector.broadcast %cst_367 : f32 to vector<32x64xf32>
    %476 = arith.select %473, %474, %475 : vector<32x64xi1>, vector<32x64xf32>
    %477 = math.absf %471 : vector<32x64xf32>
    %cst_368 = arith.constant 0.327591091 : f32
    %478 = vector.broadcast %cst_368 : f32 to vector<32x64xf32>
    %479 = arith.mulf %478, %477 : vector<32x64xf32>
    %cst_369 = arith.constant 1.000000e+00 : f32
    %480 = vector.broadcast %cst_369 : f32 to vector<32x64xf32>
    %481 = arith.addf %480, %479 : vector<32x64xf32>
    %cst_370 = arith.constant 1.000000e+00 : f32
    %482 = vector.broadcast %cst_370 : f32 to vector<32x64xf32>
    %483 = arith.divf %482, %481 : vector<32x64xf32>
    %cst_371 = arith.constant 1.06140542 : f32
    %484 = vector.broadcast %cst_371 : f32 to vector<32x64xf32>
    %485 = arith.mulf %484, %483 : vector<32x64xf32>
    %cst_372 = arith.constant -1.45315206 : f32
    %486 = vector.broadcast %cst_372 : f32 to vector<32x64xf32>
    %487 = arith.addf %485, %486 : vector<32x64xf32>
    %488 = arith.mulf %487, %483 : vector<32x64xf32>
    %cst_373 = arith.constant 1.42141378 : f32
    %489 = vector.broadcast %cst_373 : f32 to vector<32x64xf32>
    %490 = arith.addf %488, %489 : vector<32x64xf32>
    %491 = arith.mulf %490, %483 : vector<32x64xf32>
    %cst_374 = arith.constant -0.284496725 : f32
    %492 = vector.broadcast %cst_374 : f32 to vector<32x64xf32>
    %493 = arith.addf %491, %492 : vector<32x64xf32>
    %494 = arith.mulf %493, %483 : vector<32x64xf32>
    %cst_375 = arith.constant 0.254829586 : f32
    %495 = vector.broadcast %cst_375 : f32 to vector<32x64xf32>
    %496 = arith.addf %494, %495 : vector<32x64xf32>
    %497 = arith.mulf %496, %483 : vector<32x64xf32>
    %cst_376 = arith.constant 0.000000e+00 : f32
    %498 = vector.broadcast %cst_376 : f32 to vector<32x64xf32>
    %499 = arith.subf %498, %477 : vector<32x64xf32>
    %500 = arith.mulf %499, %477 : vector<32x64xf32>
    %501 = math.exp %500 : vector<32x64xf32>
    %502 = arith.mulf %497, %501 : vector<32x64xf32>
    %cst_377 = arith.constant 1.000000e+00 : f32
    %503 = vector.broadcast %cst_377 : f32 to vector<32x64xf32>
    %504 = arith.subf %503, %502 : vector<32x64xf32>
    %505 = arith.mulf %476, %504 : vector<32x64xf32>
    %cst_378 = arith.constant 1.000000e+00 : f32
    %506 = vector.broadcast %cst_378 : f32 to vector<32x64xf32>
    %507 = arith.addf %506, %505 : vector<32x64xf32>
    %508 = arith.mulf %469, %507 : vector<32x64xf32>
    %c0_379 = arith.constant 0 : index
    %c0_380 = arith.constant 0 : index
    %c0_381 = arith.constant 0 : index
    %509 = vector.load %arg24[%c0_379, %c0_380, %c0_381] : memref<2x64x32xf32, #tpu.memory_space<vmem>>, vector<1x64x32xf32>
    %510 = vector.shape_cast %509 : vector<1x64x32xf32> to vector<64x32xf32>
    %cst_382 = arith.constant dense<0.000000e+00> : vector<32x32xf32>
    %511 = tpu.matmul %508, %510, %cst_382 {dimension_numbers = #tpu.dot_dimension_numbers<[1], [0], [0], [1], [0, 0, 1, 1], [], []>} : vector<32x64xf32>, vector<64x32xf32>, vector<32x32xf32> -> vector<32x32xf32>
    %c0_383 = arith.constant 0 : index
    %c0_384 = arith.constant 0 : index
    %c0_385 = arith.constant 0 : index
    %512 = vector.load %arg25[%c0_383, %c0_384, %c0_385] : memref<2x1x32xf32, #tpu.memory_space<vmem>>, vector<1x1x32xf32>
    %513 = vector.shape_cast %512 : vector<1x1x32xf32> to vector<1x32xf32>
    %514 = vector.broadcast %513 : vector<1x32xf32> to vector<32x32xf32>
    %515 = arith.addf %511, %514 : vector<32x32xf32>
    %516 = arith.addf %515, %460 : vector<32x32xf32>
    %c0_386 = arith.constant 0 : index
    %c0_387 = arith.constant 0 : index
    %c0_388 = arith.constant 0 : index
    %517 = vector.load %arg26[%c0_386, %c0_387, %c0_388] : memref<2x1x32xf32, #tpu.memory_space<vmem>>, vector<1x1x32xf32>
    %518 = vector.shape_cast %517 : vector<1x1x32xf32> to vector<1x32xf32>
    %c0_389 = arith.constant 0 : index
    %c0_390 = arith.constant 0 : index
    %c0_391 = arith.constant 0 : index
    %519 = vector.load %arg27[%c0_389, %c0_390, %c0_391] : memref<2x1x32xf32, #tpu.memory_space<vmem>>, vector<1x1x32xf32>
    %520 = vector.shape_cast %519 : vector<1x1x32xf32> to vector<1x32xf32>
    %cst_392 = arith.constant dense<0.000000e+00> : vector<32xf32>
    %521 = vector.multi_reduction <add>, %516, %cst_392 [1] : vector<32x32xf32> to vector<32xf32>
    %522 = vector.shape_cast %521 : vector<32xf32> to vector<32x1xf32>
    %cst_393 = arith.constant 3.200000e+01 : f32
    %523 = vector.broadcast %cst_393 : f32 to vector<32x1xf32>
    %524 = arith.divf %522, %523 : vector<32x1xf32>
    %525 = vector.broadcast %524 : vector<32x1xf32> to vector<32x32xf32>
    %526 = arith.subf %516, %525 : vector<32x32xf32>
    %527 = arith.mulf %526, %526 : vector<32x32xf32>
    %cst_394 = arith.constant dense<0.000000e+00> : vector<32xf32>
    %528 = vector.multi_reduction <add>, %527, %cst_394 [1] : vector<32x32xf32> to vector<32xf32>
    %529 = vector.shape_cast %528 : vector<32xf32> to vector<32x1xf32>
    %cst_395 = arith.constant 3.200000e+01 : f32
    %530 = vector.broadcast %cst_395 : f32 to vector<32x1xf32>
    %531 = arith.divf %529, %530 : vector<32x1xf32>
    %532 = vector.broadcast %524 : vector<32x1xf32> to vector<32x32xf32>
    %533 = arith.subf %516, %532 : vector<32x32xf32>
    %cst_396 = arith.constant 9.99999996E-13 : f32
    %534 = vector.broadcast %cst_396 : f32 to vector<32x1xf32>
    %535 = arith.addf %531, %534 : vector<32x1xf32>
    %536 = math.rsqrt %535 : vector<32x1xf32>
    %537 = vector.broadcast %536 : vector<32x1xf32> to vector<32x32xf32>
    %538 = arith.mulf %533, %537 : vector<32x32xf32>
    %539 = vector.broadcast %518 : vector<1x32xf32> to vector<32x32xf32>
    %540 = arith.mulf %538, %539 : vector<32x32xf32>
    %541 = vector.broadcast %520 : vector<1x32xf32> to vector<32x32xf32>
    %542 = arith.addf %540, %541 : vector<32x32xf32>
    %c1_397 = arith.constant 1 : index
    %c0_398 = arith.constant 0 : index
    %c0_399 = arith.constant 0 : index
    %543 = vector.load %arg12[%c1_397, %c0_398, %c0_399] : memref<2x32x32xf32, #tpu.memory_space<vmem>>, vector<1x32x32xf32>
    %544 = vector.shape_cast %543 : vector<1x32x32xf32> to vector<32x32xf32>
    %cst_400 = arith.constant dense<0.000000e+00> : vector<32x32xf32>
    %545 = tpu.matmul %542, %544, %cst_400 {dimension_numbers = #tpu.dot_dimension_numbers<[1], [0], [0], [1], [0, 0, 1, 1], [], []>} : vector<32x32xf32>, vector<32x32xf32>, vector<32x32xf32> -> vector<32x32xf32>
    %c1_401 = arith.constant 1 : index
    %c0_402 = arith.constant 0 : index
    %c0_403 = arith.constant 0 : index
    %546 = vector.load %arg13[%c1_401, %c0_402, %c0_403] : memref<2x1x32xf32, #tpu.memory_space<vmem>>, vector<1x1x32xf32>
    %547 = vector.shape_cast %546 : vector<1x1x32xf32> to vector<1x32xf32>
    %548 = vector.broadcast %547 : vector<1x32xf32> to vector<32x32xf32>
    %549 = arith.addf %545, %548 : vector<32x32xf32>
    %c1_404 = arith.constant 1 : index
    %c0_405 = arith.constant 0 : index
    %c0_406 = arith.constant 0 : index
    %550 = vector.load %arg14[%c1_404, %c0_405, %c0_406] : memref<2x32x32xf32, #tpu.memory_space<vmem>>, vector<1x32x32xf32>
    %551 = vector.shape_cast %550 : vector<1x32x32xf32> to vector<32x32xf32>
    %cst_407 = arith.constant dense<0.000000e+00> : vector<32x32xf32>
    %552 = tpu.matmul %542, %551, %cst_407 {dimension_numbers = #tpu.dot_dimension_numbers<[1], [0], [0], [1], [0, 0, 1, 1], [], []>} : vector<32x32xf32>, vector<32x32xf32>, vector<32x32xf32> -> vector<32x32xf32>
    %c1_408 = arith.constant 1 : index
    %c0_409 = arith.constant 0 : index
    %c0_410 = arith.constant 0 : index
    %553 = vector.load %arg15[%c1_408, %c0_409, %c0_410] : memref<2x1x32xf32, #tpu.memory_space<vmem>>, vector<1x1x32xf32>
    %554 = vector.shape_cast %553 : vector<1x1x32xf32> to vector<1x32xf32>
    %555 = vector.broadcast %554 : vector<1x32xf32> to vector<32x32xf32>
    %556 = arith.addf %552, %555 : vector<32x32xf32>
    %c1_411 = arith.constant 1 : index
    %c0_412 = arith.constant 0 : index
    %c0_413 = arith.constant 0 : index
    %557 = vector.load %arg16[%c1_411, %c0_412, %c0_413] : memref<2x32x32xf32, #tpu.memory_space<vmem>>, vector<1x32x32xf32>
    %558 = vector.shape_cast %557 : vector<1x32x32xf32> to vector<32x32xf32>
    %cst_414 = arith.constant dense<0.000000e+00> : vector<32x32xf32>
    %559 = tpu.matmul %542, %558, %cst_414 {dimension_numbers = #tpu.dot_dimension_numbers<[1], [0], [0], [1], [0, 0, 1, 1], [], []>} : vector<32x32xf32>, vector<32x32xf32>, vector<32x32xf32> -> vector<32x32xf32>
    %c1_415 = arith.constant 1 : index
    %c0_416 = arith.constant 0 : index
    %c0_417 = arith.constant 0 : index
    %560 = vector.load %arg17[%c1_415, %c0_416, %c0_417] : memref<2x1x32xf32, #tpu.memory_space<vmem>>, vector<1x1x32xf32>
    %561 = vector.shape_cast %560 : vector<1x1x32xf32> to vector<1x32xf32>
    %562 = vector.broadcast %561 : vector<1x32xf32> to vector<32x32xf32>
    %563 = arith.addf %559, %562 : vector<32x32xf32>
    %564 = vector.extract_strided_slice %549 {offsets = [0, 0], sizes = [32, 8], strides = [1, 1]} : vector<32x32xf32> to vector<32x8xf32>
    %565 = vector.extract_strided_slice %556 {offsets = [0, 0], sizes = [32, 8], strides = [1, 1]} : vector<32x32xf32> to vector<32x8xf32>
    %cst_418 = arith.constant dense<0.000000e+00> : vector<32x32xf32>
    %566 = tpu.matmul %564, %565, %cst_418 {dimension_numbers = #tpu.dot_dimension_numbers<[1], [1], [0], [0], [0, 0, 1, 0], [], []>} : vector<32x8xf32>, vector<32x8xf32>, vector<32x32xf32> -> vector<32x32xf32>
    %cst_419 = arith.constant 0.353553385 : f32
    %567 = vector.broadcast %cst_419 : f32 to vector<32x32xf32>
    %568 = arith.mulf %566, %567 : vector<32x32xf32>
    %569 = arith.addf %568, %332 : vector<32x32xf32>
    %cst_420 = arith.constant dense<0xFF800000> : vector<32xf32>
    %570 = vector.multi_reduction <maximumf>, %569, %cst_420 [1] : vector<32x32xf32> to vector<32xf32>
    %571 = vector.shape_cast %570 : vector<32xf32> to vector<32x1xf32>
    %572 = vector.broadcast %571 : vector<32x1xf32> to vector<32x32xf32>
    %573 = arith.subf %569, %572 : vector<32x32xf32>
    %574 = math.exp %573 : vector<32x32xf32>
    %cst_421 = arith.constant dense<0.000000e+00> : vector<32xf32>
    %575 = vector.multi_reduction <add>, %574, %cst_421 [1] : vector<32x32xf32> to vector<32xf32>
    %576 = vector.shape_cast %575 : vector<32xf32> to vector<32x1xf32>
    %577 = tpu.reciprocal %576 {approx = true} : vector<32x1xf32> -> vector<32x1xf32>
    %578 = vector.broadcast %577 : vector<32x1xf32> to vector<32x32xf32>
    %579 = arith.mulf %574, %578 : vector<32x32xf32>
    %580 = vector.extract_strided_slice %563 {offsets = [0, 0], sizes = [32, 8], strides = [1, 1]} : vector<32x32xf32> to vector<32x8xf32>
    %cst_422 = arith.constant dense<0.000000e+00> : vector<32x8xf32>
    %581 = tpu.matmul %579, %580, %cst_422 {dimension_numbers = #tpu.dot_dimension_numbers<[1], [0], [0], [1], [0, 0, 1, 1], [], []>} : vector<32x32xf32>, vector<32x8xf32>, vector<32x8xf32> -> vector<32x8xf32>
    %582 = vector.extract_strided_slice %549 {offsets = [0, 8], sizes = [32, 8], strides = [1, 1]} : vector<32x32xf32> to vector<32x8xf32>
    %583 = vector.extract_strided_slice %556 {offsets = [0, 8], sizes = [32, 8], strides = [1, 1]} : vector<32x32xf32> to vector<32x8xf32>
    %cst_423 = arith.constant dense<0.000000e+00> : vector<32x32xf32>
    %584 = tpu.matmul %582, %583, %cst_423 {dimension_numbers = #tpu.dot_dimension_numbers<[1], [1], [0], [0], [0, 0, 1, 0], [], []>} : vector<32x8xf32>, vector<32x8xf32>, vector<32x32xf32> -> vector<32x32xf32>
    %cst_424 = arith.constant 0.353553385 : f32
    %585 = vector.broadcast %cst_424 : f32 to vector<32x32xf32>
    %586 = arith.mulf %584, %585 : vector<32x32xf32>
    %587 = arith.addf %586, %332 : vector<32x32xf32>
    %cst_425 = arith.constant dense<0xFF800000> : vector<32xf32>
    %588 = vector.multi_reduction <maximumf>, %587, %cst_425 [1] : vector<32x32xf32> to vector<32xf32>
    %589 = vector.shape_cast %588 : vector<32xf32> to vector<32x1xf32>
    %590 = vector.broadcast %589 : vector<32x1xf32> to vector<32x32xf32>
    %591 = arith.subf %587, %590 : vector<32x32xf32>
    %592 = math.exp %591 : vector<32x32xf32>
    %cst_426 = arith.constant dense<0.000000e+00> : vector<32xf32>
    %593 = vector.multi_reduction <add>, %592, %cst_426 [1] : vector<32x32xf32> to vector<32xf32>
    %594 = vector.shape_cast %593 : vector<32xf32> to vector<32x1xf32>
    %595 = tpu.reciprocal %594 {approx = true} : vector<32x1xf32> -> vector<32x1xf32>
    %596 = vector.broadcast %595 : vector<32x1xf32> to vector<32x32xf32>
    %597 = arith.mulf %592, %596 : vector<32x32xf32>
    %598 = vector.extract_strided_slice %563 {offsets = [0, 8], sizes = [32, 8], strides = [1, 1]} : vector<32x32xf32> to vector<32x8xf32>
    %cst_427 = arith.constant dense<0.000000e+00> : vector<32x8xf32>
    %599 = tpu.matmul %597, %598, %cst_427 {dimension_numbers = #tpu.dot_dimension_numbers<[1], [0], [0], [1], [0, 0, 1, 1], [], []>} : vector<32x32xf32>, vector<32x8xf32>, vector<32x8xf32> -> vector<32x8xf32>
    %600 = vector.extract_strided_slice %549 {offsets = [0, 16], sizes = [32, 8], strides = [1, 1]} : vector<32x32xf32> to vector<32x8xf32>
    %601 = vector.extract_strided_slice %556 {offsets = [0, 16], sizes = [32, 8], strides = [1, 1]} : vector<32x32xf32> to vector<32x8xf32>
    %cst_428 = arith.constant dense<0.000000e+00> : vector<32x32xf32>
    %602 = tpu.matmul %600, %601, %cst_428 {dimension_numbers = #tpu.dot_dimension_numbers<[1], [1], [0], [0], [0, 0, 1, 0], [], []>} : vector<32x8xf32>, vector<32x8xf32>, vector<32x32xf32> -> vector<32x32xf32>
    %cst_429 = arith.constant 0.353553385 : f32
    %603 = vector.broadcast %cst_429 : f32 to vector<32x32xf32>
    %604 = arith.mulf %602, %603 : vector<32x32xf32>
    %605 = arith.addf %604, %332 : vector<32x32xf32>
    %cst_430 = arith.constant dense<0xFF800000> : vector<32xf32>
    %606 = vector.multi_reduction <maximumf>, %605, %cst_430 [1] : vector<32x32xf32> to vector<32xf32>
    %607 = vector.shape_cast %606 : vector<32xf32> to vector<32x1xf32>
    %608 = vector.broadcast %607 : vector<32x1xf32> to vector<32x32xf32>
    %609 = arith.subf %605, %608 : vector<32x32xf32>
    %610 = math.exp %609 : vector<32x32xf32>
    %cst_431 = arith.constant dense<0.000000e+00> : vector<32xf32>
    %611 = vector.multi_reduction <add>, %610, %cst_431 [1] : vector<32x32xf32> to vector<32xf32>
    %612 = vector.shape_cast %611 : vector<32xf32> to vector<32x1xf32>
    %613 = tpu.reciprocal %612 {approx = true} : vector<32x1xf32> -> vector<32x1xf32>
    %614 = vector.broadcast %613 : vector<32x1xf32> to vector<32x32xf32>
    %615 = arith.mulf %610, %614 : vector<32x32xf32>
    %616 = vector.extract_strided_slice %563 {offsets = [0, 16], sizes = [32, 8], strides = [1, 1]} : vector<32x32xf32> to vector<32x8xf32>
    %cst_432 = arith.constant dense<0.000000e+00> : vector<32x8xf32>
    %617 = tpu.matmul %615, %616, %cst_432 {dimension_numbers = #tpu.dot_dimension_numbers<[1], [0], [0], [1], [0, 0, 1, 1], [], []>} : vector<32x32xf32>, vector<32x8xf32>, vector<32x8xf32> -> vector<32x8xf32>
    %618 = vector.extract_strided_slice %549 {offsets = [0, 24], sizes = [32, 8], strides = [1, 1]} : vector<32x32xf32> to vector<32x8xf32>
    %619 = vector.extract_strided_slice %556 {offsets = [0, 24], sizes = [32, 8], strides = [1, 1]} : vector<32x32xf32> to vector<32x8xf32>
    %cst_433 = arith.constant dense<0.000000e+00> : vector<32x32xf32>
    %620 = tpu.matmul %618, %619, %cst_433 {dimension_numbers = #tpu.dot_dimension_numbers<[1], [1], [0], [0], [0, 0, 1, 0], [], []>} : vector<32x8xf32>, vector<32x8xf32>, vector<32x32xf32> -> vector<32x32xf32>
    %cst_434 = arith.constant 0.353553385 : f32
    %621 = vector.broadcast %cst_434 : f32 to vector<32x32xf32>
    %622 = arith.mulf %620, %621 : vector<32x32xf32>
    %623 = arith.addf %622, %332 : vector<32x32xf32>
    %cst_435 = arith.constant dense<0xFF800000> : vector<32xf32>
    %624 = vector.multi_reduction <maximumf>, %623, %cst_435 [1] : vector<32x32xf32> to vector<32xf32>
    %625 = vector.shape_cast %624 : vector<32xf32> to vector<32x1xf32>
    %626 = vector.broadcast %625 : vector<32x1xf32> to vector<32x32xf32>
    %627 = arith.subf %623, %626 : vector<32x32xf32>
    %628 = math.exp %627 : vector<32x32xf32>
    %cst_436 = arith.constant dense<0.000000e+00> : vector<32xf32>
    %629 = vector.multi_reduction <add>, %628, %cst_436 [1] : vector<32x32xf32> to vector<32xf32>
    %630 = vector.shape_cast %629 : vector<32xf32> to vector<32x1xf32>
    %631 = tpu.reciprocal %630 {approx = true} : vector<32x1xf32> -> vector<32x1xf32>
    %632 = vector.broadcast %631 : vector<32x1xf32> to vector<32x32xf32>
    %633 = arith.mulf %628, %632 : vector<32x32xf32>
    %634 = vector.extract_strided_slice %563 {offsets = [0, 24], sizes = [32, 8], strides = [1, 1]} : vector<32x32xf32> to vector<32x8xf32>
    %cst_437 = arith.constant dense<0.000000e+00> : vector<32x8xf32>
    %635 = tpu.matmul %633, %634, %cst_437 {dimension_numbers = #tpu.dot_dimension_numbers<[1], [0], [0], [1], [0, 0, 1, 1], [], []>} : vector<32x32xf32>, vector<32x8xf32>, vector<32x8xf32> -> vector<32x8xf32>
    %636 = tpu.concatenate %581, %599, %617, %635 in 1 : vector<32x8xf32>, vector<32x8xf32>, vector<32x8xf32>, vector<32x8xf32> -> vector<32x32xf32>
    %c1_438 = arith.constant 1 : index
    %c0_439 = arith.constant 0 : index
    %c0_440 = arith.constant 0 : index
    %637 = vector.load %arg18[%c1_438, %c0_439, %c0_440] : memref<2x32x32xf32, #tpu.memory_space<vmem>>, vector<1x32x32xf32>
    %638 = vector.shape_cast %637 : vector<1x32x32xf32> to vector<32x32xf32>
    %cst_441 = arith.constant dense<0.000000e+00> : vector<32x32xf32>
    %639 = tpu.matmul %636, %638, %cst_441 {dimension_numbers = #tpu.dot_dimension_numbers<[1], [0], [0], [1], [0, 0, 1, 1], [], []>} : vector<32x32xf32>, vector<32x32xf32>, vector<32x32xf32> -> vector<32x32xf32>
    %c1_442 = arith.constant 1 : index
    %c0_443 = arith.constant 0 : index
    %c0_444 = arith.constant 0 : index
    %640 = vector.load %arg19[%c1_442, %c0_443, %c0_444] : memref<2x1x32xf32, #tpu.memory_space<vmem>>, vector<1x1x32xf32>
    %641 = vector.shape_cast %640 : vector<1x1x32xf32> to vector<1x32xf32>
    %642 = vector.broadcast %641 : vector<1x32xf32> to vector<32x32xf32>
    %643 = arith.addf %639, %642 : vector<32x32xf32>
    %644 = arith.addf %643, %542 : vector<32x32xf32>
    %c1_445 = arith.constant 1 : index
    %c0_446 = arith.constant 0 : index
    %c0_447 = arith.constant 0 : index
    %645 = vector.load %arg20[%c1_445, %c0_446, %c0_447] : memref<2x1x32xf32, #tpu.memory_space<vmem>>, vector<1x1x32xf32>
    %646 = vector.shape_cast %645 : vector<1x1x32xf32> to vector<1x32xf32>
    %c1_448 = arith.constant 1 : index
    %c0_449 = arith.constant 0 : index
    %c0_450 = arith.constant 0 : index
    %647 = vector.load %arg21[%c1_448, %c0_449, %c0_450] : memref<2x1x32xf32, #tpu.memory_space<vmem>>, vector<1x1x32xf32>
    %648 = vector.shape_cast %647 : vector<1x1x32xf32> to vector<1x32xf32>
    %cst_451 = arith.constant dense<0.000000e+00> : vector<32xf32>
    %649 = vector.multi_reduction <add>, %644, %cst_451 [1] : vector<32x32xf32> to vector<32xf32>
    %650 = vector.shape_cast %649 : vector<32xf32> to vector<32x1xf32>
    %cst_452 = arith.constant 3.200000e+01 : f32
    %651 = vector.broadcast %cst_452 : f32 to vector<32x1xf32>
    %652 = arith.divf %650, %651 : vector<32x1xf32>
    %653 = vector.broadcast %652 : vector<32x1xf32> to vector<32x32xf32>
    %654 = arith.subf %644, %653 : vector<32x32xf32>
    %655 = arith.mulf %654, %654 : vector<32x32xf32>
    %cst_453 = arith.constant dense<0.000000e+00> : vector<32xf32>
    %656 = vector.multi_reduction <add>, %655, %cst_453 [1] : vector<32x32xf32> to vector<32xf32>
    %657 = vector.shape_cast %656 : vector<32xf32> to vector<32x1xf32>
    %cst_454 = arith.constant 3.200000e+01 : f32
    %658 = vector.broadcast %cst_454 : f32 to vector<32x1xf32>
    %659 = arith.divf %657, %658 : vector<32x1xf32>
    %660 = vector.broadcast %652 : vector<32x1xf32> to vector<32x32xf32>
    %661 = arith.subf %644, %660 : vector<32x32xf32>
    %cst_455 = arith.constant 9.99999996E-13 : f32
    %662 = vector.broadcast %cst_455 : f32 to vector<32x1xf32>
    %663 = arith.addf %659, %662 : vector<32x1xf32>
    %664 = math.rsqrt %663 : vector<32x1xf32>
    %665 = vector.broadcast %664 : vector<32x1xf32> to vector<32x32xf32>
    %666 = arith.mulf %661, %665 : vector<32x32xf32>
    %667 = vector.broadcast %646 : vector<1x32xf32> to vector<32x32xf32>
    %668 = arith.mulf %666, %667 : vector<32x32xf32>
    %669 = vector.broadcast %648 : vector<1x32xf32> to vector<32x32xf32>
    %670 = arith.addf %668, %669 : vector<32x32xf32>
    %c1_456 = arith.constant 1 : index
    %c0_457 = arith.constant 0 : index
    %c0_458 = arith.constant 0 : index
    %671 = vector.load %arg22[%c1_456, %c0_457, %c0_458] : memref<2x32x64xf32, #tpu.memory_space<vmem>>, vector<1x32x64xf32>
    %672 = vector.shape_cast %671 : vector<1x32x64xf32> to vector<32x64xf32>
    %cst_459 = arith.constant dense<0.000000e+00> : vector<32x64xf32>
    %673 = tpu.matmul %670, %672, %cst_459 {dimension_numbers = #tpu.dot_dimension_numbers<[1], [0], [0], [1], [0, 0, 1, 1], [], []>} : vector<32x32xf32>, vector<32x64xf32>, vector<32x64xf32> -> vector<32x64xf32>
    %c1_460 = arith.constant 1 : index
    %c0_461 = arith.constant 0 : index
    %c0_462 = arith.constant 0 : index
    %674 = vector.load %arg23[%c1_460, %c0_461, %c0_462] : memref<2x1x64xf32, #tpu.memory_space<vmem>>, vector<1x1x64xf32>
    %675 = vector.shape_cast %674 : vector<1x1x64xf32> to vector<1x64xf32>
    %676 = vector.broadcast %675 : vector<1x64xf32> to vector<32x64xf32>
    %677 = arith.addf %673, %676 : vector<32x64xf32>
    %cst_463 = arith.constant 5.000000e-01 : f32
    %678 = vector.broadcast %cst_463 : f32 to vector<32x64xf32>
    %679 = arith.mulf %678, %677 : vector<32x64xf32>
    %cst_464 = arith.constant 0.707106769 : f32
    %680 = vector.broadcast %cst_464 : f32 to vector<32x64xf32>
    %681 = arith.mulf %677, %680 : vector<32x64xf32>
    %cst_465 = arith.constant 0.000000e+00 : f32
    %682 = vector.broadcast %cst_465 : f32 to vector<32x64xf32>
    %683 = arith.cmpf oge, %681, %682 : vector<32x64xf32>
    %cst_466 = arith.constant 1.000000e+00 : f32
    %cst_467 = arith.constant -1.000000e+00 : f32
    %684 = vector.broadcast %cst_466 : f32 to vector<32x64xf32>
    %685 = vector.broadcast %cst_467 : f32 to vector<32x64xf32>
    %686 = arith.select %683, %684, %685 : vector<32x64xi1>, vector<32x64xf32>
    %687 = math.absf %681 : vector<32x64xf32>
    %cst_468 = arith.constant 0.327591091 : f32
    %688 = vector.broadcast %cst_468 : f32 to vector<32x64xf32>
    %689 = arith.mulf %688, %687 : vector<32x64xf32>
    %cst_469 = arith.constant 1.000000e+00 : f32
    %690 = vector.broadcast %cst_469 : f32 to vector<32x64xf32>
    %691 = arith.addf %690, %689 : vector<32x64xf32>
    %cst_470 = arith.constant 1.000000e+00 : f32
    %692 = vector.broadcast %cst_470 : f32 to vector<32x64xf32>
    %693 = arith.divf %692, %691 : vector<32x64xf32>
    %cst_471 = arith.constant 1.06140542 : f32
    %694 = vector.broadcast %cst_471 : f32 to vector<32x64xf32>
    %695 = arith.mulf %694, %693 : vector<32x64xf32>
    %cst_472 = arith.constant -1.45315206 : f32
    %696 = vector.broadcast %cst_472 : f32 to vector<32x64xf32>
    %697 = arith.addf %695, %696 : vector<32x64xf32>
    %698 = arith.mulf %697, %693 : vector<32x64xf32>
    %cst_473 = arith.constant 1.42141378 : f32
    %699 = vector.broadcast %cst_473 : f32 to vector<32x64xf32>
    %700 = arith.addf %698, %699 : vector<32x64xf32>
    %701 = arith.mulf %700, %693 : vector<32x64xf32>
    %cst_474 = arith.constant -0.284496725 : f32
    %702 = vector.broadcast %cst_474 : f32 to vector<32x64xf32>
    %703 = arith.addf %701, %702 : vector<32x64xf32>
    %704 = arith.mulf %703, %693 : vector<32x64xf32>
    %cst_475 = arith.constant 0.254829586 : f32
    %705 = vector.broadcast %cst_475 : f32 to vector<32x64xf32>
    %706 = arith.addf %704, %705 : vector<32x64xf32>
    %707 = arith.mulf %706, %693 : vector<32x64xf32>
    %cst_476 = arith.constant 0.000000e+00 : f32
    %708 = vector.broadcast %cst_476 : f32 to vector<32x64xf32>
    %709 = arith.subf %708, %687 : vector<32x64xf32>
    %710 = arith.mulf %709, %687 : vector<32x64xf32>
    %711 = math.exp %710 : vector<32x64xf32>
    %712 = arith.mulf %707, %711 : vector<32x64xf32>
    %cst_477 = arith.constant 1.000000e+00 : f32
    %713 = vector.broadcast %cst_477 : f32 to vector<32x64xf32>
    %714 = arith.subf %713, %712 : vector<32x64xf32>
    %715 = arith.mulf %686, %714 : vector<32x64xf32>
    %cst_478 = arith.constant 1.000000e+00 : f32
    %716 = vector.broadcast %cst_478 : f32 to vector<32x64xf32>
    %717 = arith.addf %716, %715 : vector<32x64xf32>
    %718 = arith.mulf %679, %717 : vector<32x64xf32>
    %c1_479 = arith.constant 1 : index
    %c0_480 = arith.constant 0 : index
    %c0_481 = arith.constant 0 : index
    %719 = vector.load %arg24[%c1_479, %c0_480, %c0_481] : memref<2x64x32xf32, #tpu.memory_space<vmem>>, vector<1x64x32xf32>
    %720 = vector.shape_cast %719 : vector<1x64x32xf32> to vector<64x32xf32>
    %cst_482 = arith.constant dense<0.000000e+00> : vector<32x32xf32>
    %721 = tpu.matmul %718, %720, %cst_482 {dimension_numbers = #tpu.dot_dimension_numbers<[1], [0], [0], [1], [0, 0, 1, 1], [], []>} : vector<32x64xf32>, vector<64x32xf32>, vector<32x32xf32> -> vector<32x32xf32>
    %c1_483 = arith.constant 1 : index
    %c0_484 = arith.constant 0 : index
    %c0_485 = arith.constant 0 : index
    %722 = vector.load %arg25[%c1_483, %c0_484, %c0_485] : memref<2x1x32xf32, #tpu.memory_space<vmem>>, vector<1x1x32xf32>
    %723 = vector.shape_cast %722 : vector<1x1x32xf32> to vector<1x32xf32>
    %724 = vector.broadcast %723 : vector<1x32xf32> to vector<32x32xf32>
    %725 = arith.addf %721, %724 : vector<32x32xf32>
    %726 = arith.addf %725, %670 : vector<32x32xf32>
    %c1_486 = arith.constant 1 : index
    %c0_487 = arith.constant 0 : index
    %c0_488 = arith.constant 0 : index
    %727 = vector.load %arg26[%c1_486, %c0_487, %c0_488] : memref<2x1x32xf32, #tpu.memory_space<vmem>>, vector<1x1x32xf32>
    %728 = vector.shape_cast %727 : vector<1x1x32xf32> to vector<1x32xf32>
    %c1_489 = arith.constant 1 : index
    %c0_490 = arith.constant 0 : index
    %c0_491 = arith.constant 0 : index
    %729 = vector.load %arg27[%c1_489, %c0_490, %c0_491] : memref<2x1x32xf32, #tpu.memory_space<vmem>>, vector<1x1x32xf32>
    %730 = vector.shape_cast %729 : vector<1x1x32xf32> to vector<1x32xf32>
    %cst_492 = arith.constant dense<0.000000e+00> : vector<32xf32>
    %731 = vector.multi_reduction <add>, %726, %cst_492 [1] : vector<32x32xf32> to vector<32xf32>
    %732 = vector.shape_cast %731 : vector<32xf32> to vector<32x1xf32>
    %cst_493 = arith.constant 3.200000e+01 : f32
    %733 = vector.broadcast %cst_493 : f32 to vector<32x1xf32>
    %734 = arith.divf %732, %733 : vector<32x1xf32>
    %735 = vector.broadcast %734 : vector<32x1xf32> to vector<32x32xf32>
    %736 = arith.subf %726, %735 : vector<32x32xf32>
    %737 = arith.mulf %736, %736 : vector<32x32xf32>
    %cst_494 = arith.constant dense<0.000000e+00> : vector<32xf32>
    %738 = vector.multi_reduction <add>, %737, %cst_494 [1] : vector<32x32xf32> to vector<32xf32>
    %739 = vector.shape_cast %738 : vector<32xf32> to vector<32x1xf32>
    %cst_495 = arith.constant 3.200000e+01 : f32
    %740 = vector.broadcast %cst_495 : f32 to vector<32x1xf32>
    %741 = arith.divf %739, %740 : vector<32x1xf32>
    %742 = vector.broadcast %734 : vector<32x1xf32> to vector<32x32xf32>
    %743 = arith.subf %726, %742 : vector<32x32xf32>
    %cst_496 = arith.constant 9.99999996E-13 : f32
    %744 = vector.broadcast %cst_496 : f32 to vector<32x1xf32>
    %745 = arith.addf %741, %744 : vector<32x1xf32>
    %746 = math.rsqrt %745 : vector<32x1xf32>
    %747 = vector.broadcast %746 : vector<32x1xf32> to vector<32x32xf32>
    %748 = arith.mulf %743, %747 : vector<32x32xf32>
    %749 = vector.broadcast %728 : vector<1x32xf32> to vector<32x32xf32>
    %750 = arith.mulf %748, %749 : vector<32x32xf32>
    %751 = vector.broadcast %730 : vector<1x32xf32> to vector<32x32xf32>
    %752 = arith.addf %750, %751 : vector<32x32xf32>
    %c0_497 = arith.constant 0 : index
    %c0_498 = arith.constant 0 : index
    %753 = vector.load %arg28[%c0_497, %c0_498] : memref<1x32xf32, #tpu.memory_space<vmem>>, vector<1x32xf32>
    %754 = vector.extract_strided_slice %752 {offsets = [0, 0], sizes = [16, 32], strides = [1, 1]} : vector<32x32xf32> to vector<16x32xf32>
    %cst_499 = arith.constant dense<0.000000e+00> : vector<1x16xf32>
    %755 = tpu.matmul %753, %754, %cst_499 {dimension_numbers = #tpu.dot_dimension_numbers<[1], [1], [0], [0], [0, 0, 1, 0], [], []>} : vector<1x32xf32>, vector<16x32xf32>, vector<1x16xf32> -> vector<1x16xf32>
    %c0_500 = arith.constant 0 : index
    %c0_501 = arith.constant 0 : index
    %756 = vector.load %arg29[%c0_500, %c0_501] : memref<1x1xf32, #tpu.memory_space<vmem>>, vector<1x1xf32>
    %757 = vector.broadcast %756 : vector<1x1xf32> to vector<1x16xf32>
    %758 = arith.addf %755, %757 : vector<1x16xf32>
    %c0_502 = arith.constant 0 : index
    %c0_503 = arith.constant 0 : index
    %c0_504 = arith.constant 0 : index
    %759 = vector.load %arg30[%c0_502, %c0_503, %c0_504] : memref<1x1x16xf32, #tpu.memory_space<vmem>>, vector<1x1x16xf32>
    %760 = vector.shape_cast %759 : vector<1x1x16xf32> to vector<1x16xf32>
    %761 = vector.shape_cast %758 : vector<1x16xf32> to vector<1x1x16xf32>
    tpu.vector_store %arg30[%c0_502, %c0_503, %c0_504], %761 {strides = array<i32>} : memref<1x1x16xf32, #tpu.memory_space<vmem>>, vector<1x1x16xf32>,
    return
  }
  func.func @transform_0(%arg0: i32) -> (i32, i32) {
    %c0_i32 = arith.constant 0 : i32
    %c0_i32_0 = arith.constant 0 : i32
    return %arg0, %c0_i32 : i32, i32
  }
  func.func @transform_1(%arg0: i32) -> (i32, i32, i32, i32) {
    %c0_i32 = arith.constant 0 : i32
    %c0_i32_0 = arith.constant 0 : i32
    %c0_i32_1 = arith.constant 0 : i32
    %c0_i32_2 = arith.constant 0 : i32
    return %arg0, %c0_i32, %c0_i32_0, %c0_i32_1 : i32, i32, i32, i32
  }
  func.func @transform_2(%arg0: i32) -> (i32, i32, i32, i32) {
    %c0_i32 = arith.constant 0 : i32
    %c0_i32_0 = arith.constant 0 : i32
    %c0_i32_1 = arith.constant 0 : i32
    %c0_i32_2 = arith.constant 0 : i32
    return %arg0, %c0_i32, %c0_i32_0, %c0_i32_1 : i32, i32, i32, i32
  }
  func.func @transform_3(%arg0: i32) -> (i32, i32, i32) {
    %c0_i32 = arith.constant 0 : i32
    %c0_i32_0 = arith.constant 0 : i32
    %c0_i32_1 = arith.constant 0 : i32
    return %arg0, %c0_i32, %c0_i32_0 : i32, i32, i32
  }
  func.func @transform_4(%arg0: i32) -> (i32, i32) {
    %c0_i32 = arith.constant 0 : i32
    %c0_i32_0 = arith.constant 0 : i32
    %c0_i32_1 = arith.constant 0 : i32
    return %c0_i32, %c0_i32_0 : i32, i32
  }
  func.func @transform_5(%arg0: i32) -> (i32, i32) {
    %c0_i32 = arith.constant 0 : i32
    %c0_i32_0 = arith.constant 0 : i32
    %c0_i32_1 = arith.constant 0 : i32
    return %c0_i32, %c0_i32_0 : i32, i32
  }
  func.func @transform_6(%arg0: i32) -> (i32, i32, i32) {
    %c0_i32 = arith.constant 0 : i32
    %c0_i32_0 = arith.constant 0 : i32
    %c0_i32_1 = arith.constant 0 : i32
    %c0_i32_2 = arith.constant 0 : i32
    return %c0_i32, %c0_i32_0, %c0_i32_1 : i32, i32, i32
  }
  func.func @transform_7(%arg0: i32) -> (i32, i32, i32) {
    %c0_i32 = arith.constant 0 : i32
    %c0_i32_0 = arith.constant 0 : i32
    %c0_i32_1 = arith.constant 0 : i32
    %c0_i32_2 = arith.constant 0 : i32
    return %c0_i32, %c0_i32_0, %c0_i32_1 : i32, i32, i32
  }
  func.func @transform_8(%arg0: i32) -> (i32, i32, i32) {
    %c0_i32 = arith.constant 0 : i32
    %c0_i32_0 = arith.constant 0 : i32
    %c0_i32_1 = arith.constant 0 : i32
    %c0_i32_2 = arith.constant 0 : i32
    return %c0_i32, %c0_i32_0, %c0_i32_1 : i32, i32, i32
  }
  func.func @transform_9(%arg0: i32) -> (i32, i32, i32) {
    %c0_i32 = arith.constant 0 : i32
    %c0_i32_0 = arith.constant 0 : i32
    %c0_i32_1 = arith.constant 0 : i32
    %c0_i32_2 = arith.constant 0 : i32
    return %c0_i32, %c0_i32_0, %c0_i32_1 : i32, i32, i32
  }
  func.func @transform_10(%arg0: i32) -> (i32, i32) {
    %c0_i32 = arith.constant 0 : i32
    %c0_i32_0 = arith.constant 0 : i32
    %c0_i32_1 = arith.constant 0 : i32
    return %c0_i32, %c0_i32_0 : i32, i32
  }
  func.func @transform_11(%arg0: i32) -> (i32, i32, i32) {
    %c0_i32 = arith.constant 0 : i32
    %c0_i32_0 = arith.constant 0 : i32
    %c0_i32_1 = arith.constant 0 : i32
    %c0_i32_2 = arith.constant 0 : i32
    return %c0_i32, %c0_i32_0, %c0_i32_1 : i32, i32, i32
  }
  func.func @transform_12(%arg0: i32) -> (i32, i32, i32) {
    %c0_i32 = arith.constant 0 : i32
    %c0_i32_0 = arith.constant 0 : i32
    %c0_i32_1 = arith.constant 0 : i32
    %c0_i32_2 = arith.constant 0 : i32
    return %c0_i32, %c0_i32_0, %c0_i32_1 : i32, i32, i32
  }
  func.func @transform_13(%arg0: i32) -> (i32, i32, i32) {
    %c0_i32 = arith.constant 0 : i32
    %c0_i32_0 = arith.constant 0 : i32
    %c0_i32_1 = arith.constant 0 : i32
    %c0_i32_2 = arith.constant 0 : i32
    return %c0_i32, %c0_i32_0, %c0_i32_1 : i32, i32, i32
  }
  func.func @transform_14(%arg0: i32) -> (i32, i32, i32) {
    %c0_i32 = arith.constant 0 : i32
    %c0_i32_0 = arith.constant 0 : i32
    %c0_i32_1 = arith.constant 0 : i32
    %c0_i32_2 = arith.constant 0 : i32
    return %c0_i32, %c0_i32_0, %c0_i32_1 : i32, i32, i32
  }
  func.func @transform_15(%arg0: i32) -> (i32, i32, i32) {
    %c0_i32 = arith.constant 0 : i32
    %c0_i32_0 = arith.constant 0 : i32
    %c0_i32_1 = arith.constant 0 : i32
    %c0_i32_2 = arith.constant 0 : i32
    return %c0_i32, %c0_i32_0, %c0_i32_1 : i32, i32, i32
  }
  func.func @transform_16(%arg0: i32) -> (i32, i32, i32) {
    %c0_i32 = arith.constant 0 : i32
    %c0_i32_0 = arith.constant 0 : i32
    %c0_i32_1 = arith.constant 0 : i32
    %c0_i32_2 = arith.constant 0 : i32
    return %c0_i32, %c0_i32_0, %c0_i32_1 : i32, i32, i32
  }
  func.func @transform_17(%arg0: i32) -> (i32, i32, i32) {
    %c0_i32 = arith.constant 0 : i32
    %c0_i32_0 = arith.constant 0 : i32
    %c0_i32_1 = arith.constant 0 : i32
    %c0_i32_2 = arith.constant 0 : i32
    return %c0_i32, %c0_i32_0, %c0_i32_1 : i32, i32, i32
  }
  func.func @transform_18(%arg0: i32) -> (i32, i32, i32) {
    %c0_i32 = arith.constant 0 : i32
    %c0_i32_0 = arith.constant 0 : i32
    %c0_i32_1 = arith.constant 0 : i32
    %c0_i32_2 = arith.constant 0 : i32
    return %c0_i32, %c0_i32_0, %c0_i32_1 : i32, i32, i32
  }
  func.func @transform_19(%arg0: i32) -> (i32, i32, i32) {
    %c0_i32 = arith.constant 0 : i32
    %c0_i32_0 = arith.constant 0 : i32
    %c0_i32_1 = arith.constant 0 : i32
    %c0_i32_2 = arith.constant 0 : i32
    return %c0_i32, %c0_i32_0, %c0_i32_1 : i32, i32, i32
  }
  func.func @transform_20(%arg0: i32) -> (i32, i32, i32) {
    %c0_i32 = arith.constant 0 : i32
    %c0_i32_0 = arith.constant 0 : i32
    %c0_i32_1 = arith.constant 0 : i32
    %c0_i32_2 = arith.constant 0 : i32
    return %c0_i32, %c0_i32_0, %c0_i32_1 : i32, i32, i32
  }
  func.func @transform_21(%arg0: i32) -> (i32, i32, i32) {
    %c0_i32 = arith.constant 0 : i32
    %c0_i32_0 = arith.constant 0 : i32
    %c0_i32_1 = arith.constant 0 : i32
    %c0_i32_2 = arith.constant 0 : i32
    return %c0_i32, %c0_i32_0, %c0_i32_1 : i32, i32, i32
  }
  func.func @transform_22(%arg0: i32) -> (i32, i32, i32) {
    %c0_i32 = arith.constant 0 : i32
    %c0_i32_0 = arith.constant 0 : i32
    %c0_i32_1 = arith.constant 0 : i32
    %c0_i32_2 = arith.constant 0 : i32
    return %c0_i32, %c0_i32_0, %c0_i32_1 : i32, i32, i32
  }
  func.func @transform_23(%arg0: i32) -> (i32, i32, i32) {
    %c0_i32 = arith.constant 0 : i32
    %c0_i32_0 = arith.constant 0 : i32
    %c0_i32_1 = arith.constant 0 : i32
    %c0_i32_2 = arith.constant 0 : i32
    return %c0_i32, %c0_i32_0, %c0_i32_1 : i32, i32, i32
  }
  func.func @transform_24(%arg0: i32) -> (i32, i32, i32) {
    %c0_i32 = arith.constant 0 : i32
    %c0_i32_0 = arith.constant 0 : i32
    %c0_i32_1 = arith.constant 0 : i32
    %c0_i32_2 = arith.constant 0 : i32
    return %c0_i32, %c0_i32_0, %c0_i32_1 : i32, i32, i32
  }
  func.func @transform_25(%arg0: i32) -> (i32, i32, i32) {
    %c0_i32 = arith.constant 0 : i32
    %c0_i32_0 = arith.constant 0 : i32
    %c0_i32_1 = arith.constant 0 : i32
    %c0_i32_2 = arith.constant 0 : i32
    return %c0_i32, %c0_i32_0, %c0_i32_1 : i32, i32, i32
  }
  func.func @transform_26(%arg0: i32) -> (i32, i32, i32) {
    %c0_i32 = arith.constant 0 : i32
    %c0_i32_0 = arith.constant 0 : i32
    %c0_i32_1 = arith.constant 0 : i32
    %c0_i32_2 = arith.constant 0 : i32
    return %c0_i32, %c0_i32_0, %c0_i32_1 : i32, i32, i32
  }
  func.func @transform_27(%arg0: i32) -> (i32, i32) {
    %c0_i32 = arith.constant 0 : i32
    %c0_i32_0 = arith.constant 0 : i32
    %c0_i32_1 = arith.constant 0 : i32
    return %c0_i32, %c0_i32_0 : i32, i32
  }
  func.func @transform_28(%arg0: i32) -> (i32, i32) {
    %c0_i32 = arith.constant 0 : i32
    %c0_i32_0 = arith.constant 0 : i32
    %c0_i32_1 = arith.constant 0 : i32
    return %c0_i32, %c0_i32_0 : i32, i32
  }
  func.func @transform_29(%arg0: i32) -> (i32, i32, i32) {
    %c0_i32 = arith.constant 0 : i32
    %c0_i32_0 = arith.constant 0 : i32
    %c0_i32_1 = arith.constant 0 : i32
    return %arg0, %c0_i32, %c0_i32_0 : i32, i32, i32
  }
}

</mosaic_0001>

<bundles_post_ra>
// kernel: pncn_forward.1
= control target key start
LH: loop header
LB: loop body
LE: loop exit
PB: predicated region body
PF: predicated region fallthrough
CT: control target
= control target key end

     0   :  { %s11388_s6 = smov 1   ;;  %s11389_s10 = smov 2   ;;  %s12797_s0 = inlined_call_operand.smem [shape: u32[30], index: -1, kind: input, shape index: {}] }
   0x1   :  { %s11439_s5 = sld [smem:[%s12797_s0]]   ;;  %s11390_s14 = smov 3  }
   0x2   :  { %s11444_s9 = sld [smem:[%s12797_s0 + %s11388_s6]]   ;;  %s11391_s18 = smov 4  }
   0x3   :  { %s11449_s13 = sld [smem:[%s12797_s0 + %s11389_s10]]   ;;  %s11392_s22 = smov 5  }
   0x4   :  { %s11454_s17 = sld [smem:[%s12797_s0 + %s11390_s14]]   ;;  %s11393_s26 = smov 6  }
   0x5   :  { %s11459_s21 = sld [smem:[%s12797_s0 + %s11391_s18]]   ;;  %s11394_s30 = smov 7  }
   0x6   :  { %s11464_s25 = sld [smem:[%s12797_s0 + %s11392_s22]]   ;;  %s11395_s4 = smov 8  }
   0x7   :  { %s11469_s29 = sld [smem:[%s12797_s0 + %s11393_s26]]   ;;  %s11396_s10 = smov 9  }
   0x8   :  { %s11474_s3 = sld [smem:[%s12797_s0 + %s11394_s30]]   ;;  %s11397_s15 = smov 10  }
   0x9   :  { %s11479_s8 = sld [smem:[%s12797_s0 + %s11395_s4]]   ;;  %s11398_s20 = smov 11  }
   0xa   :  { %12823 = sst [smem:[#allocation6_spill]] %s11454_s17  ;;  %s11399_s26 = smov 12  }
   0xb   :  { %s11484_s14 = sld [smem:[%s12797_s0 + %s11396_s10]]   ;;  %s11400_s1 = smov 13  }
   0xc   :  { %s11489_s19 = sld [smem:[%s12797_s0 + %s11397_s15]]   ;;  %s11401_s7 = smov 14  }
   0xd   :  { %s11494_s24 = sld [smem:[%s12797_s0 + %s11398_s20]]   ;;  %s11402_s15 = smov 15  }
   0xe   :  { %12824 = sst [smem:[#allocation7_spill]] %s11474_s3  ;;  %s11403_s22 = smov 16  }
   0xf   :  { %s11499_s30 = sld [smem:[%s12797_s0 + %s11399_s26]]   ;;  %s11404_s28 = smov 17  }
  0x10   :  { %s11504_s6 = sld [smem:[%s12797_s0 + %s11400_s1]]   ;;  %s11416_s1 = smov 29  }
  0x11   :  { %s11509_s12 = sld [smem:[%s12797_s0 + %s11401_s7]]   ;;  %s11405_s7 = smov 18  }
  0x12   :  { %s11514_s20 = sld [smem:[%s12797_s0 + %s11402_s15]]   ;;  %s11406_s15 = smov 19  }
  0x13   :  { %s11519_s27 = sld [smem:[%s12797_s0 + %s11403_s22]]   ;;  %s11407_s22 = smov 20  }
  0x14   :  { %s11524_s4 = sld [smem:[%s12797_s0 + %s11404_s28]]   ;;  %s11408_s28 = smov 21  }
  0x15   :  { %12825 = sst [smem:[#allocation8_spill]] %s11499_s30 }
  0x16   :  { %s11529_s17 = sld [smem:[%s12797_s0 + %s11405_s7]]   ;;  %s11409_s7 = smov 22  }
  0x17   :  { %s11534_s30 = sld [smem:[%s12797_s0 + %s11406_s15]]   ;;  %s11410_s15 = smov 23  }
  0x19   :  { %12826 = sst [smem:[#allocation9_spill]] %s11519_s27 }
  0x1a   :  { %12827 = sst [smem:[#allocation10_spill]] %s11524_s4 }
  0x1b   :  { %s11539_s27 = sld [smem:[%s12797_s0 + %s11407_s22]]   ;;  %s11411_s22 = smov 24  }
  0x1c   :  { %12828 = sst [smem:[#allocation11_spill]] %s11529_s17 }
  0x1d   :  { %12829 = sst [smem:[#allocation12_spill]] %s11534_s30 }
  0x1e   :  { %s11544_s4 = sld [smem:[%s12797_s0 + %s11408_s28]]   ;;  %s11412_s28 = smov 25  }
  0x1f   :  { %s11549_s17 = sld [smem:[%s12797_s0 + %s11409_s7]]   ;;  %s11413_s7 = smov 26  }
  0x20   :  { %s11554_s30 = sld [smem:[%s12797_s0 + %s11410_s15]]   ;;  %s11414_s15 = smov 27  }
  0x21   :  { %12830 = sst [smem:[#allocation13_spill]] %s11539_s27 }
  0x22   :  { %s11559_s27 = sld [smem:[%s12797_s0 + %s11411_s22]]   ;;  %s11415_s22 = smov 28  }
  0x24   :  { %12831 = sst [smem:[#allocation14_spill]] %s11544_s4 }
  0x25   :  { %12832 = sst [smem:[#allocation15_spill]] %s11549_s17 }
  0x26   :  { %12833 = sst [smem:[#allocation16_spill]] %s11554_s30 }
  0x27   :  { %s11564_s4 = sld [smem:[%s12797_s0 + %s11412_s28]]  }
  0x28   :  { %12834 = sst [smem:[#allocation17_spill]] %s11559_s27 }
  0x29   :  { %s11569_s17 = sld [smem:[%s12797_s0 + %s11413_s7]]   ;;  %s11584_s7 = smov 0  }
  0x2a   :  { %s11574_s30 = sld [smem:[%s12797_s0 + %s11414_s15]]  }
  0x2b   :  { %s9210_s27 = sld [smem:[%s12797_s0 + %s11415_s22]]  }
  0x2d   :  { %12835 = sst [smem:[#allocation18_spill]] %s11564_s4 }
  0x2e   :  { %s11582_s4 = sld [smem:[%s12797_s0 + %s11416_s1]]  }
  0x31   :  { %v64_v0 = vstv %s9210_s27 }
  0x32   :  { %65 = vst [vmem:[#allocation5] sm:$0x1] %v64_v0 }
  0x33 LB: > { %s12836_s3 = sld [smem:[#allocation7_spill]]  ;;  %s11590_s10 = sadd.s32 4294967295, %s11386_s7   ;;  %s11386_s7 = sphi %s11584_s7, %s71_s7  }
  0x34   : > { %p9216_p0 = scmp.ge.s32.totalorder %s11386_s7, 1  ;;  %p854_p1 = scmp.lt.s32.totalorder %s11386_s7, 3 }
  0x36   : > { %p855_p2 = pnand %p9216_p0, %p854_p1 }
  0x37   : > { %v975_v1 = vld [vmem:[%s11459_s21] sm:$0xff] (!%p855_p2)  ;;  %v976_v2 = vld [vmem:[%s11459_s21 + $0x8] sm:$0xff] (!%p855_p2)  ;;  %s9217_s0 = sshll.u32 (!%p855_p2), %s11590_s10, 1  ;;  %vm984_vm0 = vcmask (!%p855_p2), 130048   ;;  %vm1072_vm2 = vcmask (!%p855_p2), 261120   ;;  %v1102_v29 = vld [vmem:[%s11469_s29 + $0x10] sm:$0xff] (!%p855_p2) }
  0x38   : > { %858 = sbr.rel (%p855_p2) target bundleno = 13111 (0x3337), region = 136  ;;  %v10604_v3 = vpack.c.bf16 (!%p855_p2), %v976_v2, %v975_v1  ;;  %p946_p3 = scmp.lt.s32.totalorder (!%p855_p2), %s9217_s0, 3  ;;  %v9227_v6 = vld [vmem:[%s11464_s25] ss:$0 sm:$0xff] (!%p855_p2)  ;;  %v1101_v28 = vld [vmem:[%s11469_s29 + $0x8] sm:$0xff] (!%p855_p2)  ;;  %v1103_v31 = vld [vmem:[%s11469_s29 + $0x18] sm:$0xff] (!%p855_p2) }
  0x39   : > { %v1100_v27 = vld [vmem:[%s11469_s29] sm:$0xff] (!%p855_p2)  ;;  %v10612_v32 = vpack.c.bf16 (!%p855_p2), %v1103_v31, %v1102_v29  ;;  %v11417_v43 = vmov (!%p855_p2), 0.0   ;;  %vm11418_vm4 = vmmov (!%p855_p2), 0   ;;  %s11419_s15 = smov (!%p855_p2), 96   ;;  %s11420_s16 = smov (!%p855_p2), 64   ;;  %vm1192_vm5 = vcmask (!%p855_p2), 64512  }
  0x3a   : > { %10605 = vmatprep.subr.bf16.mxu1 (!%p855_p2), %v10604_v3  ;;  %v10608_v30 = vpack.c.bf16 (!%p855_p2), %v1101_v28, %v1100_v27  ;;  %9923 = vmatprep.subr.mxu0 (!%p855_p2), %v11417_v43  ;;  %s11421_s18 = smov (!%p855_p2), 32   ;;  %v1819_v60 = vld [vmem:[%s12836_s3] sm:$0xff] (!%p855_p2)  ;;  %v1820_v61 = vld [vmem:[%s12836_s3 + $0x8] sm:$0xff] (!%p855_p2)  ;;  %v1821_v62 = vld [vmem:[%s12836_s3 + $0x10] sm:$0xff] (!%p855_p2)  ;;  %s12837_s1 = sld [smem:[#allocation8_spill]] (!%p855_p2) }
  0x3b   : > { %10607 = vmatpush3.bf16.msra.mxu1 (!%p855_p2), %v10604_v3  ;;  %9925 = vmatprep.mubr.msk.f32.mxu0 (!%p855_p2), %vm11418_vm4, %v11417_v43  ;;  %v10616_v63 = vpack.c.bf16 (!%p855_p2), %v1820_v61, %v1819_v60  ;;  %v1822_v0 = vld [vmem:[%s12836_s3 + $0x18] sm:$0xff] (!%p855_p2)  ;;  %v2539_v28 = vld [vmem:[%s11479_s8] sm:$0xff] (!%p855_p2)  ;;  %v2540_v29 = vld [vmem:[%s11479_s8 + $0x8] sm:$0xff] (!%p855_p2)  ;;  %s12838_s28 = sld [smem:[#allocation9_spill]] (!%p855_p2)  ;;  %s12841_s2 = sld [smem:[#allocation6_spill]] (!%p855_p2) }
  0x3c   : > { %10609 = vmatprep.subr.bf16.mxu1 (!%p855_p2), %v10608_v30  ;;  %v10620_v1 = vpack.c.bf16 (!%p855_p2), %v1822_v0, %v1821_v62  ;;  %v10624_v31 = vpack.c.bf16 (!%p855_p2), %v2540_v29, %v2539_v28  ;;  %p965_p4 = scmp.lt.s32.totalorder (!%p855_p2), %s11590_s10, 1 }
  0x3f   : > { %s12858_s0 = smov (!%p946_p3, %s9217_s0), 3  ;;  %s12860_s10 = smov (!%p965_p4, %s11590_s10), 1 }
  0x40   : > { %s9218_s27 = sshll.u32 %s12858_s0, 3  ;;  %s9541_s22 = sshll.u32 %s12858_s0, 5 }
  0x41   : > { %s949_s11 = scalar_lea.vmem %s11439_s5, %s9218_s27  ;;  %s11636_s23 = scalar_lea.vmem %s11444_s9, %s9541_s22 }
  0x42   : > { %v973_v4 = vld [vmem:[%s949_s11] sm:$0xff]  ;;  %v974_v5 = vld [vmem:[%s949_s11 + $0x8] sm:$0xff]  ;;  %v11673_v54 = vld [vmem:[%s11636_s23 + $0x30] sm:$0xff]  ;;  %s11719_s26 = scalar_lea.vmem %s11449_s13, %s9541_s22  ;;  %s9543_s0 = sshll.u32 %s12860_s10, 5 }
  0x43   : > { %9909 = vmatprep.mubr.msk.f32.mxu1 %vm984_vm0, %v973_v4  ;;  %v11639_v46 = vld [vmem:[%s11636_s23 + $0x28] sm:$0xff]  ;;  %v11657_v51 = vld [vmem:[%s11636_s23 + $0x20] sm:$0xff]  ;;  %v11676_v55 = vld [vmem:[%s11636_s23 + $0x10] sm:$0xff]  ;;  %s12048_s27 = scalar_lea.vmem %s12841_s2, %s9543_s0  ;;  %s12819_s11 = smov 120  }
  0x44   : > { %9910 = vmatmul.mubr.msk.f32.vlgmr.msra.gmra.mrb[0].mxu1 %vm984_vm0, %v974_v5  ;;  %v11642_v48 = vld [vmem:[%s11636_s23 + $0x8] sm:$0xff]  ;;  %v11660_v53 = vld [vmem:[%s11636_s23] sm:$0xff]  ;;  %v11688_v58 = vld [vmem:[%s11636_s23 + $0x38] sm:$0xff]  ;;  %s12811_s22 = smov 16   ;;  %s12843_s2 = sld [smem:[#allocation11_spill]] }
  0x45   : > { %10611 = vmatpush3.bf16.msra.mxu1 %v10608_v30  ;;  %v11691_v59 = vld [vmem:[%s11636_s23 + $0x18] sm:$0xff]  ;;  %v2541_v30 = vld [vmem:[%s11479_s8 + $0x10] sm:$0xff]  ;;  %s12842_s23 = sld [smem:[#allocation10_spill]]  ;;  %s12844_s0 = sld [smem:[#allocation14_spill]] }
  0x46   : > { %10613 = vmatprep.subr.bf16.mxu1 %v10612_v32  ;;  %v11773_v27 = vld [vmem:[%s11719_s26 + $0x18] sm:$0xff] }
  0x49   : > { %10615 = vmatpush3.bf16.msra.mxu1 %v10612_v32  ;;  %v2542_v32 = vld [vmem:[%s11479_s8 + $0x18] sm:$0xff] }
  0x4a   : > { %9943 = vmatprep.subr.mxu1 %v11417_v43 }
 0x117   : > { %v9911_v7 = vpop.f32.mrb[0].mxu1 }
 0x118   : > { %v1063_v8 = vadd.f32 %v9911_v7, %v9227_v6  ;;  %v1057_v9 = vpop.f32.mrb[1].mxu1 }
 0x119   : > { %v1058_v10 = vadd.f32 %v9227_v6, %v1057_v9 }
 0x11a   : > { %v1069_v11 = vmul.f32 0.01, %v1063_v8  ;;  %vm1067_vm3 = vcmp.ge.f32.partialorder %v1063_v8, 0.0 }
 0x11b   : > { %v1068_v12 = vmul.f32 0.01, %v1058_v10  ;;  %vm1066_vm1 = vcmp.ge.f32.partialorder %v1058_v10, 0.0 }
 0x11c   : > { %v1071_v15 = vsel %vm1067_vm3, %v1063_v8, %v1069_v11 }
 0x11d   : > { %v1070_v13 = vsel %vm1066_vm1, %v1058_v10, %v1068_v12  ;;  %v1076_v16 = vsel %vm1072_vm2, %v1071_v15, 0.0 }
 0x11e   : > { %v1073_v14 = vsel %vm1072_vm2, %v1070_v13, 0.0 }
 0x11f   : > { %1074 = vadd.xlane.f32.xlu0 %v1073_v14  ;;  %v11722_v14 = vld [vmem:[%s11719_s26 + $0x28] sm:$0xff] }
 0x123   : > { %1077 = vadd.xlane.f32.xlu0 %v1076_v16  ;;  %v11725_v16 = vld [vmem:[%s11719_s26 + $0x8] sm:$0xff] }
 0x1ac   : > { %v1075_v17 = vpop.xlane.xlu0 %1074 }
 0x1ad   : > { %v1080_v18 = vmul.f32 0.03125, %v1075_v17 }
 0x1af   : > { %v1082_v19 = vsub.f32 %v1070_v13, %v1080_v18  ;;  %v11740_v18 = vld [vmem:[%s11719_s26 + $0x20] sm:$0xff] }
 0x1b0   : > { %v1078_v20 = vpop.xlane.xlu0 %1077 }
 0x1b1   : > { %v1081_v21 = vmul.f32 0.03125, %v1078_v20  ;;  %v1084_v22 = vmul.f32 %v1082_v19, %v1082_v19 }
 0x1b3   : > { %v1083_v23 = vsub.f32 %v1071_v15, %v1081_v21  ;;  %v1086_v24 = vsel %vm1072_vm2, %v1084_v22, 0.0  ;;  %v11756_v22 = vld [vmem:[%s11719_s26 + $0x30] sm:$0xff] }
 0x1b4   : > { %1087 = vadd.xlane.f32.xlu1 %v1086_v24 }
 0x1b5   : > { %v1085_v25 = vmul.f32 %v1083_v23, %v1083_v23 }
 0x1b7   : > { %v1089_v26 = vsel %vm1072_vm2, %v1085_v25, 0.0 }
 0x1b8   : > { %1090 = vadd.xlane.f32.xlu1 %v1089_v26  ;;  %v11770_v26 = vld [vmem:[%s11719_s26 + $0x38] sm:$0xff] }
 0x241   : > { %v1088_v33 = vpop.xlane.xlu1 %1087 }
 0x242   : > { %v1092_v34 = vmul.f32 0.03125, %v1088_v33  ;;  %v10628_v33 = vpack.c.bf16 %v2542_v32, %v2541_v30 }
 0x244   : > { %v1094_v35 = vadd.f32 1e-05, %v1092_v34 }
 0x245   : > { %v1091_v36 = vpop.xlane.xlu1 %1090 }
 0x246   : > { %11172 = vrsqrt.f32 %v1094_v35  ;;  %v1093_v37 = vmul.f32 0.03125, %v1091_v36 }
 0x248   : > { %v1095_v38 = vadd.f32 1e-05, %v1093_v37 }
 0x24a   : > { %11174 = vrsqrt.f32 %v1095_v38 }
 0x250   : > { %v11173_v39 = vpop.eup %11172 }
 0x251   : > { %v11612_v40 = vmul.f32 %v11173_v39, %v1082_v19  ;;  %v11743_v19 = vld [vmem:[%s11719_s26] sm:$0xff] }
 0x253   : > { %9920 = vmatprep.mubr.msk.f32.mxu1 %vm1072_vm2, %v11612_v40 }
 0x254   : > { %v11175_v41 = vpop.eup %11174 }
 0x255   : > { %v11616_v42 = vmul.f32 %v11175_v41, %v1083_v23  ;;  %v11759_v23 = vld [vmem:[%s11719_s26 + $0x10] sm:$0xff]  ;;  %s12809_s26 = smov 24  }
 0x257   : > { %9921 = vmatmul.mubr.msk.f32.vlgmr.msra.gmra.mrb[2].mxu1 %vm1072_vm2, %v11616_v42 }
 0x258   : > { %9945 = vmatprep.mubr.msk.f32.mxu1 %vm11418_vm4, %v11417_v43 }
 0x32a   : > { %v9922_v44 = vpop.f32.mrb[2].mxu1 }
 0x32b   : > { %1503 = vrot.lane.b32.xlu1 %v9922_v44, %s11419_s15  ;;  %v1176_v45 = vpop.f32.mrb[3].mxu1 }
 0x32c   : > { %1189 = vrot.lane.b32.xlu0 %v1176_v45, %s11419_s15 }
 0x32f   : > { %1341 = vrot.lane.b32.xlu1 %v1176_v45, %s11420_s16 }
 0x330   : > { %1420 = vrot.lane.b32.xlu0 %v1176_v45, %s11421_s18 }
 0x333   : > { %1654 = vrot.lane.b32.xlu1 %v9922_v44, %s11420_s16 }
 0x337   : > { %1733 = vrot.lane.b32.xlu1 %v9922_v44, %s11421_s18 }
 0x39d   : > { %v1504_v47 = vpop.permute.xlu1 %1503 }
 0x39e   : > { %9944 = vmatpush3.msra.mxu1 %v1504_v47  ;;  %v1190_v49 = vpop.permute.xlu0 %1189 }
 0x39f   : > { %9924 = vmatpush3.msra.mxu0 %v1190_v49  ;;  %9946 = vmatmul.mubr.msk.f32.vlgmr.msra.gmra.mrb[4].mxu1 %vm1192_vm5, %v11639_v46 }
 0x3a0   : > { %9948 = vmatprep.subr.mxu1 %v11417_v43  ;;  %9926 = vmatmul.mubr.msk.f32.vlgmr.msra.gmra.mrb[0].mxu0 %vm1192_vm5, %v11642_v48 }
 0x3a1   : > { %9928 = vmatprep.subr.mxu0 %v11417_v43  ;;  %9949 = vmatpush3.msra.mxu1 %v9922_v44  ;;  %v1342_v50 = vpop.permute.xlu1 %1341 }
 0x3a2   : > { %9929 = vmatpush3.msra.mxu0 %v1176_v45  ;;  %9950 = vmatprep.mubr.msk.f32.mxu1 %vm11418_vm4, %v11417_v43  ;;  %v1421_v57 = vpop.permute.xlu0 %1420 }
 0x3a3   : > { %9953 = vmatprep.subr.mxu1 %v11417_v43  ;;  %9930 = vmatprep.mubr.msk.f32.mxu0 %vm11418_vm4, %v11417_v43 }
 0x3a4   : > { %9933 = vmatprep.subr.mxu0 %v11417_v43 }
 0x3a5   : > { %v1655_v52 = vpop.permute.xlu1 %1654 }
 0x3a7   : > { %9951 = vmatmul.mubr.msk.f32.vlgmr.msra.gmra.mrb[4].mxu1 %vm1192_vm5, %v11657_v51 }
 0x3a8   : > { %9954 = vmatpush3.msra.mxu1 %v1655_v52  ;;  %9931 = vmatmul.mubr.msk.f32.vlgmr.msra.gmra.mrb[0].mxu0 %vm1192_vm5, %v11660_v53  ;;  %v9264_v52 = vld [vmem:[%s11484_s14] ss:$0 sm:$0xff] }
 0x3a9   : > { %9934 = vmatpush3.msra.mxu0 %v1342_v50  ;;  %9955 = vmatprep.mubr.msk.f32.mxu1 %vm11418_vm4, %v11417_v43  ;;  %v1734_v56 = vpop.permute.xlu1 %1733 }
 0x3aa   : > { %9958 = vmatprep.subr.mxu1 %v11417_v43  ;;  %9935 = vmatprep.mubr.msk.f32.mxu0 %vm11418_vm4, %v11417_v43 }
 0x3ab   : > { %9938 = vmatprep.subr.mxu0 %v11417_v43 }
 0x3af   : > { %9956 = vmatmul.mubr.msk.f32.vlgmr.msra.gmra.mrb[4].mxu1 %vm1192_vm5, %v11673_v54 }
 0x3b0   : > { %9959 = vmatpush3.msra.mxu1 %v1734_v56  ;;  %9936 = vmatmul.mubr.msk.f32.vlgmr.msra.gmra.mrb[0].mxu0 %vm1192_vm5, %v11676_v55 }
 0x3b1   : > { %9939 = vmatpush3.msra.mxu0 %v1421_v57  ;;  %9960 = vmatprep.mubr.msk.f32.mxu1 %vm11418_vm4, %v11417_v43 }
 0x3b2   : > { %9940 = vmatprep.mubr.msk.f32.mxu0 %vm11418_vm4, %v11417_v43  ;;  %9974 = vmatprep.subr.mxu1 %v11417_v43 }
 0x3b3   : > { %10617 = vmatprep.subr.bf16.mxu0 %v10616_v63 }
 0x3b7   : > { %9961 = vmatmul.mubr.msk.f32.vlgmr.msra.gmra.mrb[4].mxu1 %vm1192_vm5, %v11688_v58 }
 0x3b8   : > { %9941 = vmatmul.mubr.msk.f32.vlgmr.msra.gmra.mrb[0].mxu0 %vm1192_vm5, %v11691_v59  ;;  %9976 = vmatprep.mubr.msk.f32.mxu1 %vm11418_vm4, %v11417_v43 }
 0x3b9   : > { %10619 = vmatpush3.bf16.msra.mxu0 %v10616_v63 }
 0x3ba   : > { %10621 = vmatprep.subr.bf16.mxu0 %v10620_v1 }
 0x3bd   : > { %10623 = vmatpush3.bf16.msra.mxu0 %v10620_v1 }
 0x3be   : > { %9994 = vmatprep.subr.mxu0 %v11417_v43 }
 0x48a   : > { %v1805_v2 = vpop.f32.mrb[4].mxu1 }
 0x48b   : > { %1810 = vst.msk [vmem:[#allocation3 + $0x8] sm:$0xff] %vm1072_vm2, %v1805_v2  ;;  %v1492_v3 = vpop.f32.mrb[0].mxu0  ;;  %v9962_v4 = vpop.f32.mrb[5].mxu1 }
 0x48c   : > { %1497 = vst.msk [vmem:[#allocation3] sm:$0xff] %vm1072_vm2, %v1492_v3  ;;  %v9942_v5 = vpop.f32.mrb[1].mxu0 }
 0x492   : > { %v1812_v6 = vld [vmem:[#allocation3 + $0x8] sm:$0xff] }
 0x493   : > { %v1811_v7 = vld [vmem:[#allocation3] sm:$0xff]  ;;  %v1816_v8 = vmul.f32 0.01, %v1812_v6  ;;  %vm1814_vm7 = vcmp.ge.f32.partialorder %v1812_v6, 0.0 }
 0x494   : > { %vm1813_vm6 = vcmp.ge.f32.partialorder %v1811_v7, 0.0  ;;  %v1815_v9 = vmul.f32 0.01, %v1811_v7 }
 0x495   : > { %v1818_v11 = vsel %vm1814_vm7, %v1812_v6, %v1816_v8  ;;  %vm6380_vm7 = vcmask 195584  }
 0x496   : > { %v1817_v10 = vsel %vm1813_vm6, %v1811_v7, %v1815_v9  ;;  %vm12007_vm6 = vmpackc.low %vm1192_vm5, %vm1192_vm5 }
 0x497   : > { %9971 = vmatprep.mubr.msk.f32.mxu0 %vm1072_vm2, %v1817_v10 }
 0x498   : > { %9972 = vmatmul.mubr.msk.f32.vlgmr.msra.gmra.mrb[2].mxu0 %vm1072_vm2, %v1818_v11 }
 0x499   : > { %9996 = vmatprep.mubr.msk.f32.mxu0 %vm11418_vm4, %v11417_v43 }
 0x56b   : > { %v9973_v12 = vpop.f32.mrb[2].mxu0 }
 0x56c   : > { %2221 = vrot.lane.b32.xlu1 %v9973_v12, %s11419_s15  ;;  %v1895_v13 = vpop.f32.mrb[3].mxu0 }
 0x56d   : > { %1908 = vrot.lane.b32.xlu0 %v1895_v13, %s11419_s15 }
 0x570   : > { %2372 = vrot.lane.b32.xlu1 %v9973_v12, %s11420_s16 }
 0x571   : > { %2059 = vrot.lane.b32.xlu0 %v1895_v13, %s11420_s16 }
 0x574   : > { %2451 = vrot.lane.b32.xlu1 %v9973_v12, %s11421_s18 }
 0x575   : > { %2138 = vrot.lane.b32.xlu0 %v1895_v13, %s11421_s18 }
 0x5de   : > { %v2222_v15 = vpop.permute.xlu1 %2221 }
 0x5df   : > { %9995 = vmatpush3.msra.mxu0 %v2222_v15  ;;  %v1909_v17 = vpop.permute.xlu0 %1908  ;;  %v9269_v15 = vld [vmem:[%s11469_s29 + $0x30] sm:$0xff] }
 0x5e0   : > { %9975 = vmatpush3.msra.mxu1 %v1909_v17  ;;  %9997 = vmatmul.mubr.msk.f32.vlgmr.msra.gmra.mrb[4].mxu0 %vm1192_vm5, %v11722_v14 }
 0x5e1   : > { %9999 = vmatprep.subr.mxu0 %v11417_v43  ;;  %9977 = vmatmul.mubr.msk.f32.vlgmr.msra.gmra.mrb[6].mxu1 %vm1192_vm5, %v11725_v16 }
 0x5e2   : > { %9979 = vmatprep.subr.mxu1 %v11417_v43  ;;  %10000 = vmatpush3.msra.mxu0 %v9973_v12  ;;  %v2373_v20 = vpop.permute.xlu1 %2372  ;;  %v9267_v12 = vld [vmem:[%s11469_s29 + $0x20] sm:$0xff] }
 0x5e3   : > { %9980 = vmatpush3.msra.mxu1 %v1895_v13  ;;  %10001 = vmatprep.mubr.msk.f32.mxu0 %vm11418_vm4, %v11417_v43  ;;  %v2060_v21 = vpop.permute.xlu0 %2059  ;;  %v9268_v13 = vld [vmem:[%s11469_s29 + $0x28] sm:$0xff] }
 0x5e4   : > { %10004 = vmatprep.subr.mxu0 %v11417_v43  ;;  %9981 = vmatprep.mubr.msk.f32.mxu1 %vm11418_vm4, %v11417_v43  ;;  %v10632_v17 = vpack.c.bf16 %v9268_v13, %v9267_v12  ;;  %v9312_v12 = vld [vmem:[%s11479_s8 + $0x38] sm:$0xff] }
 0x5e5   : > { %9984 = vmatprep.subr.mxu1 %v11417_v43 }
 0x5e6   : > { %v2452_v24 = vpop.permute.xlu1 %2451 }
 0x5e7   : > { %v2139_v25 = vpop.permute.xlu0 %2138 }
 0x5e8   : > { %10002 = vmatmul.mubr.msk.f32.vlgmr.msra.gmra.mrb[4].mxu0 %vm1192_vm5, %v11740_v18 }
 0x5e9   : > { %10005 = vmatpush3.msra.mxu0 %v2373_v20  ;;  %9982 = vmatmul.mubr.msk.f32.vlgmr.msra.gmra.mrb[6].mxu1 %vm1192_vm5, %v11743_v19  ;;  %v9270_v20 = vld [vmem:[%s11469_s29 + $0x38] sm:$0xff] }
 0x5ea   : > { %9985 = vmatpush3.msra.mxu1 %v2060_v21  ;;  %10006 = vmatprep.mubr.msk.f32.mxu0 %vm11418_vm4, %v11417_v43  ;;  %v10636_v21 = vpack.c.bf16 %v9270_v20, %v9269_v15 }
 0x5eb   : > { %10009 = vmatprep.subr.mxu0 %v11417_v43  ;;  %9986 = vmatprep.mubr.msk.f32.mxu1 %vm11418_vm4, %v11417_v43 }
 0x5ec   : > { %9989 = vmatprep.subr.mxu1 %v11417_v43 }
 0x5f0   : > { %10007 = vmatmul.mubr.msk.f32.vlgmr.msra.gmra.mrb[4].mxu0 %vm1192_vm5, %v11756_v22 }
 0x5f1   : > { %10010 = vmatpush3.msra.mxu0 %v2452_v24  ;;  %9987 = vmatmul.mubr.msk.f32.vlgmr.msra.gmra.mrb[6].mxu1 %vm1192_vm5, %v11759_v23 }
 0x5f2   : > { %9990 = vmatpush3.msra.mxu1 %v2139_v25  ;;  %10011 = vmatprep.mubr.msk.f32.mxu0 %vm11418_vm4, %v11417_v43 }
 0x5f3   : > { %9991 = vmatprep.mubr.msk.f32.mxu1 %vm11418_vm4, %v11417_v43  ;;  %10625 = vmatprep.subr.bf16.mxu1 %v10624_v31 }
 0x5f4   : > { %10633 = vmatprep.subr.bf16.mxu0 %v10632_v17 }
 0x5f8   : > { %10012 = vmatmul.mubr.msk.f32.vlgmr.msra.gmra.mrb[4].mxu0 %vm1192_vm5, %v11770_v26 }
 0x5f9   : > { %9992 = vmatmul.mubr.msk.f32.vlgmr.msra.gmra.mrb[6].mxu1 %vm1192_vm5, %v11773_v27  ;;  %10635 = vmatpush3.bf16.msra.mxu0 %v10632_v17 }
 0x5fa   : > { %10627 = vmatpush3.bf16.msra.mxu1 %v10624_v31  ;;  %10637 = vmatprep.subr.bf16.mxu0 %v10636_v21 }
 0x5fb   : > { %10629 = vmatprep.subr.bf16.mxu1 %v10628_v33 }
 0x5fd   : > { %10639 = vmatpush3.bf16.msra.mxu0 %v10636_v21 }
 0x5fe   : > { %10631 = vmatpush3.bf16.msra.mxu1 %v10628_v33  ;;  %10056 = vmatprep.subr.mxu0 %v11417_v43 }
 0x5ff   : > { %10036 = vmatprep.subr.mxu1 %v11417_v43 }
 0x6cb   : > { %v2523_v34 = vpop.f32.mrb[4].mxu0 }
 0x6cc   : > { %2528 = vst.msk [vmem:[#allocation4 + $0x8] sm:$0xff] %vm1072_vm2, %v2523_v34  ;;  %v2210_v35 = vpop.f32.mrb[6].mxu1  ;;  %v10013_v36 = vpop.f32.mrb[5].mxu0 }
 0x6cd   : > { %2215 = vst.msk [vmem:[#allocation4] sm:$0xff] %vm1072_vm2, %v2210_v35  ;;  %v9993_v37 = vpop.f32.mrb[7].mxu1 }
 0x6d3   : > { %v2530_v38 = vld [vmem:[#allocation4 + $0x8] sm:$0xff] }
 0x6d4   : > { %v2529_v39 = vld [vmem:[#allocation4] sm:$0xff]  ;;  %v2532_v41 = vadd.f32 %v2530_v38, %v11616_v42 }
 0x6d5   : > { %v2531_v44 = vadd.f32 %v2529_v39, %v11612_v40 }
 0x6d6   : > { %v2536_v45 = vmul.f32 0.01, %v2532_v41  ;;  %vm2534_vm9 = vcmp.ge.f32.partialorder %v2532_v41, 0.0 }
 0x6d7   : > { %vm2533_vm8 = vcmp.ge.f32.partialorder %v2531_v44, 0.0  ;;  %v2535_v47 = vmul.f32 0.01, %v2531_v44 }
 0x6d8   : > { %v2538_v50 = vsel %vm2534_vm9, %v2532_v41, %v2536_v45 }
 0x6d9   : > { %v2537_v49 = vsel %vm2533_vm8, %v2531_v44, %v2535_v47 }
 0x6da   : > { %10022 = vmatprep.mubr.msk.f32.mxu1 %vm1072_vm2, %v2537_v49  ;;  %v9288_v49 = vld [vmem:[%s12836_s3 + $0x20] sm:$0xff] }
 0x6db   : > { %10023 = vmatmul.mubr.msk.f32.vlgmr.msra.gmra.mrb[8].mxu1 %vm1072_vm2, %v2538_v50  ;;  %v9289_v50 = vld [vmem:[%s12836_s3 + $0x28] sm:$0xff] }
 0x6dc   : > { %10038 = vmatprep.mubr.msk.f32.mxu1 %vm11418_vm4, %v11417_v43 }
 0x7ae   : > { %v10024_v56 = vpop.f32.mrb[8].mxu1 }
 0x7af   : > { %v2628_v57 = vadd.f32 %v10024_v56, %v9264_v52  ;;  %v2622_v60 = vpop.f32.mrb[9].mxu1  ;;  %v10640_v56 = vpack.c.bf16 %v9289_v50, %v9288_v49 }
 0x7b0   : > { %v2623_v42 = vadd.f32 %v9264_v52, %v2622_v60  ;;  %v9290_v52 = vld [vmem:[%s12836_s3 + $0x30] sm:$0xff] }
 0x7b1   : > { %v2634_v61 = vmul.f32 0.01, %v2628_v57  ;;  %vm2632_vm10 = vcmp.ge.f32.partialorder %v2628_v57, 0.0 }
 0x7b2   : > { %v2633_v40 = vmul.f32 0.01, %v2623_v42  ;;  %vm2631_vm11 = vcmp.ge.f32.partialorder %v2623_v42, 0.0 }
 0x7b3   : > { %v2636_v62 = vsel %vm2632_vm10, %v2628_v57, %v2634_v61  ;;  %v9291_v57 = vld [vmem:[%s12836_s3 + $0x38] sm:$0xff]  ;;  %s12855_s3 = smov 16  }
 0x7b4   : > { %v2640_v63 = vsel %vm1072_vm2, %v2636_v62, 0.0  ;;  %v2635_v0 = vsel %vm2631_vm11, %v2623_v42, %v2633_v40  ;;  %v10644_v60 = vpack.c.bf16 %v9291_v57, %v9290_v52 }
 0x7b5   : > { %2641 = vadd.xlane.f32.xlu1 %v2640_v63  ;;  %v2637_v1 = vsel %vm1072_vm2, %v2635_v0, 0.0 }
 0x7b6   : > { %2638 = vadd.xlane.f32.xlu0 %v2637_v1 }
 0x842   : > { %v2642_v2 = vpop.xlane.xlu1 %2641 }
 0x843   : > { %v2644_v3 = vmul.f32 0.03125, %v2642_v2  ;;  %v2639_v4 = vpop.xlane.xlu0 %2638 }
 0x844   : > { %v2643_v5 = vmul.f32 0.03125, %v2639_v4 }
 0x845   : > { %v2646_v6 = vsub.f32 %v2636_v62, %v2644_v3 }
 0x846   : > { %v2645_v7 = vsub.f32 %v2635_v0, %v2643_v5 }
 0x847   : > { %v2648_v10 = vmul.f32 %v2646_v6, %v2646_v6 }
 0x848   : > { %v2647_v8 = vmul.f32 %v2645_v7, %v2645_v7 }
 0x849   : > { %v2652_v11 = vsel %vm1072_vm2, %v2648_v10, 0.0  ;;  %v9311_v10 = vld [vmem:[%s11479_s8 + $0x30] sm:$0xff] }
 0x84a   : > { %v2649_v9 = vsel %vm1072_vm2, %v2647_v8, 0.0  ;;  %v10652_v13 = vpack.c.bf16 %v9312_v12, %v9311_v10 }
 0x84b   : > { %2650 = vadd.xlane.f32.xlu0 %v2649_v9 }
 0x84f   : > { %2653 = vadd.xlane.f32.xlu0 %v2652_v11 }
 0x8d8   : > { %v2651_v24 = vpop.xlane.xlu0 %2650 }
 0x8d9   : > { %v2655_v25 = vmul.f32 0.03125, %v2651_v24 }
 0x8db   : > { %v2657_v28 = vadd.f32 1e-05, %v2655_v25 }
 0x8dc   : > { %v2654_v29 = vpop.xlane.xlu0 %2653 }
 0x8dd   : > { %11176 = vrsqrt.f32 %v2657_v28  ;;  %v2656_v30 = vmul.f32 0.03125, %v2654_v29 }
 0x8df   : > { %v2658_v31 = vadd.f32 1e-05, %v2656_v30 }
 0x8e1   : > { %11178 = vrsqrt.f32 %v2658_v31  ;;  %v9314_v31 = vld [vmem:[%s11484_s14 + $0x1] ss:$0 sm:$0xff] }
 0x8e7   : > { %v11177_v32 = vpop.eup %11176 }
 0x8e8   : > { %v11802_v33 = vmul.f32 %v11177_v32, %v2645_v7 }
 0x8ea   : > { %10033 = vmatprep.mubr.msk.f32.mxu0 %vm1072_vm2, %v11802_v33 }
 0x8eb   : > { %v11179_v34 = vpop.eup %11178 }
 0x8ec   : > { %v11806_v35 = vmul.f32 %v11179_v34, %v2646_v6 }
 0x8ee   : > { %10034 = vmatmul.mubr.msk.f32.vlgmr.msra.gmra.mrb[6].mxu0 %vm1072_vm2, %v11806_v35 }
 0x8ef   : > { %10058 = vmatprep.mubr.msk.f32.mxu0 %vm11418_vm4, %v11417_v43 }
 0x9c1   : > { %v10035_v36 = vpop.f32.mrb[6].mxu0 }
 0x9c2   : > { %3061 = vrot.lane.b32.xlu1 %v10035_v36, %s11419_s15  ;;  %v2740_v37 = vpop.f32.mrb[7].mxu0 }
 0x9c3   : > { %2752 = vrot.lane.b32.xlu0 %v2740_v37, %s11419_s15 }
 0x9c6   : > { %2902 = vrot.lane.b32.xlu1 %v2740_v37, %s11420_s16 }
 0x9c7   : > { %2980 = vrot.lane.b32.xlu0 %v2740_v37, %s11421_s18 }
 0x9ca   : > { %3211 = vrot.lane.b32.xlu1 %v10035_v36, %s11420_s16 }
 0x9ce   : > { %3289 = vrot.lane.b32.xlu1 %v10035_v36, %s11421_s18 }
 0xa34   : > { %v3062_v38 = vpop.permute.xlu1 %3061 }
 0xa35   : > { %10057 = vmatpush3.msra.mxu0 %v3062_v38  ;;  %v2753_v39 = vpop.permute.xlu0 %2752 }
 0xa36   : > { %10037 = vmatpush3.msra.mxu1 %v2753_v39  ;;  %10059 = vmatmul.mubr.msk.f32.vlgmr.msra.gmra.mrb[8].mxu0 %vm1192_vm5, %v11639_v46 }
 0xa37   : > { %10061 = vmatprep.subr.mxu0 %v11417_v43  ;;  %10039 = vmatmul.mubr.msk.f32.vlgmr.msra.gmra.mrb[10].mxu1 %vm1192_vm5, %v11642_v48 }
 0xa38   : > { %10041 = vmatprep.subr.mxu1 %v11417_v43  ;;  %10062 = vmatpush3.msra.mxu0 %v10035_v36  ;;  %v2903_v41 = vpop.permute.xlu1 %2902 }
 0xa39   : > { %10042 = vmatpush3.msra.mxu1 %v2740_v37  ;;  %10063 = vmatprep.mubr.msk.f32.mxu0 %vm11418_vm4, %v11417_v43  ;;  %v2981_v47 = vpop.permute.xlu0 %2980 }
 0xa3a   : > { %10066 = vmatprep.subr.mxu0 %v11417_v43  ;;  %10043 = vmatprep.mubr.msk.f32.mxu1 %vm11418_vm4, %v11417_v43 }
 0xa3b   : > { %10046 = vmatprep.subr.mxu1 %v11417_v43 }
 0xa3c   : > { %v3212_v44 = vpop.permute.xlu1 %3211 }
 0xa3e   : > { %10064 = vmatmul.mubr.msk.f32.vlgmr.msra.gmra.mrb[8].mxu0 %vm1192_vm5, %v11657_v51 }
 0xa3f   : > { %10067 = vmatpush3.msra.mxu0 %v3212_v44  ;;  %10044 = vmatmul.mubr.msk.f32.vlgmr.msra.gmra.mrb[10].mxu1 %vm1192_vm5, %v11660_v53 }
 0xa40   : > { %10047 = vmatpush3.msra.mxu1 %v2903_v41  ;;  %10068 = vmatprep.mubr.msk.f32.mxu0 %vm11418_vm4, %v11417_v43  ;;  %v3290_v45 = vpop.permute.xlu1 %3289 }
 0xa41   : > { %10071 = vmatprep.subr.mxu0 %v11417_v43  ;;  %10048 = vmatprep.mubr.msk.f32.mxu1 %vm11418_vm4, %v11417_v43 }
 0xa42   : > { %10051 = vmatprep.subr.mxu1 %v11417_v43 }
 0xa46   : > { %10069 = vmatmul.mubr.msk.f32.vlgmr.msra.gmra.mrb[8].mxu0 %vm1192_vm5, %v11673_v54 }
 0xa47   : > { %10072 = vmatpush3.msra.mxu0 %v3290_v45  ;;  %10049 = vmatmul.mubr.msk.f32.vlgmr.msra.gmra.mrb[10].mxu1 %vm1192_vm5, %v11676_v55 }
 0xa48   : > { %10052 = vmatpush3.msra.mxu1 %v2981_v47  ;;  %10073 = vmatprep.mubr.msk.f32.mxu0 %vm11418_vm4, %v11417_v43 }
 0xa49   : > { %10053 = vmatprep.mubr.msk.f32.mxu1 %vm11418_vm4, %v11417_v43  ;;  %10087 = vmatprep.subr.mxu0 %v11417_v43 }
 0xa4a   : > { %10641 = vmatprep.subr.bf16.mxu1 %v10640_v56 }
 0xa4e   : > { %10074 = vmatmul.mubr.msk.f32.vlgmr.msra.gmra.mrb[8].mxu0 %vm1192_vm5, %v11688_v58 }
 0xa4f   : > { %10054 = vmatmul.mubr.msk.f32.vlgmr.msra.gmra.mrb[10].mxu1 %vm1192_vm5, %v11691_v59  ;;  %10089 = vmatprep.mubr.msk.f32.mxu0 %vm11418_vm4, %v11417_v43 }
 0xa50   : > { %10643 = vmatpush3.bf16.msra.mxu1 %v10640_v56 }
 0xa51   : > { %10645 = vmatprep.subr.bf16.mxu1 %v10644_v60 }
 0xa54   : > { %10647 = vmatpush3.bf16.msra.mxu1 %v10644_v60 }
 0xa55   : > { %10107 = vmatprep.subr.mxu1 %v11417_v43 }
 0xb21   : > { %v3361_v42 = vpop.f32.mrb[8].mxu0 }
 0xb22   : > { %3366 = vst.msk [vmem:[#allocation3 + $0x8] sm:$0xff] %vm1072_vm2, %v3361_v42  ;;  %v3052_v61 = vpop.f32.mrb[10].mxu1  ;;  %v10075_v40 = vpop.f32.mrb[9].mxu0 }
 0xb23   : > { %3057 = vst.msk [vmem:[#allocation3] sm:$0xff] %vm1072_vm2, %v3052_v61  ;;  %v10055_v62 = vpop.f32.mrb[11].mxu1  ;;  %v4215_v40 = vld [vmem:[%s11489_s19] sm:$0xff] }
 0xb24   : > { %v4216_v62 = vld [vmem:[%s11489_s19 + $0x8] sm:$0xff] }
 0xb29   : > { %v3368_v63 = vld [vmem:[#allocation3 + $0x8] sm:$0xff] }
 0xb2a   : > { %v3367_v0 = vld [vmem:[#allocation3] sm:$0xff]  ;;  %v3372_v1 = vmul.f32 0.01, %v3368_v63  ;;  %vm3370_vm13 = vcmp.ge.f32.partialorder %v3368_v63, 0.0 }
 0xb2b   : > { %vm3369_vm12 = vcmp.ge.f32.partialorder %v3367_v0, 0.0  ;;  %v3371_v2 = vmul.f32 0.01, %v3367_v0 }
 0xb2c   : > { %v3374_v4 = vsel %vm3370_vm13, %v3368_v63, %v3372_v1  ;;  %v4217_v63 = vld [vmem:[%s11489_s19 + $0x10] sm:$0xff]  ;;  %v4218_v1 = vld [vmem:[%s11489_s19 + $0x18] sm:$0xff] }
 0xb2d   : > { %v3373_v3 = vsel %vm3369_vm12, %v3367_v0, %v3371_v2  ;;  %v10656_v0 = vpack.c.bf16 %v4216_v62, %v4215_v40  ;;  %v10660_v2 = vpack.c.bf16 %v4218_v1, %v4217_v63  ;;  %vm6802_vm12 = vcmask 523264  }
 0xb2e   : > { %10084 = vmatprep.mubr.msk.f32.mxu1 %vm1072_vm2, %v3373_v3 }
 0xb2f   : > { %10085 = vmatmul.mubr.msk.f32.vlgmr.msra.gmra.mrb[12].mxu1 %vm1072_vm2, %v3374_v4 }
 0xb30   : > { %10109 = vmatprep.mubr.msk.f32.mxu1 %vm11418_vm4, %v11417_v43 }
 0xc02   : > { %v10086_v5 = vpop.f32.mrb[12].mxu1 }
 0xc03   : > { %3773 = vrot.lane.b32.xlu1 %v10086_v5, %s11419_s15  ;;  %v3452_v6 = vpop.f32.mrb[13].mxu1 }
 0xc04   : > { %3464 = vrot.lane.b32.xlu0 %v3452_v6, %s11419_s15 }
 0xc07   : > { %3923 = vrot.lane.b32.xlu1 %v10086_v5, %s11420_s16 }
 0xc08   : > { %3614 = vrot.lane.b32.xlu0 %v3452_v6, %s11420_s16 }
 0xc0b   : > { %4001 = vrot.lane.b32.xlu1 %v10086_v5, %s11421_s18 }
 0xc0c   : > { %3692 = vrot.lane.b32.xlu0 %v3452_v6, %s11421_s18 }
 0xc75   : > { %v3774_v7 = vpop.permute.xlu1 %3773 }
 0xc76   : > { %10108 = vmatpush3.msra.mxu1 %v3774_v7  ;;  %v3465_v8 = vpop.permute.xlu0 %3464 }
 0xc77   : > { %10088 = vmatpush3.msra.mxu0 %v3465_v8  ;;  %10110 = vmatmul.mubr.msk.f32.vlgmr.msra.gmra.mrb[14].mxu1 %vm1192_vm5, %v11722_v14 }
 0xc78   : > { %10112 = vmatprep.subr.mxu1 %v11417_v43  ;;  %10090 = vmatmul.mubr.msk.f32.vlgmr.msra.gmra.mrb[10].mxu0 %vm1192_vm5, %v11725_v16 }
 0xc79   : > { %10092 = vmatprep.subr.mxu0 %v11417_v43  ;;  %10113 = vmatpush3.msra.mxu1 %v10086_v5  ;;  %v3924_v14 = vpop.permute.xlu1 %3923 }
 0xc7a   : > { %10093 = vmatpush3.msra.mxu0 %v3452_v6  ;;  %10114 = vmatprep.mubr.msk.f32.mxu1 %vm11418_vm4, %v11417_v43  ;;  %v3615_v9 = vpop.permute.xlu0 %3614 }
 0xc7b   : > { %10117 = vmatprep.subr.mxu1 %v11417_v43  ;;  %10094 = vmatprep.mubr.msk.f32.mxu0 %vm11418_vm4, %v11417_v43 }
 0xc7c   : > { %10097 = vmatprep.subr.mxu0 %v11417_v43 }
 0xc7d   : > { %v4002_v16 = vpop.permute.xlu1 %4001 }
 0xc7f   : > { %10115 = vmatmul.mubr.msk.f32.vlgmr.msra.gmra.mrb[14].mxu1 %vm1192_vm5, %v11740_v18  ;;  %v3693_v18 = vpop.permute.xlu0 %3692 }
 0xc80   : > { %10118 = vmatpush3.msra.mxu1 %v3924_v14  ;;  %10095 = vmatmul.mubr.msk.f32.vlgmr.msra.gmra.mrb[10].mxu0 %vm1192_vm5, %v11743_v19  ;;  %v9309_v19 = vld [vmem:[%s11479_s8 + $0x20] sm:$0xff] }
 0xc81   : > { %10098 = vmatpush3.msra.mxu0 %v3615_v9  ;;  %10119 = vmatprep.mubr.msk.f32.mxu1 %vm11418_vm4, %v11417_v43 }
 0xc82   : > { %10122 = vmatprep.subr.mxu1 %v11417_v43  ;;  %10099 = vmatprep.mubr.msk.f32.mxu0 %vm11418_vm4, %v11417_v43 }
 0xc83   : > { %10102 = vmatprep.subr.mxu0 %v11417_v43 }
 0xc87   : > { %10120 = vmatmul.mubr.msk.f32.vlgmr.msra.gmra.mrb[14].mxu1 %vm1192_vm5, %v11756_v22  ;;  %v9310_v22 = vld [vmem:[%s11479_s8 + $0x28] sm:$0xff] }
 0xc88   : > { %10123 = vmatpush3.msra.mxu1 %v4002_v16  ;;  %10100 = vmatmul.mubr.msk.f32.vlgmr.msra.gmra.mrb[10].mxu0 %vm1192_vm5, %v11759_v23  ;;  %v10648_v11 = vpack.c.bf16 %v9310_v22, %v9309_v19 }
 0xc89   : > { %10103 = vmatpush3.msra.mxu0 %v3693_v18  ;;  %10124 = vmatprep.mubr.msk.f32.mxu1 %vm11418_vm4, %v11417_v43 }
 0xc8a   : > { %10104 = vmatprep.mubr.msk.f32.mxu0 %vm11418_vm4, %v11417_v43  ;;  %10649 = vmatprep.subr.bf16.mxu0 %v10648_v11 }
 0xc8b   : > { %10657 = vmatprep.subr.bf16.mxu1 %v10656_v0 }
 0xc8f   : > { %10125 = vmatmul.mubr.msk.f32.vlgmr.msra.gmra.mrb[14].mxu1 %vm1192_vm5, %v11770_v26 }
 0xc90   : > { %10105 = vmatmul.mubr.msk.f32.vlgmr.msra.gmra.mrb[10].mxu0 %vm1192_vm5, %v11773_v27  ;;  %10659 = vmatpush3.bf16.msra.mxu1 %v10656_v0 }
 0xc91   : > { %10651 = vmatpush3.bf16.msra.mxu0 %v10648_v11  ;;  %10661 = vmatprep.subr.bf16.mxu1 %v10660_v2 }
 0xc92   : > { %10653 = vmatprep.subr.bf16.mxu0 %v10652_v13 }
 0xc94   : > { %10663 = vmatpush3.bf16.msra.mxu1 %v10660_v2  ;;  %v9344_v2 = vld [vmem:[%s12838_s28] ss:$0 sm:$0xff] }
 0xc95   : > { %10655 = vmatpush3.bf16.msra.mxu0 %v10652_v13  ;;  %10169 = vmatprep.subr.mxu1 %v11417_v43  ;;  %v5036_v13 = vld [vmem:[%s11504_s6] sm:$0xff] }
 0xc96   : > { %10149 = vmatprep.subr.mxu0 %v11417_v43 }
 0xd62   : > { %v4073_v23 = vpop.f32.mrb[14].mxu1 }
 0xd63   : > { %4078 = vst.msk [vmem:[#allocation4 + $0x8] sm:$0xff] %vm1072_vm2, %v4073_v23  ;;  %v3764_v15 = vpop.f32.mrb[10].mxu0  ;;  %v10126_v26 = vpop.f32.mrb[15].mxu1 }
 0xd64   : > { %3769 = vst.msk [vmem:[#allocation4] sm:$0xff] %vm1072_vm2, %v3764_v15  ;;  %v10106_v27 = vpop.f32.mrb[11].mxu0  ;;  %v4930_v15 = vld [vmem:[%s11494_s24 + $0x10] sm:$0xff]  ;;  %v4931_v26 = vld [vmem:[%s11494_s24 + $0x18] sm:$0xff] }
 0xd6a   : > { %v4080_v17 = vld [vmem:[#allocation4 + $0x8] sm:$0xff] }
 0xd6b   : > { %v4079_v20 = vld [vmem:[#allocation4] sm:$0xff]  ;;  %v4082_v21 = vadd.f32 %v4080_v17, %v11806_v35  ;;  %v10668_v17 = vpack.c.bf16 %v4931_v26, %v4930_v15 }
 0xd6c   : > { %v4081_v24 = vadd.f32 %v4079_v20, %v11802_v33  ;;  %v5038_v20 = vld [vmem:[%s11504_s6 + $0x10] sm:$0xff] }
 0xd6d   : > { %v4086_v25 = vmul.f32 0.01, %v4082_v21  ;;  %vm4084_vm15 = vcmp.ge.f32.partialorder %v4082_v21, 0.0 }
 0xd6e   : > { %vm4083_vm14 = vcmp.ge.f32.partialorder %v4081_v24, 0.0  ;;  %v4085_v28 = vmul.f32 0.01, %v4081_v24 }
 0xd6f   : > { %v4088_v30 = vsel %vm4084_vm15, %v4082_v21, %v4086_v25  ;;  %v5039_v21 = vld [vmem:[%s11504_s6 + $0x18] sm:$0xff]  ;;  %vm9098_vm15 = vcmask 122880  }
 0xd70   : > { %v4087_v29 = vsel %vm4083_vm14, %v4081_v24, %v4085_v28  ;;  %v10676_v24 = vpack.c.bf16 %v5039_v21, %v5038_v20  ;;  %v12060_v21 = vld [vmem:[%s12048_s27 + $0x10] sm:$0xff]  ;;  %vm10938_vm14 = vmpackc.low %vm1072_vm2, %vm1072_vm2 }
 0xd71   : > { %10135 = vmatprep.mubr.msk.f32.mxu0 %vm1072_vm2, %v4087_v29 }
 0xd72   : > { %10136 = vmatmul.mubr.msk.f32.vlgmr.msra.gmra.mrb[12].mxu0 %vm1072_vm2, %v4088_v30 }
 0xd73   : > { %10151 = vmatprep.mubr.msk.f32.mxu0 %vm11418_vm4, %v11417_v43 }
 0xe45   : > { %v10137_v32 = vpop.f32.mrb[12].mxu0 }
 0xe46   : > { %v4180_v34 = vadd.f32 %v10137_v32, %v9314_v31  ;;  %v4174_v36 = vpop.f32.mrb[13].mxu0  ;;  %v5134_v32 = vld [vmem:[%s11514_s20 + $0x10] sm:$0xff] }
 0xe47   : > { %v4175_v35 = vadd.f32 %v9314_v31, %v4174_v36 }
 0xe48   : > { %v4186_v37 = vmul.f32 0.01, %v4180_v34  ;;  %vm4184_vm1 = vcmp.ge.f32.partialorder %v4180_v34, 0.0 }
 0xe49   : > { %v4185_v33 = vmul.f32 0.01, %v4175_v35  ;;  %vm4183_vm3 = vcmp.ge.f32.partialorder %v4175_v35, 0.0 }
 0xe4a   : > { %v4188_v38 = vsel %vm4184_vm1, %v4180_v34, %v4186_v37  ;;  %v5135_v34 = vld [vmem:[%s11514_s20 + $0x18] sm:$0xff] }
 0xe4b   : > { %v4192_v39 = vsel %vm1072_vm2, %v4188_v38, 0.0  ;;  %4919 = vst.msk [vmem:[#allocation2 + $0x18] sm:$0xff] %vm1072_vm2, %v4188_v38  ;;  %v4187_v41 = vsel %vm4183_vm3, %v4175_v35, %v4185_v33  ;;  %v10684_v37 = vpack.c.bf16 %v5135_v34, %v5134_v32 }
 0xe4c   : > { %4193 = vadd.xlane.f32.xlu1 %v4192_v39  ;;  %v4189_v44 = vsel %vm1072_vm2, %v4187_v41, 0.0  ;;  %4918 = vst.msk [vmem:[#allocation2 + $0x10] sm:$0xff] %vm1072_vm2, %v4187_v41  ;;  %v9339_v39 = vld [vmem:[%s11509_s12] ss:$0 sm:$0xff] }
 0xe4d   : > { %4190 = vadd.xlane.f32.xlu0 %v4189_v44 }
 0xe53   : > { %v4922_v33 = vld [vmem:[#allocation2 + $0x10] sm:$0xff] }
 0xed9   : > { %v4194_v45 = vpop.xlane.xlu1 %4193 }
 0xeda   : > { %v4196_v47 = vmul.f32 0.03125, %v4194_v45  ;;  %v4191_v49 = vpop.xlane.xlu0 %4190 }
 0xedb   : > { %v4195_v50 = vmul.f32 0.03125, %v4191_v49 }
 0xedc   : > { %v4198_v52 = vsub.f32 %v4188_v38, %v4196_v47  ;;  %v4923_v38 = vld [vmem:[#allocation2 + $0x18] sm:$0xff] }
 0xedd   : > { %v4197_v56 = vsub.f32 %v4187_v41, %v4195_v50  ;;  %v9334_v41 = vld [vmem:[%s12837_s1] ss:$0 sm:$0xff] }
 0xede   : > { %v4200_v42 = vmul.f32 %v4198_v52, %v4198_v52 }
 0xedf   : > { %v4199_v57 = vmul.f32 %v4197_v56, %v4197_v56 }
 0xee0   : > { %v4204_v61 = vsel %vm1072_vm2, %v4200_v42, 0.0 }
 0xee1   : > { %v4201_v60 = vsel %vm1072_vm2, %v4199_v57, 0.0 }
 0xee2   : > { %4202 = vadd.xlane.f32.xlu0 %v4201_v60 }
 0xee6   : > { %4205 = vadd.xlane.f32.xlu0 %v4204_v61 }
 0xf6f   : > { %v4203_v3 = vpop.xlane.xlu0 %4202 }
 0xf70   : > { %v4207_v4 = vmul.f32 0.03125, %v4203_v3 }
 0xf72   : > { %v4209_v5 = vadd.f32 1e-05, %v4207_v4 }
 0xf73   : > { %v4206_v6 = vpop.xlane.xlu0 %4205 }
 0xf74   : > { %11180 = vrsqrt.f32 %v4209_v5  ;;  %v4208_v7 = vmul.f32 0.03125, %v4206_v6 }
 0xf76   : > { %v4210_v8 = vadd.f32 1e-05, %v4208_v7 }
 0xf78   : > { %11182 = vrsqrt.f32 %v4210_v8 }
 0xf7e   : > { %v11181_v14 = vpop.eup %11180 }
 0xf7f   : > { %v4213_v9 = vmul.f32 %v11181_v14, %v4197_v56 }
 0xf81   : > { %10146 = vmatprep.mubr.msk.f32.mxu1 %vm1072_vm2, %v4213_v9 }
 0xf82   : > { %v11183_v16 = vpop.eup %11182 }
 0xf83   : > { %v4214_v18 = vmul.f32 %v11183_v16, %v4198_v52 }
 0xf85   : > { %10147 = vmatmul.mubr.msk.f32.vlgmr.msra.gmra.mrb[16].mxu1 %vm1072_vm2, %v4214_v18 }
 0xf86   : > { %10171 = vmatprep.mubr.msk.f32.mxu1 %vm11418_vm4, %v11417_v43 }
0x1058   : > { %v10148_v19 = vpop.f32.mrb[16].mxu1 }
0x1059   : > { %4612 = vrot.lane.b32.xlu1 %v10148_v19, %s11419_s15  ;;  %v4291_v22 = vpop.f32.mrb[17].mxu1 }
0x105a   : > { %4303 = vrot.lane.b32.xlu0 %v4291_v22, %s11419_s15  ;;  %s12817_s15 = smov 112  }
0x105d   : > { %4453 = vrot.lane.b32.xlu1 %v4291_v22, %s11420_s16 }
0x105e   : > { %4531 = vrot.lane.b32.xlu0 %v4291_v22, %s11421_s18 }
0x1061   : > { %4762 = vrot.lane.b32.xlu1 %v10148_v19, %s11420_s16  ;;  %s12815_s16 = smov 104  }
0x1065   : > { %4840 = vrot.lane.b32.xlu1 %v10148_v19, %s11421_s18  ;;  %s12813_s18 = smov 8  }
0x10cb   : > { %v4613_v10 = vpop.permute.xlu1 %4612 }
0x10cc   : > { %10170 = vmatpush3.msra.mxu1 %v4613_v10  ;;  %v4304_v11 = vpop.permute.xlu0 %4303 }
0x10cd   : > { %10150 = vmatpush3.msra.mxu0 %v4304_v11  ;;  %10172 = vmatmul.mubr.msk.f32.vlgmr.msra.gmra.mrb[18].mxu1 %vm1192_vm5, %v11639_v46 }
0x10ce   : > { %10174 = vmatprep.subr.mxu1 %v11417_v43  ;;  %10152 = vmatmul.mubr.msk.f32.vlgmr.msra.gmra.mrb[14].mxu0 %vm1192_vm5, %v11642_v48 }
0x10cf   : > { %10154 = vmatprep.subr.mxu0 %v11417_v43  ;;  %10175 = vmatpush3.msra.mxu1 %v10148_v19  ;;  %v4454_v12 = vpop.permute.xlu1 %4453 }
0x10d0   : > { %10155 = vmatpush3.msra.mxu0 %v4291_v22  ;;  %10176 = vmatprep.mubr.msk.f32.mxu1 %vm11418_vm4, %v11417_v43 }
0x10d1   : > { %10179 = vmatprep.subr.mxu1 %v11417_v43  ;;  %10156 = vmatprep.mubr.msk.f32.mxu0 %vm11418_vm4, %v11417_v43 }
0x10d2   : > { %10159 = vmatprep.subr.mxu0 %v11417_v43 }
0x10d3   : > { %v4763_v46 = vpop.permute.xlu1 %4762 }
0x10d5   : > { %10177 = vmatmul.mubr.msk.f32.vlgmr.msra.gmra.mrb[18].mxu1 %vm1192_vm5, %v11657_v51  ;;  %v4532_v51 = vpop.permute.xlu0 %4531 }
0x10d6   : > { %10180 = vmatpush3.msra.mxu1 %v4763_v46  ;;  %10157 = vmatmul.mubr.msk.f32.vlgmr.msra.gmra.mrb[14].mxu0 %vm1192_vm5, %v11660_v53  ;;  %v4928_v53 = vld [vmem:[%s11494_s24] sm:$0xff] }
0x10d7   : > { %10160 = vmatpush3.msra.mxu0 %v4454_v12  ;;  %10181 = vmatprep.mubr.msk.f32.mxu1 %vm11418_vm4, %v11417_v43  ;;  %v4841_v48 = vpop.permute.xlu1 %4840 }
0x10d8   : > { %10184 = vmatprep.subr.mxu1 %v11417_v43  ;;  %10161 = vmatprep.mubr.msk.f32.mxu0 %vm11418_vm4, %v11417_v43 }
0x10d9   : > { %10164 = vmatprep.subr.mxu0 %v11417_v43 }
0x10dd   : > { %10182 = vmatmul.mubr.msk.f32.vlgmr.msra.gmra.mrb[18].mxu1 %vm1192_vm5, %v11673_v54  ;;  %v4929_v54 = vld [vmem:[%s11494_s24 + $0x8] sm:$0xff] }
0x10de   : > { %10185 = vmatpush3.msra.mxu1 %v4841_v48  ;;  %10162 = vmatmul.mubr.msk.f32.vlgmr.msra.gmra.mrb[14].mxu0 %vm1192_vm5, %v11676_v55  ;;  %v10664_v23 = vpack.c.bf16 %v4929_v54, %v4928_v53  ;;  %v5037_v55 = vld [vmem:[%s11504_s6 + $0x8] sm:$0xff] }
0x10df   : > { %10165 = vmatpush3.msra.mxu0 %v4532_v51  ;;  %10186 = vmatprep.mubr.msk.f32.mxu1 %vm11418_vm4, %v11417_v43  ;;  %v10672_v27 = vpack.c.bf16 %v5037_v55, %v5036_v13  ;;  %v12051_v53 = vld [vmem:[%s12048_s27 + $0x8] sm:$0xff] }
0x10e0   : > { %10166 = vmatprep.mubr.msk.f32.mxu0 %vm11418_vm4, %v11417_v43  ;;  %10665 = vmatprep.subr.bf16.mxu0 %v10664_v23 }
0x10e1   : > { %10673 = vmatprep.subr.bf16.mxu1 %v10672_v27 }
0x10e5   : > { %10187 = vmatmul.mubr.msk.f32.vlgmr.msra.gmra.mrb[18].mxu1 %vm1192_vm5, %v11688_v58  ;;  %v5132_v58 = vld [vmem:[%s11514_s20] sm:$0xff] }
0x10e6   : > { %10167 = vmatmul.mubr.msk.f32.vlgmr.msra.gmra.mrb[14].mxu0 %vm1192_vm5, %v11691_v59  ;;  %10675 = vmatpush3.bf16.msra.mxu1 %v10672_v27  ;;  %v5133_v59 = vld [vmem:[%s11514_s20 + $0x8] sm:$0xff] }
0x10e7   : > { %10667 = vmatpush3.bf16.msra.mxu0 %v10664_v23  ;;  %10677 = vmatprep.subr.bf16.mxu1 %v10676_v24  ;;  %v10680_v25 = vpack.c.bf16 %v5133_v59, %v5132_v58  ;;  %v12054_v23 = vld [vmem:[%s12048_s27] sm:$0xff] }
0x10e8   : > { %10669 = vmatprep.subr.bf16.mxu0 %v10668_v17 }
0x10ea   : > { %10679 = vmatpush3.bf16.msra.mxu1 %v10676_v24 }
0x10eb   : > { %10671 = vmatpush3.bf16.msra.mxu0 %v10668_v17 }
0x10ec   : > { %10681 = vmatprep.subr.bf16.mxu0 %v10680_v25 }
0x11b8   : > { %v4912_v28 = vpop.f32.mrb[18].mxu1 }
0x11b9   : > { %4917 = vst.msk [vmem:[#allocation2 + $0x8] sm:$0xff] %vm1072_vm2, %v4912_v28  ;;  %v4603_v29 = vpop.f32.mrb[14].mxu0  ;;  %v10188_v30 = vpop.f32.mrb[19].mxu1 }
0x11ba   : > { %4608 = vst.msk [vmem:[#allocation2] sm:$0xff] %vm1072_vm2, %v4603_v29  ;;  %v10168_v31 = vpop.f32.mrb[15].mxu0 }
0x11c0   : > { %v4921_v35 = vld [vmem:[#allocation2 + $0x8] sm:$0xff] }
0x11c1   : > { %v4920_v36 = vld [vmem:[#allocation2] sm:$0xff] }
0x11c2   : > { %10197 = vmatprep.mubr.msk.f32.mxu0 %vm1072_vm2, %v4920_v36  ;;  %10211 = vmatprep.mubr.msk.f32.mxu1 %vm1072_vm2, %v4920_v36 }
0x11c3   : > { %10198 = vmatmul.mubr.msk.f32.vlgmr.msra.gmra.mrb[16].mxu0 %vm1072_vm2, %v4921_v35  ;;  %10212 = vmatmul.mubr.msk.f32.vlgmr.msra.gmra.mrb[20].mxu1 %vm1072_vm2, %v4921_v35 }
0x11c4   : > { %10200 = vmatprep.mubr.msk.f32.mxu0 %vm1072_vm2, %v4922_v33  ;;  %10214 = vmatprep.mubr.msk.f32.mxu1 %vm1072_vm2, %v4922_v33 }
0x11c5   : > { %10683 = vmatpush3.bf16.msra.mxu0 %v10680_v25  ;;  %v12064_v25 = vld [vmem:[%s12048_s27 + $0x18] sm:$0xff] }
0x11c6   : > { %10685 = vmatprep.subr.bf16.mxu0 %v10684_v37 }
0x11c7   : > { %10201 = vmatmul.mubr.msk.f32.gmra.mrb[18].mxu0 %vm1072_vm2, %v4923_v38  ;;  %10215 = vmatmul.mubr.msk.f32.gmra.mrb[22].mxu1 %vm1072_vm2, %v4923_v38 }
0x11c8   : > { %10225 = vmatprep.mubr.msk.f32.mxu0 %vm1072_vm2, %v4920_v36 }
0x11c9   : > { %10687 = vmatpush3.bf16.msra.mxu0 %v10684_v37 }
0x11cc   : > { %10226 = vmatmul.mubr.msk.f32.vlgmr.msra.gmra.mrb[20].mxu0 %vm1072_vm2, %v4921_v35 }
0x11cd   : > { %10228 = vmatprep.mubr.msk.f32.mxu0 %vm1072_vm2, %v4922_v33 }
0x11d0   : > { %10229 = vmatmul.mubr.msk.f32.gmra.mrb[22].mxu0 %vm1072_vm2, %v4923_v38 }
0x1296   : > { %v10199_v44 = vpop.f32.mrb[16].mxu0  ;;  %v10213_v45 = vpop.f32.mrb[20].mxu1 }
0x1297   : > { %v5119_v47 = vadd.f32 %v10213_v45, %v9339_v39  ;;  %v5017_v49 = vpop.f32.mrb[17].mxu0  ;;  %v5113_v50 = vpop.f32.mrb[21].mxu1  ;;  %v12030_v12 = vadd.f32 %v10199_v44, %v9334_v41 }
0x1298   : > { %v12003_v52 = vadd.f32 %v9334_v41, %v5017_v49  ;;  %v5114_v56 = vadd.f32 %v9339_v39, %v5113_v50 }
0x129a   : > { %v10202_v60 = vpop.f32.mrb[18].mxu0  ;;  %v10216_v42 = vpop.f32.mrb[22].mxu1  ;;  %10239 = vmatprep.mubr.msk.f32.mxu1 %vm1192_vm5, %v12003_v52  ;;  %v10688_v61 = vpack.c.bf16 %v5119_v47, %v5114_v56  ;;  %v12013_v40 = vpack.i.bf16 %v5119_v47, %v5114_v56 }
0x129b   : > { %v5129_v62 = vadd.f32 %v10216_v42, %v9339_v39  ;;  %v5027_v63 = vpop.f32.mrb[19].mxu0  ;;  %v5123_v0 = vpop.f32.mrb[23].mxu1  ;;  %v12038_v48 = vadd.f32 %v10202_v60, %v9334_v41 }
0x129c   : > { %v5124_v1 = vadd.f32 %v9339_v39, %v5123_v0  ;;  %10690 = vmatprep.subr.msk.bf16.mxu1 %vm12007_vm6, %v10688_v61  ;;  %v12032_v46 = vadd.f32 %v9334_v41, %v5027_v63 }
0x129d   : > { %10693 = vmatpush3.bf16.xpose.msk.msra.mxu1 %vm12007_vm6, %v10688_v61 }
0x129e   : > { %v10694_v3 = vpack.c.bf16 %v5129_v62, %v5124_v1  ;;  %v12020_v4 = vpack.i.bf16 %v5129_v62, %v5124_v1 }
0x129f   : > { %v10227_v5 = vpop.f32.mrb[20].mxu0 }
0x12a0   : > { %v5215_v6 = vadd.f32 %v10227_v5, %v9344_v2  ;;  %v5209_v7 = vpop.f32.mrb[21].mxu0  ;;  %10696 = vmatprep.subr.msk.bf16.mxu1 %vm12007_vm6, %v10694_v3 }
0x12a1   : > { %v5210_v8 = vadd.f32 %v9344_v2, %v5209_v7 }
0x12a3   : > { %v10230_v14 = vpop.f32.mrb[22].mxu0  ;;  %v10700_v9 = vpack.c.bf16 %v5215_v6, %v5210_v8  ;;  %v12024_v16 = vpack.i.bf16 %v5215_v6, %v5210_v8 }
0x12a4   : > { %v5225_v18 = vadd.f32 %v10230_v14, %v9344_v2  ;;  %v5219_v19 = vpop.f32.mrb[23].mxu0 }
0x12a5   : > { %v5220_v22 = vadd.f32 %v9344_v2, %v5219_v19  ;;  %10701 = vmatprep.subr.bf16.mxu0 %v10700_v9  ;;  %10699 = vmatpush3.bf16.xpose.msk.msra.mxu1 %vm12007_vm6, %v10694_v3 }
0x12a6   : > { %10703 = vmatpush3.bf16.msra.mxu0 %v10700_v9 }
0x12a7   : > { %v10704_v10 = vpack.c.bf16 %v5225_v18, %v5220_v22  ;;  %v12028_v11 = vpack.i.bf16 %v5225_v18, %v5220_v22 }
0x12a9   : > { %10705 = vmatprep.subr.bf16.mxu0 %v10704_v10 }
0x12aa   : > { %10707 = vmatpush3.bf16.msra.mxu0 %v10704_v10 }
0x12ac   : > { %10240 = vmatmul.mubr.msk.f32.vlgmr.msra.gmra.mrb[24].mxu1 %vm1192_vm5, %v12030_v12 }
0x12ad   : > { %10242 = vmatprep.mubr.msk.f32.mxu1 %vm1192_vm5, %v12032_v46 }
0x12b0   : > { %10243 = vmatmul.mubr.msk.f32.gmra.mrb[26].mxu1 %vm1192_vm5, %v12038_v48 }
0x137f   : > { %v10241_v51 = vpop.f32.mrb[24].mxu1 }
0x1380   : > { %v5338_v54 = vmul.f32 0.35355338, %v10241_v51  ;;  %v5318_v13 = vpop.f32.mrb[25].mxu1 }
0x1381   : > { %v5337_v55 = vmul.f32 0.35355338, %v5318_v13 }
0x1382   : > { %v5342_v15 = vadd.f32 %v5338_v54, %v12051_v53 }
0x1383   : > { %v10244_v26 = vpop.f32.mrb[26].mxu1  ;;  %v5341_v27 = vadd.f32 %v5337_v55, %v12054_v23 }
0x1384   : > { %v5328_v17 = vpop.f32.mrb[27].mxu1  ;;  %v5348_v20 = vsel %vm1072_vm2, %v5342_v15, -inf  ;;  %v5340_v24 = vmul.f32 0.35355338, %v10244_v26 }
0x1385   : > { %v5339_v58 = vmul.f32 0.35355338, %v5328_v17  ;;  %5349 = vmax.xlane.f32.xlu1 %v5348_v20  ;;  %v5345_v59 = vsel %vm1072_vm2, %v5341_v27, -inf }
0x1386   : > { %5346 = vmax.xlane.f32.xlu0 %v5345_v59  ;;  %v5344_v30 = vadd.f32 %v5340_v24, %v12064_v25 }
0x1387   : > { %v5343_v28 = vadd.f32 %v5339_v58, %v12060_v21 }
0x1388   : > { %v5354_v31 = vsel %vm1072_vm2, %v5344_v30, -inf }
0x1389   : > { %v5351_v29 = vsel %vm1072_vm2, %v5343_v28, -inf }
0x138a   : > { %5352 = vmax.xlane.f32.xlu0 %v5351_v29 }
0x138e   : > { %5355 = vmax.xlane.f32.xlu0 %v5354_v31 }
0x1412   : > { %v5350_v32 = vpop.xlane.xlu1 %5349 }
0x1413   : > { %v5358_v34 = vsub.f32 %v5342_v15, %v5350_v32  ;;  %v5347_v36 = vpop.xlane.xlu0 %5346 }
0x1414   : > { %v5357_v35 = vsub.f32 %v5341_v27, %v5347_v36 }
0x1415   : > { %v5363_v37 = vmul.f32 1.442695, %v5358_v34 }
0x1416   : > { %v5361_v33 = vmul.f32 1.442695, %v5357_v35 }
0x1417   : > { %11184 = vpow2.f32 %v5363_v37  ;;  %v5353_v38 = vpop.xlane.xlu0 %5352 }
0x1418   : > { %11186 = vpow2.f32 %v5361_v33  ;;  %v5359_v39 = vsub.f32 %v5343_v28, %v5353_v38 }
0x141a   : > { %v5365_v41 = vmul.f32 1.442695, %v5359_v39 }
0x141b   : > { %v5356_v44 = vpop.xlane.xlu0 %5355 }
0x141c   : > { %11188 = vpow2.f32 %v5365_v41  ;;  %v5360_v45 = vsub.f32 %v5344_v30, %v5356_v44 }
0x141e   : > { %v5367_v47 = vmul.f32 1.442695, %v5360_v45 }
0x1420   : > { %11190 = vpow2.f32 %v5367_v47 }
0x1421   : > { %v11185_v49 = vpop.eup %11184 }
0x1422   : > { %v11187_v50 = vpop.eup %11186  ;;  %v5372_v56 = vsel %vm1072_vm2, %v11185_v49, 0.0 }
0x1423   : > { %5373 = vadd.xlane.f32.xlu1 %v5372_v56  ;;  %v5369_v60 = vsel %vm1072_vm2, %v11187_v50, 0.0 }
0x1424   : > { %5370 = vadd.xlane.f32.xlu0 %v5369_v60 }
0x1426   : > { %v11189_v42 = vpop.eup %11188 }
0x1427   : > { %v5375_v61 = vsel %vm1072_vm2, %v11189_v42, 0.0 }
0x1428   : > { %5376 = vadd.xlane.f32.xlu0 %v5375_v61 }
0x142a   : > { %v11191_v62 = vpop.eup %11190 }
0x142b   : > { %v5378_v63 = vsel %vm1072_vm2, %v11191_v62, 0.0 }
0x142c   : > { %5379 = vadd.xlane.f32.xlu1 %v5378_v63 }
0x143d   : > { %11057 = vrot.lane.b32.xlu1 %v12020_v4, %s12819_s11 }
0x143e   : > { %11052 = vrot.lane.b32.xlu0 %v12013_v40, %s12819_s11 }
0x1441   : > { %5486 = vrot.lane.b32.xlu1 %v12003_v52, %s12819_s11 }
0x1442   : > { %5490 = vrot.lane.b32.xlu0 %v12032_v46, %s12819_s11 }
0x1445   : > { %5488 = vrot.lane.b32.xlu1 %v12030_v12, %s12819_s11 }
0x1449   : > { %5492 = vrot.lane.b32.xlu1 %v12038_v48, %s12819_s11 }
0x14b0   : > { %v5374_v0 = vpop.xlane.xlu1 %5373 }
0x14b1   : > { %11192 = vrcp.f32 %v5374_v0  ;;  %v5371_v1 = vpop.xlane.xlu0 %5370 }
0x14b2   : > { %11194 = vrcp.f32 %v5371_v1 }
0x14b5   : > { %v5377_v2 = vpop.xlane.xlu0 %5376 }
0x14b6   : > { %11196 = vrcp.f32 %v5377_v2 }
0x14b9   : > { %v5380_v3 = vpop.xlane.xlu1 %5379  ;;  %v11053_v5 = vpop.permute.xlu0 %11052 }
0x14ba   : > { %11198 = vrcp.f32 %v5380_v3  ;;  %v11055_v6 = vunpack.i.h.bf16 %v11053_v5  ;;  %v11054_v7 = vunpack.i.l.bf16 %v11053_v5 }
0x14bb   : > { %v11193_v8 = vpop.eup %11192 }
0x14bc   : > { %v11195_v14 = vpop.eup %11194  ;;  %v10708_v9 = vpack.c.bf16 %v11055_v6, %v11054_v7  ;;  %v5386_v22 = vmul.f32 %v11193_v8, %v11185_v49 }
0x14bd   : > { %v11058_v18 = vpop.permute.xlu1 %11057  ;;  %v5385_v19 = vmul.f32 %v11195_v14, %v11187_v50  ;;  %v5491_v20 = vpop.permute.xlu0 %5490 }
0x14be   : > { %v11060_v10 = vunpack.i.h.bf16 %v11058_v18  ;;  %v11059_v51 = vunpack.i.l.bf16 %v11058_v18  ;;  %10710 = vmatprep.subr.msk.bf16.mxu0 %vm12007_vm6, %v10708_v9 }
0x14bf   : > { %10253 = vmatprep.mubr.msk.f32.mxu0 %vm1072_vm2, %v5385_v19 }
0x14c0   : > { %v11197_v54 = vpop.eup %11196  ;;  %v10714_v13 = vpack.c.bf16 %v11060_v10, %v11059_v51  ;;  %10254 = vmatmul.mubr.msk.f32.vlgmr.msra.gmra.mrb[24].mxu0 %vm1072_vm2, %v5386_v22 }
0x14c1   : > { %10713 = vmatpush3.bf16.xpose.msk.msra.mxu0 %vm12007_vm6, %v10708_v9  ;;  %v5387_v55 = vmul.f32 %v11197_v54, %v11189_v42  ;;  %v5487_v27 = vpop.permute.xlu1 %5486 }
0x14c2   : > { %10716 = vmatprep.subr.msk.bf16.mxu0 %vm12007_vm6, %v10714_v13 }
0x14c3   : > { %10256 = vmatprep.mubr.msk.f32.mxu0 %vm1072_vm2, %v5387_v55 }
0x14c4   : > { %v11199_v15 = vpop.eup %11198 }
0x14c5   : > { %v5388_v26 = vmul.f32 %v11199_v15, %v11191_v62  ;;  %v5489_v17 = vpop.permute.xlu1 %5488 }
0x14c7   : > { %10257 = vmatmul.mubr.msk.f32.gmra.mrb[26].mxu0 %vm1072_vm2, %v5388_v26 }
0x14c8   : > { %10267 = vmatprep.mubr.msk.f32.mxu0 %vm1192_vm5, %v5487_v27 }
0x14c9   : > { %10719 = vmatpush3.bf16.xpose.msk.msra.mxu0 %vm12007_vm6, %v10714_v13  ;;  %v5493_v24 = vpop.permute.xlu1 %5492 }
0x14d0   : > { %10268 = vmatmul.mubr.msk.f32.vlgmr.msra.gmra.mrb[28].mxu0 %vm1192_vm5, %v5489_v17 }
0x14d1   : > { %10270 = vmatprep.mubr.msk.f32.mxu0 %vm1192_vm5, %v5491_v20 }
0x14d4   : > { %10271 = vmatmul.mubr.msk.f32.gmra.mrb[30].mxu0 %vm1192_vm5, %v5493_v24 }
0x1593   : > { %v12102_v58 = vpop.f32.mrb[24].mxu0 }
0x1594   : > { %v12104_v59 = vpop.f32.mrb[25].mxu0 }
0x159a   : > { %v12106_v28 = vpop.f32.mrb[26].mxu0 }
0x159b   : > { %v12108_v29 = vpop.f32.mrb[27].mxu0 }
0x15a3   : > { %v10269_v30 = vpop.f32.mrb[28].mxu0 }
0x15a4   : > { %v5604_v31 = vmul.f32 0.35355338, %v10269_v30  ;;  %v5584_v32 = vpop.f32.mrb[29].mxu0 }
0x15a5   : > { %v5603_v34 = vmul.f32 0.35355338, %v5584_v32 }
0x15a6   : > { %v5608_v36 = vadd.f32 %v5604_v31, %v12051_v53 }
0x15a7   : > { %v10272_v35 = vpop.f32.mrb[30].mxu0  ;;  %v5607_v37 = vadd.f32 %v5603_v34, %v12054_v23 }
0x15a8   : > { %v5594_v33 = vpop.f32.mrb[31].mxu0  ;;  %v5614_v38 = vsel %vm1072_vm2, %v5608_v36, -inf  ;;  %v5606_v39 = vmul.f32 0.35355338, %v10272_v35 }
0x15a9   : > { %v5605_v41 = vmul.f32 0.35355338, %v5594_v33  ;;  %5615 = vmax.xlane.f32.xlu1 %v5614_v38  ;;  %v5611_v44 = vsel %vm1072_vm2, %v5607_v37, -inf }
0x15aa   : > { %5612 = vmax.xlane.f32.xlu0 %v5611_v44  ;;  %v5610_v49 = vadd.f32 %v5606_v39, %v12064_v25 }
0x15ab   : > { %v5609_v45 = vadd.f32 %v5605_v41, %v12060_v21 }
0x15ac   : > { %v5620_v50 = vsel %vm1072_vm2, %v5610_v49, -inf }
0x15ad   : > { %v5617_v47 = vsel %vm1072_vm2, %v5609_v45, -inf }
0x15ae   : > { %5618 = vmax.xlane.f32.xlu0 %v5617_v47 }
0x15b2   : > { %5621 = vmax.xlane.f32.xlu0 %v5620_v50 }
0x1636   : > { %v5616_v56 = vpop.xlane.xlu1 %5615 }
0x1637   : > { %v5624_v60 = vsub.f32 %v5608_v36, %v5616_v56  ;;  %v5613_v42 = vpop.xlane.xlu0 %5612 }
0x1638   : > { %v5623_v61 = vsub.f32 %v5607_v37, %v5613_v42 }
0x1639   : > { %v5629_v62 = vmul.f32 1.442695, %v5624_v60 }
0x163a   : > { %v5627_v63 = vmul.f32 1.442695, %v5623_v61 }
0x163b   : > { %11200 = vpow2.f32 %v5629_v62  ;;  %v5619_v5 = vpop.xlane.xlu0 %5618 }
0x163c   : > { %11202 = vpow2.f32 %v5627_v63  ;;  %v5625_v6 = vsub.f32 %v5609_v45, %v5619_v5 }
0x163e   : > { %v5631_v7 = vmul.f32 1.442695, %v5625_v6 }
0x163f   : > { %v5622_v8 = vpop.xlane.xlu0 %5621 }
0x1640   : > { %v5626_v14 = vsub.f32 %v5610_v49, %v5622_v8  ;;  %11204 = vpow2.f32 %v5631_v7 }
0x1642   : > { %v5633_v9 = vmul.f32 1.442695, %v5626_v14 }
0x1644   : > { %11206 = vpow2.f32 %v5633_v9 }
0x1645   : > { %v11201_v0 = vpop.eup %11200 }
0x1646   : > { %v11203_v1 = vpop.eup %11202  ;;  %v5638_v2 = vsel %vm1072_vm2, %v11201_v0, 0.0 }
0x1647   : > { %5639 = vadd.xlane.f32.xlu1 %v5638_v2  ;;  %v5635_v3 = vsel %vm1072_vm2, %v11203_v1, 0.0 }
0x1648   : > { %5636 = vadd.xlane.f32.xlu0 %v5635_v3 }
0x164a   : > { %v11205_v18 = vpop.eup %11204 }
0x164b   : > { %v5641_v19 = vsel %vm1072_vm2, %v11205_v18, 0.0 }
0x164e   : > { %v11207_v22 = vpop.eup %11206 }
0x164f   : > { %v5644_v10 = vsel %vm1072_vm2, %v11207_v22, 0.0 }
0x1658   : > { %11067 = vrot.lane.b32.xlu1 %v12028_v11, %s12819_s11 }
0x165c   : > { %11072 = vrot.lane.b32.xlu1 %v12013_v40, %s12817_s15 }
0x165e   : > { %11062 = vrot.lane.b32.xlu0 %v12024_v16, %s12819_s11  ;;  %s12850_s11 = sld [smem:[#allocation18_spill]] }
0x1660   : > { %11077 = vrot.lane.b32.xlu1 %v12020_v4, %s12817_s15 }
0x167d   : > { %5642 = vadd.xlane.f32.xlu0 %v5641_v19 }
0x1684   : > { %5645 = vadd.xlane.f32.xlu1 %v5644_v10 }
0x1693   : > { %5768 = vrot.lane.b32.xlu0 %v12003_v52, %s12817_s15 }
0x1695   : > { %5770 = vrot.lane.b32.xlu1 %v12030_v12, %s12817_s15 }
0x1697   : > { %5772 = vrot.lane.b32.xlu0 %v12032_v46, %s12817_s15 }
0x1699   : > { %5774 = vrot.lane.b32.xlu1 %v12038_v48, %s12817_s15 }
0x16d4   : > { %v5640_v51 = vpop.xlane.xlu1 %5639 }
0x16d5   : > { %v5637_v54 = vpop.xlane.xlu0 %5636 }
0x16d6   : > { %11208 = vrcp.f32 %v5637_v54 }
0x16d7   : > { %11210 = vrcp.f32 %v5640_v51 }
0x16d8   : > { %v11068_v13 = vpop.permute.xlu1 %11067 }
0x16d9   : > { %v11063_v55 = vpop.permute.xlu0 %11062  ;;  %v11070_v15 = vunpack.i.h.bf16 %v11068_v13  ;;  %v11069_v26 = vunpack.i.l.bf16 %v11068_v13 }
0x16da   : > { %v11065_v27 = vunpack.i.h.bf16 %v11063_v55  ;;  %v11064_v17 = vunpack.i.l.bf16 %v11063_v55 }
0x16db   : > { %v10724_v32 = vpack.c.bf16 %v11070_v15, %v11069_v26 }
0x16dc   : > { %v11073_v20 = vpop.permute.xlu1 %11072  ;;  %v10720_v24 = vpack.c.bf16 %v11065_v27, %v11064_v17 }
0x16dd   : > { %v11075_v30 = vunpack.i.h.bf16 %v11073_v20  ;;  %v11074_v31 = vunpack.i.l.bf16 %v11073_v20 }
0x16de   : > { %10721 = vmatprep.subr.bf16.mxu1 %v10720_v24 }
0x16df   : > { %10723 = vmatpush3.bf16.msra.mxu1 %v10720_v24  ;;  %v10728_v37 = vpack.c.bf16 %v11075_v30, %v11074_v31 }
0x16e0   : > { %v11209_v34 = vpop.eup %11208  ;;  %10725 = vmatprep.subr.bf16.mxu1 %v10724_v32  ;;  %v11078_v38 = vpop.permute.xlu1 %11077 }
0x16e1   : > { %v11211_v36 = vpop.eup %11210  ;;  %v5651_v35 = vmul.f32 %v11209_v34, %v11203_v1  ;;  %v11080_v39 = vunpack.i.h.bf16 %v11078_v38  ;;  %v11079_v41 = vunpack.i.l.bf16 %v11078_v38 }
0x16e2   : > { %v5652_v33 = vmul.f32 %v11211_v36, %v11201_v0 }
0x16e3   : > { %10727 = vmatpush3.bf16.msra.mxu1 %v10724_v32  ;;  %10281 = vmatprep.mubr.msk.f32.mxu1 %vm1072_vm2, %v5651_v35  ;;  %v10734_v44 = vpack.c.bf16 %v11080_v39, %v11079_v41 }
0x16e4   : > { %10730 = vmatprep.subr.msk.bf16.mxu1 %vm12007_vm6, %v10728_v37 }
0x16e6   : > { %10282 = vmatmul.mubr.msk.f32.vlgmr.msra.gmra.mrb[28].mxu1 %vm1072_vm2, %v5652_v33 }
0x16ec   : > { %10733 = vmatpush3.bf16.xpose.msk.msra.mxu1 %vm12007_vm6, %v10728_v37 }
0x16ed   : > { %10736 = vmatprep.subr.msk.bf16.mxu1 %vm12007_vm6, %v10734_v44 }
0x16f4   : > { %10739 = vmatpush3.bf16.xpose.msk.msra.mxu1 %vm12007_vm6, %v10734_v44 }
0x170a   : > { %v5643_v45 = vpop.xlane.xlu0 %5642 }
0x170b   : > { %11212 = vrcp.f32 %v5643_v45 }
0x170e   : > { %v5769_v60 = vpop.permute.xlu0 %5768 }
0x1711   : > { %v5646_v47 = vpop.xlane.xlu1 %5645 }
0x1712   : > { %11214 = vrcp.f32 %v5646_v47  ;;  %v5773_v62 = vpop.permute.xlu0 %5772 }
0x1715   : > { %v11213_v49 = vpop.eup %11212  ;;  %v5771_v61 = vpop.permute.xlu1 %5770 }
0x1716   : > { %v5653_v50 = vmul.f32 %v11213_v49, %v11205_v18 }
0x1718   : > { %10284 = vmatprep.mubr.msk.f32.mxu1 %vm1072_vm2, %v5653_v50 }
0x1719   : > { %v5775_v63 = vpop.permute.xlu1 %5774 }
0x171c   : > { %v11215_v56 = vpop.eup %11214 }
0x171d   : > { %v5654_v42 = vmul.f32 %v11215_v56, %v11207_v22 }
0x171f   : > { %10285 = vmatmul.mubr.msk.f32.gmra.mrb[30].mxu1 %vm1072_vm2, %v5654_v42 }
0x1720   : > { %10295 = vmatprep.mubr.msk.f32.mxu1 %vm1192_vm5, %v5769_v60 }
0x1723   : > { %10296 = vmatmul.mubr.msk.f32.vlgmr.msra.gmra.mrb[32].mxu1 %vm1192_vm5, %v5771_v61 }
0x1724   : > { %10298 = vmatprep.mubr.msk.f32.mxu1 %vm1192_vm5, %v5773_v62 }
0x1727   : > { %10299 = vmatmul.mubr.msk.f32.gmra.mrb[34].mxu1 %vm1192_vm5, %v5775_v63 }
0x17b9   : > { %v12154_v0 = vpop.f32.mrb[28].mxu1 }
0x17ba   : > { %v12156_v1 = vpop.f32.mrb[29].mxu1 }
0x17f2   : > { %v12158_v2 = vpop.f32.mrb[30].mxu1 }
0x17f3   : > { %v12160_v3 = vpop.f32.mrb[31].mxu1 }
0x17f6   : > { %v10297_v5 = vpop.f32.mrb[32].mxu1 }
0x17f7   : > { %v5886_v6 = vmul.f32 0.35355338, %v10297_v5  ;;  %v5866_v7 = vpop.f32.mrb[33].mxu1 }
0x17f8   : > { %v5885_v8 = vmul.f32 0.35355338, %v5866_v7 }
0x17f9   : > { %v5890_v14 = vadd.f32 %v5886_v6, %v12051_v53 }
0x17fa   : > { %v10300_v9 = vpop.f32.mrb[34].mxu1  ;;  %v5889_v18 = vadd.f32 %v5885_v8, %v12054_v23 }
0x17fb   : > { %v5876_v19 = vpop.f32.mrb[35].mxu1  ;;  %v5896_v22 = vsel %vm1072_vm2, %v5890_v14, -inf  ;;  %v5888_v10 = vmul.f32 0.35355338, %v10300_v9 }
0x17fc   : > { %v5887_v51 = vmul.f32 0.35355338, %v5876_v19  ;;  %5897 = vmax.xlane.f32.xlu1 %v5896_v22  ;;  %v5893_v54 = vsel %vm1072_vm2, %v5889_v18, -inf }
0x17fd   : > { %5894 = vmax.xlane.f32.xlu0 %v5893_v54  ;;  %v5892_v15 = vadd.f32 %v5888_v10, %v12064_v25 }
0x17fe   : > { %v5891_v13 = vadd.f32 %v5887_v51, %v12060_v21 }
0x17ff   : > { %v5902_v26 = vsel %vm1072_vm2, %v5892_v15, -inf }
0x1800   : > { %v5899_v55 = vsel %vm1072_vm2, %v5891_v13, -inf }
0x1801   : > { %5900 = vmax.xlane.f32.xlu0 %v5899_v55 }
0x1805   : > { %5903 = vmax.xlane.f32.xlu0 %v5902_v26 }
0x1889   : > { %v5898_v27 = vpop.xlane.xlu1 %5897 }
0x188a   : > { %v5906_v17 = vsub.f32 %v5890_v14, %v5898_v27  ;;  %v5895_v20 = vpop.xlane.xlu0 %5894 }
0x188b   : > { %v5905_v24 = vsub.f32 %v5889_v18, %v5895_v20 }
0x188c   : > { %v5911_v30 = vmul.f32 1.442695, %v5906_v17 }
0x188d   : > { %v5909_v31 = vmul.f32 1.442695, %v5905_v24 }
0x188e   : > { %11216 = vpow2.f32 %v5911_v30  ;;  %v5901_v37 = vpop.xlane.xlu0 %5900 }
0x188f   : > { %11218 = vpow2.f32 %v5909_v31  ;;  %v5907_v33 = vsub.f32 %v5891_v13, %v5901_v37 }
0x1891   : > { %v5913_v38 = vmul.f32 1.442695, %v5907_v33 }
0x1892   : > { %v5904_v39 = vpop.xlane.xlu0 %5903 }
0x1893   : > { %v5908_v41 = vsub.f32 %v5892_v15, %v5904_v39  ;;  %11220 = vpow2.f32 %v5913_v38 }
0x1895   : > { %v5915_v44 = vmul.f32 1.442695, %v5908_v41 }
0x1897   : > { %11222 = vpow2.f32 %v5915_v44 }
0x1898   : > { %v11217_v32 = vpop.eup %11216 }
0x1899   : > { %v11219_v34 = vpop.eup %11218  ;;  %v5920_v36 = vsel %vm1072_vm2, %v11217_v32, 0.0 }
0x189a   : > { %5921 = vadd.xlane.f32.xlu1 %v5920_v36  ;;  %v5917_v35 = vsel %vm1072_vm2, %v11219_v34, 0.0 }
0x189b   : > { %5918 = vadd.xlane.f32.xlu0 %v5917_v35 }
0x189d   : > { %v11221_v45 = vpop.eup %11220 }
0x189e   : > { %v5923_v47 = vsel %vm1072_vm2, %v11221_v45, 0.0 }
0x18a1   : > { %v11223_v49 = vpop.eup %11222 }
0x18ab   : > { %11087 = vrot.lane.b32.xlu1 %v12028_v11, %s12817_s15 }
0x18af   : > { %11092 = vrot.lane.b32.xlu1 %v12013_v40, %s12815_s16  ;;  %v5926_v40 = vsel %vm1072_vm2, %v11223_v49, 0.0 }
0x18b1   : > { %11082 = vrot.lane.b32.xlu0 %v12024_v16, %s12817_s15  ;;  %s12849_s15 = sld [smem:[#allocation17_spill]] }
0x18b3   : > { %11097 = vrot.lane.b32.xlu1 %v12020_v4, %s12815_s16 }
0x18d0   : > { %5924 = vadd.xlane.f32.xlu0 %v5923_v47 }
0x18d7   : > { %5927 = vadd.xlane.f32.xlu1 %v5926_v40 }
0x18e6   : > { %6046 = vrot.lane.b32.xlu0 %v12003_v52, %s12815_s16 }
0x18e8   : > { %6048 = vrot.lane.b32.xlu1 %v12030_v12, %s12815_s16 }
0x18ea   : > { %6050 = vrot.lane.b32.xlu0 %v12032_v46, %s12815_s16 }
0x18ec   : > { %6052 = vrot.lane.b32.xlu1 %v12038_v48, %s12815_s16 }
0x1927   : > { %v5922_v4 = vpop.xlane.xlu1 %5921 }
0x1928   : > { %v5919_v50 = vpop.xlane.xlu0 %5918 }
0x1929   : > { %11224 = vrcp.f32 %v5919_v50 }
0x192a   : > { %11226 = vrcp.f32 %v5922_v4 }
0x192b   : > { %v11088_v56 = vpop.permute.xlu1 %11087 }
0x192c   : > { %v11083_v60 = vpop.permute.xlu0 %11082  ;;  %v11090_v42 = vunpack.i.h.bf16 %v11088_v56  ;;  %v11089_v61 = vunpack.i.l.bf16 %v11088_v56 }
0x192d   : > { %v11085_v62 = vunpack.i.h.bf16 %v11083_v60  ;;  %v11084_v63 = vunpack.i.l.bf16 %v11083_v60 }
0x192e   : > { %v10744_v7 = vpack.c.bf16 %v11090_v42, %v11089_v61 }
0x192f   : > { %v11093_v52 = vpop.permute.xlu1 %11092  ;;  %v10740_v5 = vpack.c.bf16 %v11085_v62, %v11084_v63 }
0x1930   : > { %v11095_v6 = vunpack.i.h.bf16 %v11093_v52  ;;  %v11094_v12 = vunpack.i.l.bf16 %v11093_v52 }
0x1931   : > { %10741 = vmatprep.subr.bf16.mxu0 %v10740_v5 }
0x1932   : > { %10743 = vmatpush3.bf16.msra.mxu0 %v10740_v5  ;;  %v10748_v14 = vpack.c.bf16 %v11095_v6, %v11094_v12 }
0x1933   : > { %v11225_v46 = vpop.eup %11224  ;;  %10745 = vmatprep.subr.bf16.mxu0 %v10744_v7  ;;  %v11098_v18 = vpop.permute.xlu1 %11097 }
0x1934   : > { %v11227_v48 = vpop.eup %11226  ;;  %v5933_v8 = vmul.f32 %v11225_v46, %v11219_v34  ;;  %v11100_v19 = vunpack.i.h.bf16 %v11098_v18  ;;  %v11099_v22 = vunpack.i.l.bf16 %v11098_v18 }
0x1935   : > { %v5934_v9 = vmul.f32 %v11227_v48, %v11217_v32 }
0x1936   : > { %10747 = vmatpush3.bf16.msra.mxu0 %v10744_v7  ;;  %10309 = vmatprep.mubr.msk.f32.mxu0 %vm1072_vm2, %v5933_v8  ;;  %v10754_v10 = vpack.c.bf16 %v11100_v19, %v11099_v22 }
0x1937   : > { %10750 = vmatprep.subr.msk.bf16.mxu0 %vm12007_vm6, %v10748_v14 }
0x1939   : > { %10310 = vmatmul.mubr.msk.f32.vlgmr.msra.gmra.mrb[32].mxu0 %vm1072_vm2, %v5934_v9 }
0x193f   : > { %10753 = vmatpush3.bf16.xpose.msk.msra.mxu0 %vm12007_vm6, %v10748_v14 }
0x1940   : > { %10756 = vmatprep.subr.msk.bf16.mxu0 %vm12007_vm6, %v10754_v10 }
0x1947   : > { %10759 = vmatpush3.bf16.xpose.msk.msra.mxu0 %vm12007_vm6, %v10754_v10 }
0x195d   : > { %v5925_v51 = vpop.xlane.xlu0 %5924 }
0x195e   : > { %11228 = vrcp.f32 %v5925_v51 }
0x1961   : > { %v6047_v26 = vpop.permute.xlu0 %6046 }
0x1964   : > { %v5928_v54 = vpop.xlane.xlu1 %5927 }
0x1965   : > { %11230 = vrcp.f32 %v5928_v54  ;;  %v6051_v20 = vpop.permute.xlu0 %6050 }
0x1968   : > { %v11229_v13 = vpop.eup %11228  ;;  %v6049_v17 = vpop.permute.xlu1 %6048 }
0x1969   : > { %v5935_v55 = vmul.f32 %v11229_v13, %v11221_v45 }
0x196b   : > { %10312 = vmatprep.mubr.msk.f32.mxu0 %vm1072_vm2, %v5935_v55 }
0x196c   : > { %v6053_v24 = vpop.permute.xlu1 %6052 }
0x196f   : > { %v11231_v15 = vpop.eup %11230 }
0x1970   : > { %v5936_v27 = vmul.f32 %v11231_v15, %v11223_v49 }
0x1972   : > { %10313 = vmatmul.mubr.msk.f32.gmra.mrb[34].mxu0 %vm1072_vm2, %v5936_v27 }
0x1973   : > { %10323 = vmatprep.mubr.msk.f32.mxu0 %vm1192_vm5, %v6047_v26 }
0x1976   : > { %10324 = vmatmul.mubr.msk.f32.vlgmr.msra.gmra.mrb[36].mxu0 %vm1192_vm5, %v6049_v17 }
0x1977   : > { %10326 = vmatprep.mubr.msk.f32.mxu0 %vm1192_vm5, %v6051_v20 }
0x197a   : > { %10327 = vmatmul.mubr.msk.f32.gmra.mrb[38].mxu0 %vm1192_vm5, %v6053_v24 }
0x1a0c   : > { %v10311_v30 = vpop.f32.mrb[32].mxu0 }
0x1a0d   : > { %v6027_v31 = vpop.f32.mrb[33].mxu0 }
0x1a45   : > { %v10314_v32 = vpop.f32.mrb[34].mxu0 }
0x1a46   : > { %v6037_v34 = vpop.f32.mrb[35].mxu0 }
0x1a49   : > { %v10325_v36 = vpop.f32.mrb[36].mxu0 }
0x1a4a   : > { %v6164_v35 = vmul.f32 0.35355338, %v10325_v36  ;;  %v6144_v37 = vpop.f32.mrb[37].mxu0  ;;  %v6387_v36 = vld [vmem:[%s12842_s23 + $0x10] sm:$0xff] }
0x1a4b   : > { %v6163_v33 = vmul.f32 0.35355338, %v6144_v37  ;;  %v6388_v37 = vld [vmem:[%s12842_s23 + $0x18] sm:$0xff] }
0x1a4c   : > { %v6168_v38 = vadd.f32 %v6164_v35, %v12051_v53 }
0x1a4d   : > { %v10328_v39 = vpop.f32.mrb[38].mxu0  ;;  %v6167_v41 = vadd.f32 %v6163_v33, %v12054_v23  ;;  %v10772_v33 = vpack.c.bf16 %v6388_v37, %v6387_v36 }
0x1a4e   : > { %v6154_v44 = vpop.f32.mrb[39].mxu0  ;;  %v6174_v45 = vsel %vm1072_vm2, %v6168_v38, -inf  ;;  %v6166_v47 = vmul.f32 0.35355338, %v10328_v39 }
0x1a4f   : > { %v6165_v49 = vmul.f32 0.35355338, %v6154_v44  ;;  %6175 = vmax.xlane.f32.xlu1 %v6174_v45  ;;  %v6171_v40 = vsel %vm1072_vm2, %v6167_v41, -inf }
0x1a50   : > { %6172 = vmax.xlane.f32.xlu0 %v6171_v40  ;;  %v6170_v56 = vadd.f32 %v6166_v47, %v12064_v25 }
0x1a51   : > { %v6169_v4 = vadd.f32 %v6165_v49, %v12060_v21 }
0x1a52   : > { %v6180_v53 = vsel %vm1072_vm2, %v6170_v56, -inf }
0x1a53   : > { %v6177_v50 = vsel %vm1072_vm2, %v6169_v4, -inf }
0x1a54   : > { %6178 = vmax.xlane.f32.xlu0 %v6177_v50 }
0x1a58   : > { %6181 = vmax.xlane.f32.xlu0 %v6180_v53 }
0x1adc   : > { %v6176_v23 = vpop.xlane.xlu1 %6175 }
0x1add   : > { %v6184_v60 = vsub.f32 %v6168_v38, %v6176_v23  ;;  %v6173_v42 = vpop.xlane.xlu0 %6172 }
0x1ade   : > { %v6183_v61 = vsub.f32 %v6167_v41, %v6173_v42 }
0x1adf   : > { %v6189_v62 = vmul.f32 1.442695, %v6184_v60 }
0x1ae0   : > { %v6187_v63 = vmul.f32 1.442695, %v6183_v61 }
0x1ae1   : > { %11232 = vpow2.f32 %v6189_v62  ;;  %v6179_v52 = vpop.xlane.xlu0 %6178 }
0x1ae2   : > { %11234 = vpow2.f32 %v6187_v63  ;;  %v6185_v5 = vsub.f32 %v6169_v4, %v6179_v52 }
0x1ae4   : > { %v6191_v6 = vmul.f32 1.442695, %v6185_v5 }
0x1ae5   : > { %v6182_v21 = vpop.xlane.xlu0 %6181 }
0x1ae6   : > { %11236 = vpow2.f32 %v6191_v6  ;;  %v6186_v12 = vsub.f32 %v6170_v56, %v6182_v21 }
0x1ae8   : > { %v6193_v7 = vmul.f32 1.442695, %v6186_v12 }
0x1aea   : > { %11238 = vpow2.f32 %v6193_v7 }
0x1aeb   : > { %v11233_v25 = vpop.eup %11232 }
0x1aec   : > { %v11235_v46 = vpop.eup %11234  ;;  %v6198_v48 = vsel %vm1072_vm2, %v11233_v25, 0.0 }
0x1aed   : > { %6199 = vadd.xlane.f32.xlu1 %v6198_v48  ;;  %v6195_v8 = vsel %vm1072_vm2, %v11235_v46, 0.0 }
0x1aee   : > { %6196 = vadd.xlane.f32.xlu0 %v6195_v8 }
0x1af0   : > { %v11237_v14 = vpop.eup %11236 }
0x1af1   : > { %v6201_v9 = vsel %vm1072_vm2, %v11237_v14, 0.0 }
0x1af2   : > { %6202 = vadd.xlane.f32.xlu0 %v6201_v9 }
0x1af4   : > { %v11239_v18 = vpop.eup %11238 }
0x1af5   : > { %v6204_v19 = vsel %vm1072_vm2, %v11239_v18, 0.0 }
0x1af6   : > { %6205 = vadd.xlane.f32.xlu1 %v6204_v19 }
0x1b07   : > { %11107 = vrot.lane.b32.xlu1 %v12028_v11, %s12815_s16 }
0x1b08   : > { %11102 = vrot.lane.b32.xlu0 %v12024_v16, %s12815_s16  ;;  %s12848_s16 = sld [smem:[#allocation15_spill]] }
0x1b0b   : > { %6328 = vrot.lane.b32.xlu1 %v12156_v1, %s12813_s18 }
0x1b0c   : > { %6344 = vrot.lane.b32.xlu0 %v6027_v31, %s12811_s22 }
0x1b0f   : > { %6330 = vrot.lane.b32.xlu1 %v12154_v0, %s12813_s18 }
0x1b10   : > { %6332 = vrot.lane.b32.xlu0 %v12160_v3, %s12813_s18 }
0x1b13   : > { %6346 = vrot.lane.b32.xlu1 %v10311_v30, %s12811_s22 }
0x1b14   : > { %6348 = vrot.lane.b32.xlu0 %v6037_v34, %s12811_s22  ;;  %v6386_v34 = vld [vmem:[%s12842_s23 + $0x8] sm:$0xff] }
0x1b17   : > { %6334 = vrot.lane.b32.xlu1 %v12158_v2, %s12813_s18  ;;  %s12847_s18 = sld [smem:[#allocation16_spill]] }
0x1b1b   : > { %6350 = vrot.lane.b32.xlu1 %v10314_v32, %s12811_s22  ;;  %v6385_v32 = vld [vmem:[%s12842_s23] sm:$0xff]  ;;  %s12846_s22 = sld [smem:[#allocation13_spill]] }
0x1b1c   : > { %v10768_v35 = vpack.c.bf16 %v6386_v34, %v6385_v32 }
0x1b7a   : > { %v6200_v11 = vpop.xlane.xlu1 %6199 }
0x1b7b   : > { %v6197_v16 = vpop.xlane.xlu0 %6196 }
0x1b7c   : > { %11240 = vrcp.f32 %v6197_v16  ;;  %v11373_v16 = vld [vmem:[#allocation2] sm:$0xff] }
0x1b7d   : > { %11242 = vrcp.f32 %v6200_v11 }
0x1b7f   : > { %v6203_v1 = vpop.xlane.xlu0 %6202 }
0x1b80   : > { %11244 = vrcp.f32 %v6203_v1 }
0x1b83   : > { %v6206_v22 = vpop.xlane.xlu1 %6205  ;;  %v11103_v0 = vpop.permute.xlu0 %11102 }
0x1b84   : > { %v11105_v10 = vunpack.i.h.bf16 %v11103_v0  ;;  %v11104_v51 = vunpack.i.l.bf16 %v11103_v0  ;;  %11246 = vrcp.f32 %v6206_v22 }
0x1b86   : > { %v11241_v3 = vpop.eup %11240  ;;  %v10760_v54 = vpack.c.bf16 %v11105_v10, %v11104_v51 }
0x1b87   : > { %v11108_v13 = vpop.permute.xlu1 %11107  ;;  %v6211_v55 = vmul.f32 %v11241_v3, %v11235_v46  ;;  %v11243_v27 = vpop.eup %11242  ;;  %v11374_v3 = vld [vmem:[#allocation2 + $0x10] sm:$0xff] }
0x1b88   : > { %v11110_v15 = vunpack.i.h.bf16 %v11108_v13  ;;  %v11109_v26 = vunpack.i.l.bf16 %v11108_v13  ;;  %10761 = vmatprep.subr.bf16.mxu1 %v10760_v54  ;;  %v6212_v20 = vmul.f32 %v11243_v27, %v11233_v25  ;;  %v6345_v40 = vpop.permute.xlu0 %6344  ;;  %v11375_v13 = vld [vmem:[#allocation2 + $0x18] sm:$0xff] }
0x1b89   : > { %10763 = vmatpush3.bf16.msra.mxu1 %v10760_v54  ;;  %10337 = vmatprep.mubr.msk.f32.mxu1 %vm1072_vm2, %v6211_v55 }
0x1b8a   : > { %v10764_v2 = vpack.c.bf16 %v11110_v15, %v11109_v26  ;;  %v11245_v17 = vpop.eup %11244 }
0x1b8b   : > { %v6213_v30 = vmul.f32 %v11245_v17, %v11237_v14  ;;  %v6329_v45 = vpop.permute.xlu1 %6328 }
0x1b8c   : > { %10765 = vmatprep.subr.bf16.mxu1 %v10764_v2  ;;  %v6333_v50 = vpop.permute.xlu0 %6332  ;;  %v6372_v23 = vsel %vm1192_vm5, %v12104_v59, %v6329_v45 }
0x1b8d   : > { %10767 = vmatpush3.bf16.msra.mxu1 %v10764_v2  ;;  %v6376_v61 = vsel %vm984_vm0, %v6372_v23, %v6345_v40  ;;  %v6374_v59 = vsel %vm1192_vm5, %v12108_v29, %v6333_v50  ;;  %v9397_v29 = vld [vmem:[%s12843_s2] ss:$0 sm:$0xff] }
0x1b8e   : > { %v11247_v24 = vpop.eup %11246  ;;  %10769 = vmatprep.subr.bf16.mxu1 %v10768_v35  ;;  %v6571_v40 = vld [vmem:[%s12844_s0] sm:$0xff] }
0x1b8f   : > { %v6214_v31 = vmul.f32 %v11247_v24, %v11239_v18  ;;  %v6331_v47 = vpop.permute.xlu1 %6330  ;;  %v11372_v18 = vld [vmem:[#allocation2 + $0x8] sm:$0xff] }
0x1b90   : > { %10338 = vmatmul.mubr.msk.f32.vlgmr.msra.gmra.mrb[36].mxu1 %vm1072_vm2, %v6212_v20  ;;  %v6349_v53 = vpop.permute.xlu0 %6348  ;;  %v6373_v42 = vsel %vm1192_vm5, %v12102_v58, %v6331_v47 }
0x1b91   : > { %10340 = vmatprep.mubr.msk.f32.mxu1 %vm1072_vm2, %v6213_v30  ;;  %10771 = vmatpush3.bf16.msra.mxu1 %v10768_v35  ;;  %v6378_v58 = vsel %vm984_vm0, %v6374_v59, %v6349_v53  ;;  %v6574_v53 = vld [vmem:[%s12844_s0 + $0x18] sm:$0xff] }
0x1b92   : > { %10773 = vmatprep.subr.bf16.mxu1 %v10772_v33 }
0x1b93   : > { %v6347_v49 = vpop.permute.xlu1 %6346 }
0x1b94   : > { %10341 = vmatmul.mubr.msk.f32.gmra.mrb[38].mxu1 %vm1072_vm2, %v6214_v31  ;;  %v6377_v63 = vsel %vm984_vm0, %v6373_v42, %v6347_v49 }
0x1b95   : > { %10775 = vmatpush3.bf16.msra.mxu1 %v10772_v33 }
0x1b97   : > { %v6335_v4 = vpop.permute.xlu1 %6334 }
0x1b98   : > { %v6375_v21 = vsel %vm1192_vm5, %v12106_v28, %v6335_v4  ;;  %v6572_v4 = vld [vmem:[%s12844_s0 + $0x8] sm:$0xff] }
0x1b99   : > { %v10776_v50 = vpack.c.bf16 %v6572_v4, %v6571_v40 }
0x1b9b   : > { %v6351_v56 = vpop.permute.xlu1 %6350  ;;  %10777 = vmatprep.subr.bf16.mxu0 %v10776_v50 }
0x1b9c   : > { %v6379_v7 = vsel %vm984_vm0, %v6375_v21, %v6351_v56  ;;  %v6573_v56 = vld [vmem:[%s12844_s0 + $0x10] sm:$0xff]  ;;  %10779 = vmatpush3.bf16.msra.mxu0 %v10776_v50 }
0x1b9d   : > { %v10780_v23 = vpack.c.bf16 %v6574_v53, %v6573_v56 }
0x1b9f   : > { %10781 = vmatprep.subr.bf16.mxu0 %v10780_v23 }
0x1ba0   : > { %10783 = vmatpush3.bf16.msra.mxu0 %v10780_v23 }
0x1c63   : > { %v10339_v38 = vpop.f32.mrb[36].mxu1 }
0x1c64   : > { %6362 = vrot.lane.b32.xlu1 %v10339_v38, %s12809_s26  ;;  %v6305_v39 = vpop.f32.mrb[37].mxu1 }
0x1c65   : > { %6360 = vrot.lane.b32.xlu0 %v6305_v39, %s12809_s26 }
0x1c67   : > { %v10342_v41 = vpop.f32.mrb[38].mxu1 }
0x1c68   : > { %6366 = vrot.lane.b32.xlu1 %v10342_v41, %s12809_s26  ;;  %v6315_v44 = vpop.f32.mrb[39].mxu1 }
0x1c69   : > { %6364 = vrot.lane.b32.xlu0 %v6315_v44, %s12809_s26  ;;  %s12845_s26 = sld [smem:[#allocation12_spill]] }
0x1cd6   : > { %v6363_v60 = vpop.permute.xlu1 %6362 }
0x1cd7   : > { %v6361_v62 = vpop.permute.xlu0 %6360  ;;  %v6382_v5 = vsel %vm6380_vm7, %v6377_v63, %v6363_v60 }
0x1cd8   : > { %v6381_v52 = vsel %vm6380_vm7, %v6376_v61, %v6361_v62 }
0x1cd9   : > { %10351 = vmatprep.mubr.msk.f32.mxu1 %vm1072_vm2, %v6381_v52 }
0x1cda   : > { %10352 = vmatmul.mubr.msk.f32.vlgmr.msra.gmra.mrb[40].mxu1 %vm1072_vm2, %v6382_v5  ;;  %v6367_v6 = vpop.permute.xlu1 %6366 }
0x1cdb   : > { %v6365_v12 = vpop.permute.xlu0 %6364  ;;  %v6384_v46 = vsel %vm6380_vm7, %v6379_v7, %v6367_v6 }
0x1cdc   : > { %v6383_v25 = vsel %vm6380_vm7, %v6378_v58, %v6365_v12 }
0x1cdd   : > { %10354 = vmatprep.mubr.msk.f32.mxu1 %vm1072_vm2, %v6383_v25  ;;  %v9402_v25 = vld [vmem:[%s12845_s26] ss:$0 sm:$0xff] }
0x1cde   : > { %10355 = vmatmul.mubr.msk.f32.gmra.mrb[42].mxu1 %vm1072_vm2, %v6384_v46 }
0x1dad   : > { %v10353_v48 = vpop.f32.mrb[40].mxu1 }
0x1dae   : > { %v6480_v8 = vadd.f32 %v10353_v48, %v9397_v29  ;;  %v6474_v14 = vpop.f32.mrb[41].mxu1 }
0x1daf   : > { %v6475_v9 = vadd.f32 %v9397_v29, %v6474_v14 }
0x1db0   : > { %v6494_v19 = vadd.f32 %v11372_v18, %v6480_v8  ;;  %v9403_v8 = vld [vmem:[%s12846_s22] ss:$0 sm:$0xff] }
0x1db1   : > { %v6493_v28 = vadd.f32 %v11373_v16, %v6475_v9  ;;  %v10356_v11 = vpop.f32.mrb[42].mxu1 }
0x1db2   : > { %v6484_v1 = vpop.f32.mrb[43].mxu1  ;;  %v6502_v22 = vsel %vm1072_vm2, %v6494_v19, 0.0  ;;  %v6490_v0 = vadd.f32 %v10356_v11, %v9397_v29 }
0x1db3   : > { %v6485_v10 = vadd.f32 %v9397_v29, %v6484_v1  ;;  %6503 = vadd.xlane.f32.xlu1 %v6502_v22  ;;  %v6499_v51 = vsel %vm1072_vm2, %v6493_v28, 0.0 }
0x1db4   : > { %6500 = vadd.xlane.f32.xlu0 %v6499_v51  ;;  %v6496_v55 = vadd.f32 %v11375_v13, %v6490_v0 }
0x1db5   : > { %v6495_v54 = vadd.f32 %v11374_v3, %v6485_v10  ;;  %v6787_v3 = vld [vmem:[%s12847_s18] sm:$0xff] }
0x1db6   : > { %v6508_v26 = vsel %vm1072_vm2, %v6496_v55, 0.0 }
0x1db7   : > { %v6505_v15 = vsel %vm1072_vm2, %v6495_v54, 0.0 }
0x1db8   : > { %6506 = vadd.xlane.f32.xlu0 %v6505_v15  ;;  %v6790_v15 = vld [vmem:[%s12847_s18 + $0x18] sm:$0xff] }
0x1dbc   : > { %6509 = vadd.xlane.f32.xlu0 %v6508_v26 }
0x1e40   : > { %v6504_v2 = vpop.xlane.xlu1 %6503 }
0x1e41   : > { %v6512_v27 = vmul.f32 0.03125, %v6504_v2  ;;  %v6501_v17 = vpop.xlane.xlu0 %6500  ;;  %v6791_v2 = vld [vmem:[%s12847_s18 + $0x20] sm:$0xff] }
0x1e42   : > { %v6511_v20 = vmul.f32 0.03125, %v6501_v17 }
0x1e43   : > { %v6516_v24 = vsub.f32 %v6494_v19, %v6512_v27  ;;  %v6792_v27 = vld [vmem:[%s12847_s18 + $0x28] sm:$0xff] }
0x1e44   : > { %v6515_v30 = vsub.f32 %v6493_v28, %v6511_v20  ;;  %v10792_v17 = vpack.c.bf16 %v6792_v27, %v6791_v2  ;;  %v6793_v20 = vld [vmem:[%s12847_s18 + $0x30] sm:$0xff] }
0x1e45   : > { %v6507_v31 = vpop.xlane.xlu0 %6506  ;;  %v6520_v32 = vmul.f32 %v6516_v24, %v6516_v24 }
0x1e46   : > { %v6513_v34 = vmul.f32 0.03125, %v6507_v31  ;;  %v6519_v36 = vmul.f32 %v6515_v30, %v6515_v30  ;;  %v9404_v31 = vld [vmem:[%s12848_s16] ss:$0 sm:$0xff] }
0x1e47   : > { %v6526_v35 = vsel %vm1072_vm2, %v6520_v32, 0.0 }
0x1e48   : > { %v6517_v37 = vsub.f32 %v6495_v54, %v6513_v34  ;;  %6527 = vadd.xlane.f32.xlu1 %v6526_v35  ;;  %v6523_v33 = vsel %vm1072_vm2, %v6519_v36, 0.0  ;;  %v6788_v54 = vld [vmem:[%s12847_s18 + $0x8] sm:$0xff] }
0x1e49   : > { %6524 = vadd.xlane.f32.xlu0 %v6523_v33  ;;  %v6510_v38 = vpop.xlane.xlu0 %6509  ;;  %v10784_v13 = vpack.c.bf16 %v6788_v54, %v6787_v3 }
0x1e4a   : > { %v6514_v39 = vmul.f32 0.03125, %v6510_v38  ;;  %v6521_v41 = vmul.f32 %v6517_v37, %v6517_v37 }
0x1e4b   : > { %10785 = vmatprep.subr.bf16.mxu1 %v10784_v13 }
0x1e4c   : > { %v6518_v44 = vsub.f32 %v6496_v55, %v6514_v39  ;;  %v6529_v45 = vsel %vm1072_vm2, %v6521_v41, 0.0  ;;  %10787 = vmatpush3.bf16.msra.mxu1 %v10784_v13  ;;  %v6789_v55 = vld [vmem:[%s12847_s18 + $0x10] sm:$0xff] }
0x1e4d   : > { %6530 = vadd.xlane.f32.xlu0 %v6529_v45  ;;  %v10788_v26 = vpack.c.bf16 %v6790_v15, %v6789_v55 }
0x1e4e   : > { %v6522_v47 = vmul.f32 %v6518_v44, %v6518_v44 }
0x1e4f   : > { %10789 = vmatprep.subr.bf16.mxu1 %v10788_v26 }
0x1e50   : > { %v6532_v49 = vsel %vm1072_vm2, %v6522_v47, 0.0  ;;  %10791 = vmatpush3.bf16.msra.mxu1 %v10788_v26 }
0x1e51   : > { %6533 = vadd.xlane.f32.xlu1 %v6532_v49  ;;  %10793 = vmatprep.subr.bf16.mxu1 %v10792_v17 }
0x1e54   : > { %10795 = vmatpush3.bf16.msra.mxu1 %v10792_v17 }
0x1ed5   : > { %v6528_v60 = vpop.xlane.xlu1 %6527 }
0x1ed6   : > { %v6536_v42 = vmul.f32 0.03125, %v6528_v60  ;;  %v6525_v61 = vpop.xlane.xlu0 %6524 }
0x1ed7   : > { %v6535_v62 = vmul.f32 0.03125, %v6525_v61 }
0x1ed8   : > { %v6540_v63 = vadd.f32 1e-12, %v6536_v42 }
0x1ed9   : > { %v6539_v52 = vadd.f32 1e-12, %v6535_v62 }
0x1eda   : > { %11248 = vrsqrt.f32 %v6540_v63  ;;  %v6531_v5 = vpop.xlane.xlu0 %6530 }
0x1edb   : > { %11250 = vrsqrt.f32 %v6539_v52  ;;  %v6537_v59 = vmul.f32 0.03125, %v6531_v5 }
0x1edd   : > { %v6541_v6 = vadd.f32 1e-12, %v6537_v59 }
0x1ede   : > { %v6534_v58 = vpop.xlane.xlu1 %6533 }
0x1edf   : > { %11252 = vrsqrt.f32 %v6541_v6  ;;  %v6538_v21 = vmul.f32 0.03125, %v6534_v58 }
0x1ee1   : > { %v6542_v12 = vadd.f32 1e-12, %v6538_v21 }
0x1ee3   : > { %11254 = vrsqrt.f32 %v6542_v12 }
0x1ee4   : > { %v11249_v7 = vpop.eup %11248 }
0x1ee5   : > { %v11251_v46 = vpop.eup %11250  ;;  %v6548_v29 = vmul.f32 %v11249_v7, %v6516_v24  ;;  %v6794_v24 = vld [vmem:[%s12847_s18 + $0x38] sm:$0xff] }
0x1ee6   : > { %v6547_v48 = vmul.f32 %v11251_v46, %v6515_v30  ;;  %v10796_v30 = vpack.c.bf16 %v6794_v24, %v6793_v20 }
0x1ee7   : > { %v6558_v14 = vmul.f32 %v9402_v25, %v6548_v29 }
0x1ee8   : > { %v6557_v9 = vmul.f32 %v9402_v25, %v6547_v48  ;;  %10797 = vmatprep.subr.bf16.mxu1 %v10796_v30 }
0x1ee9   : > { %v11253_v18 = vpop.eup %11252  ;;  %v12283_v28 = vadd.f32 %v9403_v8, %v6558_v14  ;;  %10799 = vmatpush3.bf16.msra.mxu1 %v10796_v30 }
0x1eea   : > { %v12281_v19 = vadd.f32 %v9403_v8, %v6557_v9  ;;  %v6549_v16 = vmul.f32 %v11253_v18, %v6517_v37 }
0x1eec   : > { %10365 = vmatprep.mubr.msk.f32.mxu0 %vm1072_vm2, %v12281_v19  ;;  %v6559_v11 = vmul.f32 %v9402_v25, %v6549_v16 }
0x1eed   : > { %v11255_v1 = vpop.eup %11254  ;;  %10366 = vmatmul.mubr.msk.f32.vlgmr.msra.gmra.mrb[40].mxu0 %vm1072_vm2, %v12283_v28 }
0x1eee   : > { %v12289_v22 = vadd.f32 %v9403_v8, %v6559_v11  ;;  %v6550_v0 = vmul.f32 %v11255_v1, %v6518_v44 }
0x1ef0   : > { %10368 = vmatprep.mubr.msk.f32.mxu0 %vm1072_vm2, %v12289_v22  ;;  %v6560_v10 = vmul.f32 %v9402_v25, %v6550_v0 }
0x1ef2   : > { %v12293_v51 = vadd.f32 %v9403_v8, %v6560_v10 }
0x1ef4   : > { %10369 = vmatmul.mubr.msk.f32.gmra.mrb[42].mxu0 %vm1072_vm2, %v12293_v51 }
0x1fc0   : > { %v10367_v32 = vpop.f32.mrb[40].mxu0 }
0x1fc1   : > { %v12306_v34 = vadd.f32 %v10367_v32, %v9404_v31  ;;  %v6660_v36 = vpop.f32.mrb[41].mxu0 }
0x1fc2   : > { %v12308_v35 = vadd.f32 %v9404_v31, %v6660_v36 }
0x1fc3   : > { %v12311_v37 = vmul.f32 0.70710677, %v12306_v34 }
0x1fc4   : > { %v12314_v33 = vmul.f32 0.70710677, %v12308_v35 }
0x1fc5   : > { %v6696_v38 = vand.u32 2147483647, %v12311_v37  ;;  %vm6688_vm8 = vcmp.ge.f32.partialorder %v12311_v37, 0.0 }
0x1fc6   : > { %v6695_v39 = vand.u32 2147483647, %v12314_v33  ;;  %vm6687_vm9 = vcmp.ge.f32.partialorder %v12314_v33, 0.0  ;;  %v6679_v33 = vmul.f32 0.5, %v12308_v35 }
0x1fc7   : > { %v6700_v41 = vmul.f32 0.3275911, %v6696_v38  ;;  %v10370_v44 = vpop.f32.mrb[42].mxu0  ;;  %v6752_v63 = vsub.f32 0.0, %v6696_v38 }
0x1fc8   : > { %v6699_v45 = vmul.f32 0.3275911, %v6695_v39  ;;  %v12318_v47 = vadd.f32 %v10370_v44, %v9404_v31  ;;  %v6670_v49 = vpop.f32.mrb[43].mxu0  ;;  %v6751_v5 = vsub.f32 0.0, %v6695_v39 }
0x1fc9   : > { %v6704_v40 = vadd.f32 1.0, %v6700_v41  ;;  %v12320_v4 = vadd.f32 %v9404_v31, %v6670_v49  ;;  %v6756_v6 = vmul.f32 %v6752_v63, %v6696_v38 }
0x1fca   : > { %v6703_v50 = vadd.f32 1.0, %v6699_v45  ;;  %v12323_v56 = vmul.f32 0.70710677, %v12318_v47  ;;  %v6755_v12 = vmul.f32 %v6751_v5, %v6695_v39 }
0x1fcb   : > { %11256 = vrcp.f32 %v6704_v40  ;;  %v12326_v53 = vmul.f32 0.70710677, %v12320_v4  ;;  %v6761_v29 = vmul.f32 1.442695, %v6756_v6 }
0x1fcc   : > { %11258 = vrcp.f32 %v6703_v50  ;;  %v6698_v23 = vand.u32 2147483647, %v12323_v56  ;;  %v6759_v9 = vmul.f32 1.442695, %v6755_v12  ;;  %vm6690_vm10 = vcmp.ge.f32.partialorder %v12323_v56, 0.0 }
0x1fcd   : > { %v6697_v60 = vand.u32 2147483647, %v12326_v53  ;;  %vm6689_vm11 = vcmp.ge.f32.partialorder %v12326_v53, 0.0  ;;  %v6681_v53 = vmul.f32 0.5, %v12320_v4 }
0x1fce   : > { %v6702_v42 = vmul.f32 0.3275911, %v6698_v23  ;;  %v6754_v46 = vsub.f32 0.0, %v6698_v23 }
0x1fcf   : > { %v6701_v61 = vmul.f32 0.3275911, %v6697_v60  ;;  %v6753_v8 = vsub.f32 0.0, %v6697_v60 }
0x1fd0   : > { %v6706_v62 = vadd.f32 1.0, %v6702_v42  ;;  %v6758_v1 = vmul.f32 %v6754_v46, %v6698_v23 }
0x1fd1   : > { %v6705_v52 = vadd.f32 1.0, %v6701_v61  ;;  %v6757_v54 = vmul.f32 %v6753_v8, %v6697_v60 }
0x1fd2   : > { %11260 = vrcp.f32 %v6706_v62  ;;  %v6765_v27 = vmul.f32 1.442695, %v6758_v1  ;;  %v6680_v1 = vmul.f32 0.5, %v12306_v34 }
0x1fd3   : > { %11262 = vrcp.f32 %v6705_v52  ;;  %v6763_v30 = vmul.f32 1.442695, %v6757_v54 }
0x1fd4   : > { %11264 = vpow2.f32 %v6761_v29 }
0x1fd5   : > { %v11257_v59 = vpop.eup %11256  ;;  %11266 = vpow2.f32 %v6759_v9 }
0x1fd6   : > { %v11259_v58 = vpop.eup %11258  ;;  %v6716_v21 = vmul.f32 1.0614054, %v11257_v59  ;;  %11268 = vpow2.f32 %v6765_v27 }
0x1fd7   : > { %v6715_v7 = vmul.f32 1.0614054, %v11259_v58  ;;  %11270 = vpow2.f32 %v6763_v30 }
0x1fd8   : > { %v6720_v25 = vadd.f32 -1.4531521, %v6716_v21  ;;  %v11428_v21 = vmov -1.0  }
0x1fd9   : > { %v6719_v48 = vadd.f32 -1.4531521, %v6715_v7  ;;  %v6692_v12 = vsel %vm6688_vm8, 1.0, %v11428_v21  ;;  %v6693_v35 = vsel %vm6689_vm11, 1.0, %v11428_v21 }
0x1fda   : > { %v6724_v14 = vmul.f32 %v11257_v59, %v6720_v25 }
0x1fdb   : > { %v6723_v18 = vmul.f32 %v11259_v58, %v6719_v48 }
0x1fdc   : > { %v11261_v16 = vpop.eup %11260  ;;  %v6728_v11 = vadd.f32 1.4214138, %v6724_v14 }
0x1fdd   : > { %v11263_v0 = vpop.eup %11262  ;;  %v6727_v10 = vadd.f32 1.4214138, %v6723_v18  ;;  %v6718_v3 = vmul.f32 1.0614054, %v11261_v16 }
0x1fde   : > { %v6732_v13 = vmul.f32 %v11257_v59, %v6728_v11  ;;  %v6717_v55 = vmul.f32 1.0614054, %v11263_v0  ;;  %v11265_v50 = vpop.eup %11264 }
0x1fdf   : > { %v6731_v15 = vmul.f32 %v11259_v58, %v6727_v10  ;;  %v6722_v26 = vadd.f32 -1.4531521, %v6718_v3  ;;  %v11267_v42 = vpop.eup %11266 }
0x1fe0   : > { %v6736_v2 = vadd.f32 -0.28449672, %v6732_v13  ;;  %v6721_v17 = vadd.f32 -1.4531521, %v6717_v55  ;;  %v11269_v37 = vpop.eup %11268 }
0x1fe1   : > { %v6735_v20 = vadd.f32 -0.28449672, %v6731_v15  ;;  %v6726_v24 = vmul.f32 %v11261_v16, %v6722_v26  ;;  %v11271_v9 = vpop.eup %11270  ;;  %v6682_v26 = vmul.f32 0.5, %v12318_v47 }
0x1fe2   : > { %v6740_v31 = vmul.f32 %v11257_v59, %v6736_v2  ;;  %v6725_v32 = vmul.f32 %v11263_v0, %v6721_v17  ;;  %v9409_v17 = vld [vmem:[%s12849_s15] ss:$0 sm:$0xff] }
0x1fe3   : > { %v6739_v36 = vmul.f32 %v11259_v58, %v6735_v20  ;;  %v6730_v38 = vadd.f32 1.4214138, %v6726_v24 }
0x1fe4   : > { %v6744_v39 = vadd.f32 0.2548296, %v6740_v31  ;;  %v6729_v41 = vadd.f32 1.4214138, %v6725_v32 }
0x1fe5   : > { %v6743_v44 = vadd.f32 0.2548296, %v6739_v36  ;;  %v6734_v45 = vmul.f32 %v11261_v16, %v6730_v38 }
0x1fe6   : > { %v6748_v49 = vmul.f32 %v11257_v59, %v6744_v39  ;;  %v6733_v40 = vmul.f32 %v11263_v0, %v6729_v41 }
0x1fe7   : > { %v6747_v23 = vmul.f32 %v11259_v58, %v6743_v44  ;;  %v6738_v60 = vadd.f32 -0.28449672, %v6734_v45  ;;  %v6691_v58 = vsel %vm6687_vm9, 1.0, %v11428_v21 }
0x1fe8   : > { %v6768_v61 = vmul.f32 %v11265_v50, %v6748_v49  ;;  %v6737_v62 = vadd.f32 -0.28449672, %v6733_v40 }
0x1fe9   : > { %v6767_v63 = vmul.f32 %v11267_v42, %v6747_v23  ;;  %v6742_v52 = vmul.f32 %v11261_v16, %v6738_v60 }
0x1fea   : > { %v6772_v5 = vsub.f32 1.0, %v6768_v61  ;;  %v6741_v6 = vmul.f32 %v11263_v0, %v6737_v62 }
0x1feb   : > { %v6771_v7 = vsub.f32 1.0, %v6767_v63  ;;  %v6746_v59 = vadd.f32 0.2548296, %v6742_v52 }
0x1fec   : > { %v6776_v25 = vmul.f32 %v6772_v5, %v6692_v12  ;;  %v6745_v46 = vadd.f32 0.2548296, %v6741_v6 }
0x1fed   : > { %v6775_v29 = vmul.f32 %v6771_v7, %v6691_v58  ;;  %v6750_v48 = vmul.f32 %v11261_v16, %v6746_v59  ;;  %v6694_v16 = vsel %vm6690_vm10, 1.0, %v11428_v21 }
0x1fee   : > { %v6780_v8 = vadd.f32 1.0, %v6776_v25  ;;  %v6749_v14 = vmul.f32 %v11263_v0, %v6745_v46 }
0x1fef   : > { %v6779_v18 = vadd.f32 1.0, %v6775_v29  ;;  %v6770_v11 = vmul.f32 %v11269_v37, %v6750_v48  ;;  %v9416_v48 = vld [vmem:[%s11494_s24 + $0x20] sm:$0xff]  ;;  %v9417_v37 = vld [vmem:[%s11494_s24 + $0x28] sm:$0xff] }
0x1ff0   : > { %v6769_v10 = vmul.f32 %v11271_v9, %v6749_v14  ;;  %v6784_v13 = vmul.f32 %v6780_v8, %v6680_v1  ;;  %v9436_v8 = vld [vmem:[%s11514_s20 + $0x20] sm:$0xff]  ;;  %v10800_v14 = vpack.c.bf16 %v9417_v37, %v9416_v48  ;;  %v9437_v9 = vld [vmem:[%s11514_s20 + $0x28] sm:$0xff]  ;;  %v9438_v1 = vld [vmem:[%s11514_s20 + $0x30] sm:$0xff] }
0x1ff1   : > { %v6783_v3 = vmul.f32 %v6779_v18, %v6679_v33  ;;  %v6774_v54 = vsub.f32 1.0, %v6770_v11  ;;  %v10816_v33 = vpack.c.bf16 %v9437_v9, %v9436_v8  ;;  %v9418_v18 = vld [vmem:[%s11494_s24 + $0x30] sm:$0xff]  ;;  %v9419_v11 = vld [vmem:[%s11494_s24 + $0x38] sm:$0xff]  ;;  %v9431_v9 = vld [vmem:[%s11509_s12 + $0x1] ss:$0 sm:$0xff] }
0x1ff2   : > { %v6773_v0 = vsub.f32 1.0, %v6769_v10  ;;  %10801 = vmatprep.subr.bf16.mxu0 %v10800_v14  ;;  %v10804_v10 = vpack.c.bf16 %v9419_v11, %v9418_v18 }
0x1ff3   : > { %v6778_v55 = vmul.f32 %v6774_v54, %v6694_v16  ;;  %10387 = vmatprep.mubr.msk.f32.mxu1 %vm6802_vm12, %v6783_v3  ;;  %10817 = vmatprep.subr.bf16.mxu1 %v10816_v33  ;;  %v9439_v3 = vld [vmem:[%s11514_s20 + $0x38] sm:$0xff]  ;;  %v9427_v16 = vld [vmem:[%s11504_s6 + $0x28] sm:$0xff] }
0x1ff4   : > { %v6777_v56 = vmul.f32 %v6773_v0, %v6693_v35  ;;  %10388 = vmatmul.mubr.msk.f32.vlgmr.msra.gmra.mrb[44].mxu1 %vm6802_vm12, %v6784_v13  ;;  %10803 = vmatpush3.bf16.msra.mxu0 %v10800_v14  ;;  %v10820_v54 = vpack.c.bf16 %v9439_v3, %v9438_v1  ;;  %v9426_v13 = vld [vmem:[%s11504_s6 + $0x20] sm:$0xff] }
0x1ff5   : > { %v6782_v34 = vadd.f32 1.0, %v6778_v55  ;;  %10819 = vmatpush3.bf16.msra.mxu1 %v10816_v33  ;;  %10805 = vmatprep.subr.bf16.mxu0 %v10804_v10  ;;  %v10808_v0 = vpack.c.bf16 %v9427_v16, %v9426_v13 }
0x1ff6   : > { %v6781_v15 = vadd.f32 1.0, %v6777_v56  ;;  %10821 = vmatprep.subr.bf16.mxu1 %v10820_v54 }
0x1ff7   : > { %v6786_v27 = vmul.f32 %v6782_v34, %v6682_v26 }
0x1ff8   : > { %v6785_v2 = vmul.f32 %v6781_v15, %v6681_v53  ;;  %10807 = vmatpush3.bf16.msra.mxu0 %v10804_v10 }
0x1ff9   : > { %10823 = vmatpush3.bf16.msra.mxu1 %v10820_v54  ;;  %10809 = vmatprep.subr.bf16.mxu0 %v10808_v0 }
0x1ffa   : > { %10390 = vmatprep.mubr.msk.f32.mxu1 %vm6802_vm12, %v6785_v2 }
0x1ffb   : > { %10391 = vmatmul.mubr.msk.f32.gmra.mrb[46].mxu1 %vm6802_vm12, %v6786_v27 }
0x20c7   : > { %v10389_v20 = vpop.f32.mrb[44].mxu1 }
0x20c8   : > { %v6887_v24 = vadd.f32 %v10389_v20, %v9409_v17  ;;  %v6881_v30 = vpop.f32.mrb[45].mxu1 }
0x20c9   : > { %v6882_v31 = vadd.f32 %v9409_v17, %v6881_v30 }
0x20ca   : > { %v6901_v32 = vadd.f32 %v6887_v24, %v12283_v28 }
0x20cb   : > { %v6900_v36 = vadd.f32 %v6882_v31, %v12281_v19  ;;  %v9414_v31 = vld [vmem:[%s12850_s11] ss:$0 sm:$0xff] }
0x20cc   : > { %v6909_v4 = vsel %vm1072_vm2, %v6901_v32, 0.0 }
0x20cd   : > { %6910 = vadd.xlane.f32.xlu1 %v6909_v4  ;;  %v6906_v47 = vsel %vm1072_vm2, %v6900_v36, 0.0 }
0x20ce   : > { %6907 = vadd.xlane.f32.xlu0 %v6906_v47  ;;  %v10392_v38 = vpop.f32.mrb[46].mxu1  ;;  %v9415_v47 = vld [vmem:[%s11569_s17] ss:$0 sm:$0xff] }
0x20cf   : > { %v6897_v39 = vadd.f32 %v10392_v38, %v9409_v17  ;;  %v6891_v41 = vpop.f32.mrb[47].mxu1 }
0x20d0   : > { %v6892_v44 = vadd.f32 %v9409_v17, %v6891_v41  ;;  %v9428_v41 = vld [vmem:[%s11504_s6 + $0x30] sm:$0xff] }
0x20d1   : > { %v6903_v45 = vadd.f32 %v6897_v39, %v12293_v51 }
0x20d2   : > { %v6902_v49 = vadd.f32 %v6892_v44, %v12289_v22  ;;  %v9429_v44 = vld [vmem:[%s11504_s6 + $0x38] sm:$0xff] }
0x20d3   : > { %v6915_v40 = vsel %vm1072_vm2, %v6903_v45, 0.0 }
0x20d4   : > { %6916 = vadd.xlane.f32.xlu1 %v6915_v40  ;;  %v6912_v28 = vsel %vm1072_vm2, %v6902_v49, 0.0 }
0x20d5   : > { %6913 = vadd.xlane.f32.xlu0 %v6912_v28  ;;  %v10812_v28 = vpack.c.bf16 %v9429_v44, %v9428_v41  ;;  %v12471_v44 = vld [vmem:[%s12048_s27 + $0x18] sm:$0xff] }
0x215a   : > { %v6911_v19 = vpop.xlane.xlu1 %6910 }
0x215b   : > { %v6919_v50 = vmul.f32 0.03125, %v6911_v19  ;;  %v6908_v23 = vpop.xlane.xlu0 %6907 }
0x215c   : > { %v6918_v60 = vmul.f32 0.03125, %v6908_v23 }
0x215d   : > { %v12355_v42 = vsub.f32 %v6901_v32, %v6919_v50 }
0x215e   : > { %v12357_v61 = vsub.f32 %v6900_v36, %v6918_v60 }
0x215f   : > { %v6927_v62 = vmul.f32 %v12355_v42, %v12355_v42 }
0x2160   : > { %v6926_v22 = vmul.f32 %v12357_v61, %v12357_v61 }
0x2161   : > { %v6917_v51 = vpop.xlane.xlu1 %6916  ;;  %v6933_v63 = vsel %vm1072_vm2, %v6927_v62, 0.0 }
0x2162   : > { %v6921_v52 = vmul.f32 0.03125, %v6917_v51  ;;  %6934 = vadd.xlane.f32.xlu1 %v6933_v63  ;;  %v6914_v5 = vpop.xlane.xlu0 %6913  ;;  %v6930_v6 = vsel %vm1072_vm2, %v6926_v22, 0.0  ;;  %v9441_v22 = vld [vmem:[%s12838_s28 + $0x1] ss:$0 sm:$0xff] }
0x2163   : > { %v6920_v12 = vmul.f32 0.03125, %v6914_v5  ;;  %6931 = vadd.xlane.f32.xlu0 %v6930_v6  ;;  %v9421_v51 = vld [vmem:[%s12837_s1 + $0x1] ss:$0 sm:$0xff]  ;;  %s12852_s1 = smov 112  }
0x2164   : > { %v12365_v7 = vsub.f32 %v6903_v45, %v6921_v52 }
0x2165   : > { %v12367_v59 = vsub.f32 %v6902_v49, %v6920_v12 }
0x2166   : > { %v6929_v25 = vmul.f32 %v12365_v7, %v12365_v7 }
0x2167   : > { %v6928_v58 = vmul.f32 %v12367_v59, %v12367_v59 }
0x2168   : > { %v6939_v46 = vsel %vm1072_vm2, %v6929_v25, 0.0 }
0x2169   : > { %6940 = vadd.xlane.f32.xlu1 %v6939_v46  ;;  %v6936_v29 = vsel %vm1072_vm2, %v6928_v58, 0.0 }
0x216a   : > { %6937 = vadd.xlane.f32.xlu0 %v6936_v29 }
0x21ef   : > { %v6935_v55 = vpop.xlane.xlu1 %6934 }
0x21f0   : > { %v6943_v35 = vmul.f32 0.03125, %v6935_v55  ;;  %v6932_v56 = vpop.xlane.xlu0 %6931 }
0x21f1   : > { %v6942_v34 = vmul.f32 0.03125, %v6932_v56 }
0x21f2   : > { %v6947_v53 = vadd.f32 1e-12, %v6943_v35 }
0x21f3   : > { %v6946_v15 = vadd.f32 1e-12, %v6942_v34 }
0x21f4   : > { %11272 = vrsqrt.f32 %v6947_v53 }
0x21f5   : > { %11274 = vrsqrt.f32 %v6946_v15 }
0x21f6   : > { %v6941_v26 = vpop.xlane.xlu1 %6940 }
0x21f7   : > { %v6945_v2 = vmul.f32 0.03125, %v6941_v26  ;;  %v6938_v27 = vpop.xlane.xlu0 %6937 }
0x21f8   : > { %v6944_v17 = vmul.f32 0.03125, %v6938_v27 }
0x21f9   : > { %v6949_v20 = vadd.f32 1e-12, %v6945_v2 }
0x21fa   : > { %v6948_v24 = vadd.f32 1e-12, %v6944_v17 }
0x21fb   : > { %11276 = vrsqrt.f32 %v6949_v20 }
0x21fc   : > { %11278 = vrsqrt.f32 %v6948_v24  ;;  %v12461_v24 = vld [vmem:[%s12048_s27 + $0x8] sm:$0xff] }
0x21fe   : > { %v11273_v30 = vpop.eup %11272 }
0x21ff   : > { %v11275_v32 = vpop.eup %11274  ;;  %v6955_v36 = vmul.f32 %v11273_v30, %v12355_v42 }
0x2200   : > { %v6954_v4 = vmul.f32 %v11275_v32, %v12357_v61 }
0x2201   : > { %v6965_v38 = vmul.f32 %v9414_v31, %v6955_v36 }
0x2202   : > { %v6964_v39 = vmul.f32 %v9414_v31, %v6954_v4 }
0x2203   : > { %v12393_v40 = vadd.f32 %v9415_v47, %v6965_v38 }
0x2204   : > { %v12391_v45 = vadd.f32 %v9415_v47, %v6964_v39 }
0x2205   : > { %v11277_v49 = vpop.eup %11276 }
0x2206   : > { %v11279_v19 = vpop.eup %11278  ;;  %10401 = vmatprep.mubr.msk.f32.mxu0 %vm1072_vm2, %v12391_v45  ;;  %10429 = vmatprep.mubr.msk.f32.mxu1 %vm1072_vm2, %v12391_v45  ;;  %v6957_v50 = vmul.f32 %v11277_v49, %v12365_v7 }
0x2207   : > { %10402 = vmatmul.mubr.msk.f32.vlgmr.msra.gmra.mrb[44].mxu0 %vm1072_vm2, %v12393_v40  ;;  %10430 = vmatmul.mubr.msk.f32.vlgmr.msra.gmra.mrb[48].mxu1 %vm1072_vm2, %v12393_v40  ;;  %v6956_v23 = vmul.f32 %v11279_v19, %v12367_v59 }
0x2208   : > { %10811 = vmatpush3.bf16.msra.mxu0 %v10808_v0  ;;  %v6967_v60 = vmul.f32 %v9414_v31, %v6957_v50 }
0x2209   : > { %v6966_v42 = vmul.f32 %v9414_v31, %v6956_v23  ;;  %10813 = vmatprep.subr.bf16.mxu0 %v10812_v28  ;;  %v12465_v31 = vld [vmem:[%s12048_s27] sm:$0xff] }
0x220a   : > { %v12407_v62 = vadd.f32 %v9415_v47, %v6967_v60 }
0x220b   : > { %v12405_v61 = vadd.f32 %v9415_v47, %v6966_v42 }
0x220c   : > { %10815 = vmatpush3.bf16.msra.mxu0 %v10812_v28  ;;  %v12475_v28 = vld [vmem:[%s12048_s27 + $0x10] sm:$0xff]  ;;  %s12851_s27 = smov 120  }
0x220d   : > { %10404 = vmatprep.mubr.msk.f32.mxu0 %vm1072_vm2, %v12405_v61  ;;  %10432 = vmatprep.mubr.msk.f32.mxu1 %vm1072_vm2, %v12405_v61 }
0x220e   : > { %10405 = vmatmul.mubr.msk.f32.gmra.mrb[46].mxu0 %vm1072_vm2, %v12407_v62  ;;  %10433 = vmatmul.mubr.msk.f32.gmra.mrb[50].mxu1 %vm1072_vm2, %v12407_v62 }
0x220f   : > { %10415 = vmatprep.mubr.msk.f32.mxu0 %vm1072_vm2, %v12391_v45 }
0x2212   : > { %10416 = vmatmul.mubr.msk.f32.vlgmr.msra.gmra.mrb[48].mxu0 %vm1072_vm2, %v12393_v40 }
0x2213   : > { %10418 = vmatprep.mubr.msk.f32.mxu0 %vm1072_vm2, %v12405_v61 }
0x2216   : > { %10419 = vmatmul.mubr.msk.f32.gmra.mrb[50].mxu0 %vm1072_vm2, %v12407_v62 }
0x22da   : > { %v10403_v63 = vpop.f32.mrb[44].mxu0  ;;  %v10431_v52 = vpop.f32.mrb[48].mxu1 }
0x22db   : > { %v7271_v5 = vadd.f32 %v10431_v52, %v9441_v22  ;;  %v7069_v6 = vpop.f32.mrb[45].mxu0  ;;  %v7265_v12 = vpop.f32.mrb[49].mxu1  ;;  %v12448_v53 = vadd.f32 %v10403_v63, %v9421_v51 }
0x22dc   : > { %v12427_v7 = vadd.f32 %v9421_v51, %v7069_v6  ;;  %v7266_v59 = vadd.f32 %v9441_v22, %v7265_v12 }
0x22de   : > { %10443 = vmatprep.mubr.msk.f32.mxu0 %vm1192_vm5, %v12427_v7  ;;  %v10836_v25 = vpack.c.bf16 %v7271_v5, %v7266_v59  ;;  %v12431_v58 = vpack.i.bf16 %v7271_v5, %v7266_v59 }
0x22e0   : > { %10837 = vmatprep.subr.bf16.mxu1 %v10836_v25 }
0x22e1   : > { %v10406_v46 = vpop.f32.mrb[46].mxu0  ;;  %v10434_v29 = vpop.f32.mrb[50].mxu1  ;;  %10839 = vmatpush3.bf16.msra.mxu1 %v10836_v25 }
0x22e2   : > { %v7281_v48 = vadd.f32 %v10434_v29, %v9441_v22  ;;  %v7079_v37 = vpop.f32.mrb[47].mxu0  ;;  %v7275_v8 = vpop.f32.mrb[51].mxu1  ;;  %v12456_v26 = vadd.f32 %v10406_v46, %v9421_v51 }
0x22e3   : > { %v7276_v14 = vadd.f32 %v9441_v22, %v7275_v8  ;;  %v12450_v15 = vadd.f32 %v9421_v51, %v7079_v37 }
0x22e5   : > { %v10417_v33 = vpop.f32.mrb[48].mxu0  ;;  %v10840_v18 = vpack.c.bf16 %v7281_v48, %v7276_v14  ;;  %v12434_v11 = vpack.i.bf16 %v7281_v48, %v7276_v14 }
0x22e6   : > { %v7173_v1 = vadd.f32 %v10417_v33, %v9431_v9  ;;  %v7167_v10 = vpop.f32.mrb[49].mxu0 }
0x22e7   : > { %v7168_v3 = vadd.f32 %v9431_v9, %v7167_v10  ;;  %10841 = vmatprep.subr.bf16.mxu1 %v10840_v18 }
0x22e8   : > { %10843 = vmatpush3.bf16.msra.mxu1 %v10840_v18 }
0x22e9   : > { %v10420_v54 = vpop.f32.mrb[50].mxu0  ;;  %v10824_v13 = vpack.c.bf16 %v7173_v1, %v7168_v3  ;;  %v12436_v16 = vpack.i.bf16 %v7173_v1, %v7168_v3 }
0x22ea   : > { %v7183_v0 = vadd.f32 %v10420_v54, %v9431_v9  ;;  %v7177_v55 = vpop.f32.mrb[51].mxu0 }
0x22eb   : > { %v7178_v35 = vadd.f32 %v9431_v9, %v7177_v55  ;;  %10826 = vmatprep.subr.msk.bf16.mxu0 %vm12007_vm6, %v10824_v13 }
0x22ec   : > { %10829 = vmatpush3.bf16.xpose.msk.msra.mxu0 %vm12007_vm6, %v10824_v13 }
0x22ed   : > { %v10830_v56 = vpack.c.bf16 %v7183_v0, %v7178_v35  ;;  %v12442_v34 = vpack.i.bf16 %v7183_v0, %v7178_v35 }
0x22ef   : > { %10832 = vmatprep.subr.msk.bf16.mxu0 %vm12007_vm6, %v10830_v56 }
0x22f4   : > { %10835 = vmatpush3.bf16.xpose.msk.msra.mxu0 %vm12007_vm6, %v10830_v56 }
0x22fb   : > { %10444 = vmatmul.mubr.msk.f32.vlgmr.msra.gmra.mrb[52].mxu0 %vm1192_vm5, %v12448_v53 }
0x22fc   : > { %10446 = vmatprep.mubr.msk.f32.mxu0 %vm1192_vm5, %v12450_v15 }
0x22ff   : > { %10447 = vmatmul.mubr.msk.f32.gmra.mrb[54].mxu0 %vm1192_vm5, %v12456_v26 }
0x23ce   : > { %v10445_v2 = vpop.f32.mrb[52].mxu0 }
0x23cf   : > { %v7394_v27 = vmul.f32 0.35355338, %v10445_v2  ;;  %v7374_v17 = vpop.f32.mrb[53].mxu0 }
0x23d0   : > { %v7393_v20 = vmul.f32 0.35355338, %v7374_v17 }
0x23d1   : > { %v7398_v30 = vadd.f32 %v12461_v24, %v7394_v27 }
0x23d2   : > { %v7397_v32 = vadd.f32 %v12465_v31, %v7393_v20  ;;  %v10448_v36 = vpop.f32.mrb[54].mxu0 }
0x23d3   : > { %v7396_v4 = vmul.f32 0.35355338, %v10448_v36  ;;  %v7384_v47 = vpop.f32.mrb[55].mxu0  ;;  %v7404_v38 = vsel %vm1072_vm2, %v7398_v30, -inf }
0x23d4   : > { %v7395_v39 = vmul.f32 0.35355338, %v7384_v47  ;;  %7405 = vmax.xlane.f32.xlu1 %v7404_v38  ;;  %v7401_v41 = vsel %vm1072_vm2, %v7397_v32, -inf }
0x23d5   : > { %v7400_v49 = vadd.f32 %v12471_v44, %v7396_v4  ;;  %7402 = vmax.xlane.f32.xlu0 %v7401_v41 }
0x23d6   : > { %v7399_v19 = vadd.f32 %v12475_v28, %v7395_v39 }
0x23d7   : > { %v7410_v50 = vsel %vm1072_vm2, %v7400_v49, -inf }
0x23d8   : > { %7411 = vmax.xlane.f32.xlu1 %v7410_v50  ;;  %v7407_v23 = vsel %vm1072_vm2, %v7399_v19, -inf }
0x23d9   : > { %7408 = vmax.xlane.f32.xlu0 %v7407_v23 }
0x2461   : > { %v7406_v60 = vpop.xlane.xlu1 %7405 }
0x2462   : > { %v7414_v42 = vsub.f32 %v7398_v30, %v7406_v60  ;;  %v7403_v22 = vpop.xlane.xlu0 %7402 }
0x2463   : > { %v7413_v51 = vsub.f32 %v7397_v32, %v7403_v22 }
0x2464   : > { %v7419_v63 = vmul.f32 1.442695, %v7414_v42 }
0x2465   : > { %v7417_v52 = vmul.f32 1.442695, %v7413_v51  ;;  %v7412_v5 = vpop.xlane.xlu1 %7411 }
0x2466   : > { %11280 = vpow2.f32 %v7419_v63  ;;  %v7416_v6 = vsub.f32 %v7400_v49, %v7412_v5  ;;  %v7409_v12 = vpop.xlane.xlu0 %7408 }
0x2467   : > { %11282 = vpow2.f32 %v7417_v52  ;;  %v7415_v59 = vsub.f32 %v7399_v19, %v7409_v12 }
0x2468   : > { %v7423_v25 = vmul.f32 1.442695, %v7416_v6 }
0x2469   : > { %v7421_v46 = vmul.f32 1.442695, %v7415_v59 }
0x246a   : > { %11284 = vpow2.f32 %v7423_v25 }
0x246b   : > { %11286 = vpow2.f32 %v7421_v46 }
0x2470   : > { %v11281_v29 = vpop.eup %11280 }
0x2471   : > { %v11283_v48 = vpop.eup %11282  ;;  %v7428_v37 = vsel %vm1072_vm2, %v11281_v29, 0.0 }
0x2472   : > { %7429 = vadd.xlane.f32.xlu1 %v7428_v37  ;;  %v7425_v8 = vsel %vm1072_vm2, %v11283_v48, 0.0 }
0x2473   : > { %7426 = vadd.xlane.f32.xlu0 %v7425_v8 }
0x2474   : > { %v11285_v14 = vpop.eup %11284 }
0x2475   : > { %v11287_v9 = vpop.eup %11286  ;;  %v7434_v33 = vsel %vm1072_vm2, %v11285_v14, 0.0 }
0x2476   : > { %7435 = vadd.xlane.f32.xlu1 %v7434_v33  ;;  %v7431_v18 = vsel %vm1072_vm2, %v11287_v9, 0.0 }
0x2477   : > { %7432 = vadd.xlane.f32.xlu0 %v7431_v18 }
0x2487   : > { %11117 = vrot.lane.b32.xlu1 %v12442_v34, %s12851_s27 }
0x248b   : > { %7542 = vrot.lane.b32.xlu1 %v12427_v7, %s12851_s27 }
0x248d   : > { %11112 = vrot.lane.b32.xlu0 %v12436_v16, %s12851_s27 }
0x248f   : > { %7544 = vrot.lane.b32.xlu1 %v12448_v53, %s12851_s27 }
0x2491   : > { %7546 = vrot.lane.b32.xlu0 %v12450_v15, %s12851_s27 }
0x2493   : > { %7548 = vrot.lane.b32.xlu1 %v12456_v26, %s12851_s27 }
0x24ff   : > { %v7430_v1 = vpop.xlane.xlu1 %7429 }
0x2500   : > { %11288 = vrcp.f32 %v7430_v1  ;;  %v7427_v10 = vpop.xlane.xlu0 %7426 }
0x2501   : > { %11290 = vrcp.f32 %v7427_v10 }
0x2503   : > { %v7436_v3 = vpop.xlane.xlu1 %7435 }
0x2504   : > { %11292 = vrcp.f32 %v7436_v3  ;;  %v7433_v54 = vpop.xlane.xlu0 %7432 }
0x2505   : > { %11294 = vrcp.f32 %v7433_v54 }
0x2507   : > { %v11118_v13 = vpop.permute.xlu1 %11117 }
0x2508   : > { %v11113_v0 = vpop.permute.xlu0 %11112  ;;  %v11120_v27 = vunpack.i.h.bf16 %v11118_v13  ;;  %v11119_v17 = vunpack.i.l.bf16 %v11118_v13 }
0x2509   : > { %v11115_v55 = vunpack.i.h.bf16 %v11113_v0  ;;  %v11114_v35 = vunpack.i.l.bf16 %v11113_v0 }
0x250a   : > { %v11289_v56 = vpop.eup %11288  ;;  %v10850_v47 = vpack.c.bf16 %v11120_v27, %v11119_v17 }
0x250b   : > { %v11291_v2 = vpop.eup %11290  ;;  %v10844_v20 = vpack.c.bf16 %v11115_v55, %v11114_v35  ;;  %v7442_v32 = vmul.f32 %v11289_v56, %v11281_v29  ;;  %v7543_v41 = vpop.permute.xlu1 %7542 }
0x250c   : > { %v7441_v30 = vmul.f32 %v11291_v2, %v11283_v48  ;;  %v7547_v19 = vpop.permute.xlu0 %7546 }
0x250d   : > { %10846 = vmatprep.subr.msk.bf16.mxu1 %vm12007_vm6, %v10844_v20 }
0x250e   : > { %v11293_v36 = vpop.eup %11292  ;;  %10457 = vmatprep.mubr.msk.f32.mxu1 %vm1072_vm2, %v7441_v30 }
0x250f   : > { %v11295_v4 = vpop.eup %11294  ;;  %10458 = vmatmul.mubr.msk.f32.vlgmr.msra.gmra.mrb[52].mxu1 %vm1072_vm2, %v7442_v32  ;;  %v7444_v39 = vmul.f32 %v11293_v36, %v11285_v14  ;;  %v7545_v49 = vpop.permute.xlu1 %7544 }
0x2510   : > { %10849 = vmatpush3.bf16.xpose.msk.msra.mxu1 %vm12007_vm6, %v10844_v20  ;;  %v7443_v38 = vmul.f32 %v11295_v4, %v11287_v9 }
0x2511   : > { %10852 = vmatprep.subr.msk.bf16.mxu1 %vm12007_vm6, %v10850_v47 }
0x2512   : > { %10460 = vmatprep.mubr.msk.f32.mxu1 %vm1072_vm2, %v7443_v38 }
0x2513   : > { %10461 = vmatmul.mubr.msk.f32.gmra.mrb[54].mxu1 %vm1072_vm2, %v7444_v39  ;;  %v7549_v50 = vpop.permute.xlu1 %7548 }
0x2514   : > { %10471 = vmatprep.mubr.msk.f32.mxu1 %vm1192_vm5, %v7543_v41 }
0x2518   : > { %10855 = vmatpush3.bf16.xpose.msk.msra.mxu1 %vm12007_vm6, %v10850_v47 }
0x251f   : > { %10472 = vmatmul.mubr.msk.f32.vlgmr.msra.gmra.mrb[56].mxu1 %vm1192_vm5, %v7545_v49 }
0x2520   : > { %10474 = vmatprep.mubr.msk.f32.mxu1 %vm1192_vm5, %v7547_v19 }
0x2523   : > { %10475 = vmatmul.mubr.msk.f32.gmra.mrb[58].mxu1 %vm1192_vm5, %v7549_v50 }
0x25e2   : > { %v12512_v23 = vpop.f32.mrb[52].mxu1 }
0x25e3   : > { %v12514_v60 = vpop.f32.mrb[53].mxu1 }
0x25e6   : > { %v12516_v42 = vpop.f32.mrb[54].mxu1 }
0x25e7   : > { %v12518_v22 = vpop.f32.mrb[55].mxu1 }
0x25f2   : > { %v10473_v51 = vpop.f32.mrb[56].mxu1 }
0x25f3   : > { %v7660_v63 = vmul.f32 0.35355338, %v10473_v51  ;;  %v7640_v52 = vpop.f32.mrb[57].mxu1 }
0x25f4   : > { %v7659_v5 = vmul.f32 0.35355338, %v7640_v52 }
0x25f5   : > { %v7664_v6 = vadd.f32 %v12461_v24, %v7660_v63 }
0x25f6   : > { %v7663_v12 = vadd.f32 %v12465_v31, %v7659_v5  ;;  %v10476_v59 = vpop.f32.mrb[58].mxu1 }
0x25f7   : > { %v7650_v25 = vpop.f32.mrb[59].mxu1  ;;  %v7670_v46 = vsel %vm1072_vm2, %v7664_v6, -inf  ;;  %v7662_v29 = vmul.f32 0.35355338, %v10476_v59 }
0x25f8   : > { %v7661_v48 = vmul.f32 0.35355338, %v7650_v25  ;;  %7671 = vmax.xlane.f32.xlu1 %v7670_v46  ;;  %v7667_v37 = vsel %vm1072_vm2, %v7663_v12, -inf }
0x25f9   : > { %7668 = vmax.xlane.f32.xlu0 %v7667_v37  ;;  %v7666_v14 = vadd.f32 %v12471_v44, %v7662_v29 }
0x25fa   : > { %v7665_v8 = vadd.f32 %v12475_v28, %v7661_v48 }
0x25fb   : > { %v7676_v33 = vsel %vm1072_vm2, %v7666_v14, -inf }
0x25fc   : > { %v7673_v9 = vsel %vm1072_vm2, %v7665_v8, -inf }
0x25fd   : > { %7674 = vmax.xlane.f32.xlu0 %v7673_v9 }
0x2601   : > { %7677 = vmax.xlane.f32.xlu0 %v7676_v33 }
0x2685   : > { %v7672_v18 = vpop.xlane.xlu1 %7671 }
0x2686   : > { %v7680_v1 = vsub.f32 %v7664_v6, %v7672_v18  ;;  %v7669_v10 = vpop.xlane.xlu0 %7668 }
0x2687   : > { %v7679_v3 = vsub.f32 %v7663_v12, %v7669_v10 }
0x2688   : > { %v7685_v54 = vmul.f32 1.442695, %v7680_v1 }
0x2689   : > { %v7683_v13 = vmul.f32 1.442695, %v7679_v3 }
0x268a   : > { %11296 = vpow2.f32 %v7685_v54  ;;  %v7675_v2 = vpop.xlane.xlu0 %7674 }
0x268b   : > { %11298 = vpow2.f32 %v7683_v13  ;;  %v7681_v27 = vsub.f32 %v7665_v8, %v7675_v2 }
0x268d   : > { %v7687_v17 = vmul.f32 1.442695, %v7681_v27 }
0x268e   : > { %v7678_v20 = vpop.xlane.xlu0 %7677 }
0x268f   : > { %v7682_v30 = vsub.f32 %v7666_v14, %v7678_v20  ;;  %11300 = vpow2.f32 %v7687_v17 }
0x2691   : > { %v7689_v32 = vmul.f32 1.442695, %v7682_v30 }
0x2693   : > { %11302 = vpow2.f32 %v7689_v32 }
0x2694   : > { %v11297_v0 = vpop.eup %11296 }
0x2695   : > { %v11299_v55 = vpop.eup %11298  ;;  %v7694_v35 = vsel %vm1072_vm2, %v11297_v0, 0.0 }
0x2696   : > { %7695 = vadd.xlane.f32.xlu1 %v7694_v35  ;;  %v7691_v56 = vsel %vm1072_vm2, %v11299_v55, 0.0 }
0x2697   : > { %7692 = vadd.xlane.f32.xlu0 %v7691_v56 }
0x2699   : > { %v11301_v36 = vpop.eup %11300 }
0x269a   : > { %v7697_v4 = vsel %vm1072_vm2, %v11301_v36, 0.0 }
0x269d   : > { %v11303_v47 = vpop.eup %11302 }
0x269e   : > { %v7700_v38 = vsel %vm1072_vm2, %v11303_v47, 0.0 }
0x26a7   : > { %11127 = vrot.lane.b32.xlu1 %v12434_v11, %s12851_s27 }
0x26ab   : > { %11132 = vrot.lane.b32.xlu1 %v12436_v16, %s12852_s1 }
0x26ad   : > { %11122 = vrot.lane.b32.xlu0 %v12431_v58, %s12851_s27  ;;  %s12853_s27 = smov 104  }
0x26af   : > { %11137 = vrot.lane.b32.xlu1 %v12442_v34, %s12852_s1 }
0x26cc   : > { %7698 = vadd.xlane.f32.xlu0 %v7697_v4 }
0x26d3   : > { %7701 = vadd.xlane.f32.xlu1 %v7700_v38 }
0x26e2   : > { %7824 = vrot.lane.b32.xlu0 %v12427_v7, %s12852_s1 }
0x26e4   : > { %7826 = vrot.lane.b32.xlu1 %v12448_v53, %s12852_s1 }
0x26e6   : > { %7828 = vrot.lane.b32.xlu0 %v12450_v15, %s12852_s1 }
0x26e8   : > { %7830 = vrot.lane.b32.xlu1 %v12456_v26, %s12852_s1 }
0x2723   : > { %v7696_v39 = vpop.xlane.xlu1 %7695 }
0x2724   : > { %v7693_v41 = vpop.xlane.xlu0 %7692 }
0x2725   : > { %11304 = vrcp.f32 %v7693_v41 }
0x2726   : > { %11306 = vrcp.f32 %v7696_v39 }
0x2727   : > { %v11128_v49 = vpop.permute.xlu1 %11127 }
0x2728   : > { %v11123_v19 = vpop.permute.xlu0 %11122  ;;  %v11130_v50 = vunpack.i.h.bf16 %v11128_v49  ;;  %v11129_v51 = vunpack.i.l.bf16 %v11128_v49 }
0x2729   : > { %v11125_v63 = vunpack.i.h.bf16 %v11123_v19  ;;  %v11124_v52 = vunpack.i.l.bf16 %v11123_v19 }
0x272a   : > { %v10860_v12 = vpack.c.bf16 %v11130_v50, %v11129_v51 }
0x272b   : > { %v10856_v5 = vpack.c.bf16 %v11125_v63, %v11124_v52  ;;  %v11133_v6 = vpop.permute.xlu1 %11132 }
0x272c   : > { %v11135_v59 = vunpack.i.h.bf16 %v11133_v6  ;;  %v11134_v25 = vunpack.i.l.bf16 %v11133_v6 }
0x272d   : > { %10857 = vmatprep.subr.bf16.mxu0 %v10856_v5 }
0x272e   : > { %10859 = vmatpush3.bf16.msra.mxu0 %v10856_v5  ;;  %v10864_v37 = vpack.c.bf16 %v11135_v59, %v11134_v25 }
0x272f   : > { %v11305_v46 = vpop.eup %11304  ;;  %10861 = vmatprep.subr.bf16.mxu0 %v10860_v12  ;;  %v11138_v14 = vpop.permute.xlu1 %11137 }
0x2730   : > { %v11307_v29 = vpop.eup %11306  ;;  %v7707_v48 = vmul.f32 %v11305_v46, %v11299_v55  ;;  %v11140_v9 = vunpack.i.h.bf16 %v11138_v14  ;;  %v11139_v33 = vunpack.i.l.bf16 %v11138_v14 }
0x2731   : > { %v7708_v8 = vmul.f32 %v11307_v29, %v11297_v0 }
0x2732   : > { %10863 = vmatpush3.bf16.msra.mxu0 %v10860_v12  ;;  %10485 = vmatprep.mubr.msk.f32.mxu0 %vm1072_vm2, %v7707_v48  ;;  %v10870_v18 = vpack.c.bf16 %v11140_v9, %v11139_v33 }
0x2733   : > { %10866 = vmatprep.subr.msk.bf16.mxu0 %vm12007_vm6, %v10864_v37 }
0x2735   : > { %10486 = vmatmul.mubr.msk.f32.vlgmr.msra.gmra.mrb[56].mxu0 %vm1072_vm2, %v7708_v8 }
0x273b   : > { %10869 = vmatpush3.bf16.xpose.msk.msra.mxu0 %vm12007_vm6, %v10864_v37 }
0x273c   : > { %10872 = vmatprep.subr.msk.bf16.mxu0 %vm12007_vm6, %v10870_v18 }
0x2743   : > { %10875 = vmatpush3.bf16.xpose.msk.msra.mxu0 %vm12007_vm6, %v10870_v18 }
0x2759   : > { %v7699_v1 = vpop.xlane.xlu0 %7698 }
0x275a   : > { %11308 = vrcp.f32 %v7699_v1 }
0x275d   : > { %v7825_v0 = vpop.permute.xlu0 %7824 }
0x2760   : > { %v7702_v10 = vpop.xlane.xlu1 %7701 }
0x2761   : > { %11310 = vrcp.f32 %v7702_v10  ;;  %v7829_v56 = vpop.permute.xlu0 %7828 }
0x2764   : > { %v11309_v3 = vpop.eup %11308  ;;  %v7827_v35 = vpop.permute.xlu1 %7826 }
0x2765   : > { %v7709_v54 = vmul.f32 %v11309_v3, %v11301_v36 }
0x2767   : > { %10488 = vmatprep.mubr.msk.f32.mxu0 %vm1072_vm2, %v7709_v54 }
0x2768   : > { %v7831_v2 = vpop.permute.xlu1 %7830 }
0x276b   : > { %v11311_v13 = vpop.eup %11310 }
0x276c   : > { %v7710_v55 = vmul.f32 %v11311_v13, %v11303_v47 }
0x276e   : > { %10489 = vmatmul.mubr.msk.f32.gmra.mrb[58].mxu0 %vm1072_vm2, %v7710_v55 }
0x276f   : > { %10499 = vmatprep.mubr.msk.f32.mxu0 %vm1192_vm5, %v7825_v0 }
0x2772   : > { %10500 = vmatmul.mubr.msk.f32.vlgmr.msra.gmra.mrb[60].mxu0 %vm1192_vm5, %v7827_v35 }
0x2773   : > { %10502 = vmatprep.mubr.msk.f32.mxu0 %vm1192_vm5, %v7829_v56 }
0x2776   : > { %10503 = vmatmul.mubr.msk.f32.gmra.mrb[62].mxu0 %vm1192_vm5, %v7831_v2 }
0x2808   : > { %v12564_v27 = vpop.f32.mrb[56].mxu0 }
0x2809   : > { %v12566_v17 = vpop.f32.mrb[57].mxu0 }
0x2841   : > { %v12568_v20 = vpop.f32.mrb[58].mxu0 }
0x2842   : > { %v12570_v30 = vpop.f32.mrb[59].mxu0 }
0x2845   : > { %v10501_v32 = vpop.f32.mrb[60].mxu0 }
0x2846   : > { %v7942_v36 = vmul.f32 0.35355338, %v10501_v32  ;;  %v7922_v4 = vpop.f32.mrb[61].mxu0 }
0x2847   : > { %v7941_v47 = vmul.f32 0.35355338, %v7922_v4 }
0x2848   : > { %v7946_v38 = vadd.f32 %v12461_v24, %v7942_v36 }
0x2849   : > { %v7945_v39 = vadd.f32 %v12465_v31, %v7941_v47  ;;  %v10504_v41 = vpop.f32.mrb[62].mxu0 }
0x284a   : > { %v7932_v49 = vpop.f32.mrb[63].mxu0  ;;  %v7952_v19 = vsel %vm1072_vm2, %v7946_v38, -inf  ;;  %v7944_v50 = vmul.f32 0.35355338, %v10504_v41 }
0x284b   : > { %v7943_v51 = vmul.f32 0.35355338, %v7932_v49  ;;  %7953 = vmax.xlane.f32.xlu1 %v7952_v19  ;;  %v7949_v63 = vsel %vm1072_vm2, %v7945_v39, -inf }
0x284c   : > { %7950 = vmax.xlane.f32.xlu0 %v7949_v63  ;;  %v7948_v5 = vadd.f32 %v12471_v44, %v7944_v50 }
0x284d   : > { %v7947_v52 = vadd.f32 %v12475_v28, %v7943_v51 }
0x284e   : > { %v7958_v12 = vsel %vm1072_vm2, %v7948_v5, -inf }
0x284f   : > { %v7955_v6 = vsel %vm1072_vm2, %v7947_v52, -inf }
0x2850   : > { %7956 = vmax.xlane.f32.xlu0 %v7955_v6 }
0x2854   : > { %7959 = vmax.xlane.f32.xlu0 %v7958_v12 }
0x28d8   : > { %v7954_v59 = vpop.xlane.xlu1 %7953 }
0x28d9   : > { %v7962_v25 = vsub.f32 %v7946_v38, %v7954_v59  ;;  %v7951_v46 = vpop.xlane.xlu0 %7950 }
0x28da   : > { %v7961_v29 = vsub.f32 %v7945_v39, %v7951_v46 }
0x28db   : > { %v7967_v48 = vmul.f32 1.442695, %v7962_v25 }
0x28dc   : > { %v7965_v37 = vmul.f32 1.442695, %v7961_v29 }
0x28dd   : > { %11312 = vpow2.f32 %v7967_v48  ;;  %v7957_v18 = vpop.xlane.xlu0 %7956 }
0x28de   : > { %11314 = vpow2.f32 %v7965_v37  ;;  %v7963_v1 = vsub.f32 %v7947_v52, %v7957_v18 }
0x28e0   : > { %v7969_v10 = vmul.f32 1.442695, %v7963_v1 }
0x28e1   : > { %v7960_v3 = vpop.xlane.xlu0 %7959 }
0x28e2   : > { %v7964_v54 = vsub.f32 %v7948_v5, %v7960_v3  ;;  %11316 = vpow2.f32 %v7969_v10 }
0x28e4   : > { %v7971_v13 = vmul.f32 1.442695, %v7964_v54 }
0x28e6   : > { %11318 = vpow2.f32 %v7971_v13 }
0x28e7   : > { %v11313_v8 = vpop.eup %11312 }
0x28e8   : > { %v11315_v14 = vpop.eup %11314  ;;  %v7976_v9 = vsel %vm1072_vm2, %v11313_v8, 0.0 }
0x28e9   : > { %7977 = vadd.xlane.f32.xlu1 %v7976_v9  ;;  %v7973_v33 = vsel %vm1072_vm2, %v11315_v14, 0.0 }
0x28ea   : > { %7974 = vadd.xlane.f32.xlu0 %v7973_v33 }
0x28ec   : > { %v11317_v0 = vpop.eup %11316 }
0x28ed   : > { %v7979_v55 = vsel %vm1072_vm2, %v11317_v0, 0.0 }
0x28f0   : > { %v11319_v35 = vpop.eup %11318 }
0x28fa   : > { %11147 = vrot.lane.b32.xlu1 %v12434_v11, %s12852_s1 }
0x28fe   : > { %11152 = vrot.lane.b32.xlu1 %v12436_v16, %s12853_s27  ;;  %v7982_v16 = vsel %vm1072_vm2, %v11319_v35, 0.0 }
0x2900   : > { %11142 = vrot.lane.b32.xlu0 %v12431_v58, %s12852_s1  ;;  %s12854_s1 = smov 8  }
0x2902   : > { %11157 = vrot.lane.b32.xlu1 %v12442_v34, %s12853_s27 }
0x291f   : > { %7980 = vadd.xlane.f32.xlu0 %v7979_v55 }
0x2926   : > { %7983 = vadd.xlane.f32.xlu1 %v7982_v16 }
0x2935   : > { %8102 = vrot.lane.b32.xlu0 %v12427_v7, %s12853_s27 }
0x2937   : > { %8104 = vrot.lane.b32.xlu1 %v12448_v53, %s12853_s27 }
0x2939   : > { %8106 = vrot.lane.b32.xlu0 %v12450_v15, %s12853_s27 }
0x293b   : > { %8108 = vrot.lane.b32.xlu1 %v12456_v26, %s12853_s27 }
0x2976   : > { %v7978_v34 = vpop.xlane.xlu1 %7977 }
0x2977   : > { %v7975_v56 = vpop.xlane.xlu0 %7974 }
0x2978   : > { %11320 = vrcp.f32 %v7975_v56 }
0x2979   : > { %11322 = vrcp.f32 %v7978_v34 }
0x297a   : > { %v11148_v2 = vpop.permute.xlu1 %11147 }
0x297b   : > { %v11143_v32 = vpop.permute.xlu0 %11142  ;;  %v11150_v36 = vunpack.i.h.bf16 %v11148_v2  ;;  %v11149_v4 = vunpack.i.l.bf16 %v11148_v2 }
0x297c   : > { %v11145_v47 = vunpack.i.h.bf16 %v11143_v32  ;;  %v11144_v38 = vunpack.i.l.bf16 %v11143_v32 }
0x297d   : > { %v10880_v41 = vpack.c.bf16 %v11150_v36, %v11149_v4 }
0x297e   : > { %v10876_v7 = vpack.c.bf16 %v11145_v47, %v11144_v38  ;;  %v11153_v39 = vpop.permute.xlu1 %11152 }
0x297f   : > { %v11155_v53 = vunpack.i.h.bf16 %v11153_v39  ;;  %v11154_v49 = vunpack.i.l.bf16 %v11153_v39 }
0x2980   : > { %10877 = vmatprep.subr.bf16.mxu1 %v10876_v7 }
0x2981   : > { %10879 = vmatpush3.bf16.msra.mxu1 %v10876_v7  ;;  %v10884_v50 = vpack.c.bf16 %v11155_v53, %v11154_v49 }
0x2982   : > { %v11321_v15 = vpop.eup %11320  ;;  %10881 = vmatprep.subr.bf16.mxu1 %v10880_v41  ;;  %v11158_v63 = vpop.permute.xlu1 %11157 }
0x2983   : > { %v11323_v26 = vpop.eup %11322  ;;  %v7989_v19 = vmul.f32 %v11321_v15, %v11315_v14  ;;  %v11160_v52 = vunpack.i.h.bf16 %v11158_v63  ;;  %v11159_v5 = vunpack.i.l.bf16 %v11158_v63 }
0x2984   : > { %v7990_v51 = vmul.f32 %v11323_v26, %v11313_v8 }
0x2985   : > { %10883 = vmatpush3.bf16.msra.mxu1 %v10880_v41  ;;  %10513 = vmatprep.mubr.msk.f32.mxu1 %vm1072_vm2, %v7989_v19  ;;  %v10890_v6 = vpack.c.bf16 %v11160_v52, %v11159_v5 }
0x2986   : > { %10886 = vmatprep.subr.msk.bf16.mxu1 %vm12007_vm6, %v10884_v50 }
0x2988   : > { %10514 = vmatmul.mubr.msk.f32.vlgmr.msra.gmra.mrb[60].mxu1 %vm1072_vm2, %v7990_v51 }
0x298e   : > { %10889 = vmatpush3.bf16.xpose.msk.msra.mxu1 %vm12007_vm6, %v10884_v50 }
0x298f   : > { %10892 = vmatprep.subr.msk.bf16.mxu1 %vm12007_vm6, %v10890_v6 }
0x2996   : > { %10895 = vmatpush3.bf16.xpose.msk.msra.mxu1 %vm12007_vm6, %v10890_v6 }
0x29ac   : > { %v7981_v12 = vpop.xlane.xlu0 %7980 }
0x29ad   : > { %11324 = vrcp.f32 %v7981_v12 }
0x29b0   : > { %v8103_v48 = vpop.permute.xlu0 %8102 }
0x29b3   : > { %v7984_v59 = vpop.xlane.xlu1 %7983 }
0x29b4   : > { %11326 = vrcp.f32 %v7984_v59  ;;  %v8107_v14 = vpop.permute.xlu0 %8106 }
0x29b7   : > { %v11325_v25 = vpop.eup %11324  ;;  %v8105_v8 = vpop.permute.xlu1 %8104 }
0x29b8   : > { %v7991_v46 = vmul.f32 %v11325_v25, %v11317_v0 }
0x29ba   : > { %10516 = vmatprep.mubr.msk.f32.mxu1 %vm1072_vm2, %v7991_v46 }
0x29bb   : > { %v8109_v57 = vpop.permute.xlu1 %8108 }
0x29be   : > { %v11327_v29 = vpop.eup %11326 }
0x29bf   : > { %v7992_v37 = vmul.f32 %v11327_v29, %v11319_v35 }
0x29c1   : > { %10517 = vmatmul.mubr.msk.f32.gmra.mrb[62].mxu1 %vm1072_vm2, %v7992_v37 }
0x29c2   : > { %10527 = vmatprep.mubr.msk.f32.mxu1 %vm1192_vm5, %v8103_v48 }
0x29c5   : > { %10528 = vmatmul.mubr.msk.f32.vlgmr.msra.gmra.mrb[64].mxu1 %vm1192_vm5, %v8105_v8 }
0x29c6   : > { %10530 = vmatprep.mubr.msk.f32.mxu1 %vm1192_vm5, %v8107_v14 }
0x29c9   : > { %10531 = vmatmul.mubr.msk.f32.gmra.mrb[66].mxu1 %vm1192_vm5, %v8109_v57 }
0x2a5b   : > { %v10515_v9 = vpop.f32.mrb[60].mxu1 }
0x2a5c   : > { %v8083_v33 = vpop.f32.mrb[61].mxu1 }
0x2a94   : > { %v12616_v18 = vpop.f32.mrb[62].mxu1 }
0x2a95   : > { %v12618_v1 = vpop.f32.mrb[63].mxu1 }
0x2a98   : > { %v10529_v10 = vpop.f32.mrb[64].mxu1 }
0x2a99   : > { %v8220_v3 = vmul.f32 0.35355338, %v10529_v10  ;;  %v8200_v54 = vpop.f32.mrb[65].mxu1 }
0x2a9a   : > { %v8219_v13 = vmul.f32 0.35355338, %v8200_v54 }
0x2a9b   : > { %v8224_v0 = vadd.f32 %v12461_v24, %v8220_v3 }
0x2a9c   : > { %v8223_v55 = vadd.f32 %v12465_v31, %v8219_v13  ;;  %v10532_v35 = vpop.f32.mrb[66].mxu1  ;;  %v9494_v13 = vld [vmem:[%s12842_s23 + $0x20] sm:$0xff] }
0x2a9d   : > { %v8210_v16 = vpop.f32.mrb[67].mxu1  ;;  %v8230_v34 = vsel %vm1072_vm2, %v8224_v0, -inf  ;;  %v8222_v26 = vmul.f32 0.35355338, %v10532_v35 }
0x2a9e   : > { %8231 = vmax.xlane.f32.xlu1 %v8230_v34  ;;  %v8227_v56 = vsel %vm1072_vm2, %v8223_v55, -inf  ;;  %v8221_v2 = vmul.f32 0.35355338, %v8210_v16  ;;  %v9497_v16 = vld [vmem:[%s12842_s23 + $0x38] sm:$0xff] }
0x2a9f   : > { %8228 = vmax.xlane.f32.xlu0 %v8227_v56  ;;  %v8226_v19 = vadd.f32 %v12471_v44, %v8222_v26  ;;  %v12666_v26 = vld [vmem:[%s12843_s2 + $0x1] ss:$0 sm:$0xff] }
0x2aa0   : > { %v8225_v32 = vadd.f32 %v12475_v28, %v8221_v2 }
0x2aa1   : > { %v8236_v50 = vsel %vm1072_vm2, %v8226_v19, -inf }
0x2aa2   : > { %v8233_v36 = vsel %vm1072_vm2, %v8225_v32, -inf }
0x2aaf   : > { %11167 = vrot.lane.b32.xlu1 %v12434_v11, %s12853_s27 }
0x2ad3   : > { %8234 = vmax.xlane.f32.xlu1 %v8233_v36 }
0x2ae4   : > { %8386 = vrot.lane.b32.xlu1 %v12564_v27, %s12854_s1 }
0x2ae8   : > { %8400 = vrot.lane.b32.xlu1 %v8083_v33, %s12855_s3 }
0x2aec   : > { %8402 = vrot.lane.b32.xlu1 %v10515_v9, %s12855_s3 }
0x2b2b   : > { %v8232_v24 = vpop.xlane.xlu1 %8231 }
0x2b2c   : > { %v8240_v31 = vsub.f32 %v8224_v0, %v8232_v24  ;;  %v8229_v4 = vpop.xlane.xlu0 %8228  ;;  %v9495_v0 = vld [vmem:[%s12842_s23 + $0x28] sm:$0xff] }
0x2b2d   : > { %v8239_v47 = vsub.f32 %v8223_v55, %v8229_v4  ;;  %v9496_v55 = vld [vmem:[%s12842_s23 + $0x30] sm:$0xff]  ;;  %v10904_v35 = vpack.c.bf16 %v9495_v0, %v9494_v13 }
0x2b2e   : > { %v8245_v38 = vmul.f32 1.442695, %v8240_v31  ;;  %v10908_v34 = vpack.c.bf16 %v9497_v16, %v9496_v55 }
0x2b2f   : > { %v8243_v7 = vmul.f32 1.442695, %v8239_v47  ;;  %v11168_v27 = vpop.permute.xlu1 %11167 }
0x2b30   : > { %11328 = vpow2.f32 %v8245_v38  ;;  %v11170_v12 = vunpack.i.h.bf16 %v11168_v27  ;;  %v11169_v44 = vunpack.i.l.bf16 %v11168_v27 }
0x2b31   : > { %11330 = vpow2.f32 %v8243_v7 }
0x2b32   : > { %v10900_v29 = vpack.c.bf16 %v11170_v12, %v11169_v44 }
0x2b3a   : > { %v11329_v11 = vpop.eup %11328 }
0x2b3b   : > { %v8254_v28 = vsel %vm1072_vm2, %v11329_v11, 0.0  ;;  %v11331_v39 = vpop.eup %11330 }
0x2b3c   : > { %8255 = vadd.xlane.f32.xlu0 %v8254_v28  ;;  %v8251_v41 = vsel %vm1072_vm2, %v11331_v39, 0.0 }
0x2b40   : > { %8252 = vadd.xlane.f32.xlu0 %v8251_v41 }
0x2b56   : > { %11162 = vrot.lane.b32.xlu0 %v12431_v58, %s12853_s27  ;;  %s12856_s27 = smov 24  }
0x2b60   : > { %v8235_v53 = vpop.xlane.xlu1 %8234 }
0x2b61   : > { %v8241_v51 = vsub.f32 %v8225_v32, %v8235_v53 }
0x2b63   : > { %v8247_v63 = vmul.f32 1.442695, %v8241_v51 }
0x2b64   : > { %v8387_v49 = vpop.permute.xlu1 %8386 }
0x2b65   : > { %v12638_v15 = vsel %vm1192_vm5, %v12512_v23, %v8387_v49  ;;  %11332 = vpow2.f32 %v8247_v63 }
0x2b6f   : > { %v11333_v58 = vpop.eup %11332 }
0x2b70   : > { %v8257_v52 = vsel %vm1072_vm2, %v11333_v58, 0.0 }
0x2b75   : > { %8237 = vmax.xlane.f32.xlu0 %v8236_v50 }
0x2b8b   : > { %8384 = vrot.lane.b32.xlu0 %v12566_v17, %s12854_s1 }
0x2baa   : > { %8258 = vadd.xlane.f32.xlu0 %v8257_v52 }
0x2bc9   : > { %v8256_v5 = vpop.xlane.xlu0 %8255 }
0x2bcd   : > { %v8253_v6 = vpop.xlane.xlu0 %8252 }
0x2bce   : > { %11334 = vrcp.f32 %v8253_v6 }
0x2bcf   : > { %11336 = vrcp.f32 %v8256_v5 }
0x2bd1   : > { %v11163_v23 = vpop.permute.xlu0 %11162 }
0x2bd2   : > { %v11165_v59 = vunpack.i.h.bf16 %v11163_v23  ;;  %v11164_v25 = vunpack.i.l.bf16 %v11163_v23 }
0x2bd4   : > { %v10896_v46 = vpack.c.bf16 %v11165_v59, %v11164_v25 }
0x2bd6   : > { %10897 = vmatprep.subr.bf16.mxu0 %v10896_v46 }
0x2bd7   : > { %10899 = vmatpush3.bf16.msra.mxu0 %v10896_v46  ;;  %v9509_v46 = vld [vmem:[%s12844_s0 + $0x28] sm:$0xff] }
0x2bd8   : > { %v11335_v17 = vpop.eup %11334  ;;  %10901 = vmatprep.subr.bf16.mxu0 %v10900_v29 }
0x2bd9   : > { %v11337_v48 = vpop.eup %11336  ;;  %v8267_v37 = vmul.f32 %v11335_v17, %v11331_v39  ;;  %v9510_v17 = vld [vmem:[%s12844_s0 + $0x30] sm:$0xff] }
0x2bda   : > { %v8268_v8 = vmul.f32 %v11337_v48, %v11329_v11  ;;  %v9511_v48 = vld [vmem:[%s12844_s0 + $0x38] sm:$0xff] }
0x2bdb   : > { %10903 = vmatpush3.bf16.msra.mxu0 %v10900_v29  ;;  %10541 = vmatprep.mubr.msk.f32.mxu0 %vm1072_vm2, %v8267_v37  ;;  %v10916_v37 = vpack.c.bf16 %v9511_v48, %v9510_v17 }
0x2bdc   : > { %10905 = vmatprep.subr.bf16.mxu0 %v10904_v35 }
0x2bde   : > { %10542 = vmatmul.mubr.msk.f32.vlgmr.msra.gmra.mrb[64].mxu0 %vm1072_vm2, %v8268_v8 }
0x2bdf   : > { %10907 = vmatpush3.bf16.msra.mxu0 %v10904_v35 }
0x2be0   : > { %10909 = vmatprep.subr.bf16.mxu0 %v10908_v34 }
0x2be3   : > { %10911 = vmatpush3.bf16.msra.mxu0 %v10908_v34 }
0x2c02   : > { %v8238_v14 = vpop.xlane.xlu0 %8237 }
0x2c03   : > { %v8242_v57 = vsub.f32 %v8226_v19, %v8238_v14 }
0x2c05   : > { %v8249_v9 = vmul.f32 1.442695, %v8242_v57 }
0x2c06   : > { %v8385_v33 = vpop.permute.xlu0 %8384 }
0x2c07   : > { %11338 = vpow2.f32 %v8249_v9  ;;  %v8428_v10 = vsel %vm1192_vm5, %v12514_v60, %v8385_v33  ;;  %v8401_v60 = vpop.permute.xlu1 %8400 }
0x2c08   : > { %v8432_v28 = vsel %vm984_vm0, %v8428_v10, %v8401_v60 }
0x2c0b   : > { %v8403_v36 = vpop.permute.xlu1 %8402 }
0x2c0c   : > { %v8433_v39 = vsel %vm984_vm0, %v12638_v15, %v8403_v36  ;;  %v12704_v36 = vld [vmem:[%s12846_s22 + $0x1] ss:$0 sm:$0xff] }
0x2c11   : > { %v11339_v3 = vpop.eup %11338 }
0x2c12   : > { %v8260_v54 = vsel %vm1072_vm2, %v11339_v3, 0.0 }
0x2c13   : > { %8261 = vadd.xlane.f32.xlu1 %v8260_v54 }
0x2c37   : > { %v8259_v56 = vpop.xlane.xlu0 %8258 }
0x2c38   : > { %11340 = vrcp.f32 %v8259_v56 }
0x2c42   : > { %v11341_v2 = vpop.eup %11340 }
0x2c43   : > { %v8269_v32 = vmul.f32 %v11341_v2, %v11333_v58 }
0x2c45   : > { %10544 = vmatprep.mubr.msk.f32.mxu0 %vm1072_vm2, %v8269_v32 }
0x2ca0   : > { %v8262_v24 = vpop.xlane.xlu1 %8261 }
0x2ca1   : > { %11342 = vrcp.f32 %v8262_v24 }
0x2cab   : > { %v11343_v31 = vpop.eup %11342 }
0x2cac   : > { %v8270_v4 = vmul.f32 %v11343_v31, %v11339_v3 }
0x2cae   : > { %10545 = vmatmul.mubr.msk.f32.gmra.mrb[66].mxu0 %vm1072_vm2, %v8270_v4 }
0x2cb1   : > { %v10543_v47 = vpop.f32.mrb[64].mxu0 }
0x2cb2   : > { %v8361_v38 = vpop.f32.mrb[65].mxu0  ;;  %8418 = vrot.lane.b32.xlu1 %v10543_v47, %s12856_s27 }
0x2cb3   : > { %8416 = vrot.lane.b32.xlu0 %v8361_v38, %s12856_s27 }
0x2d24   : > { %v8419_v7 = vpop.permute.xlu1 %8418 }
0x2d25   : > { %v8417_v11 = vpop.permute.xlu0 %8416  ;;  %v8437_v27 = vsel %vm6380_vm7, %v8433_v39, %v8419_v7 }
0x2d26   : > { %v8436_v41 = vsel %vm6380_vm7, %v8432_v28, %v8417_v11  ;;  %v9518_v11 = vld [vmem:[%s12847_s18 + $0x40] sm:$0xff]  ;;  %v9519_v28 = vld [vmem:[%s12847_s18 + $0x48] sm:$0xff] }
0x2d27   : > { %10555 = vmatprep.mubr.msk.f32.mxu0 %vm1072_vm2, %v8436_v41  ;;  %v10920_v39 = vpack.c.bf16 %v9519_v28, %v9518_v11  ;;  %v9520_v41 = vld [vmem:[%s12847_s18 + $0x50] sm:$0xff] }
0x2d28   : > { %10556 = vmatmul.mubr.msk.f32.vlgmr.msra.gmra.mrb[68].mxu0 %vm1072_vm2, %v8437_v27  ;;  %v9521_v27 = vld [vmem:[%s12847_s18 + $0x58] sm:$0xff] }
0x2d29   : > { %10921 = vmatprep.subr.bf16.mxu0 %v10920_v39 }
0x2d2a   : > { %10923 = vmatpush3.bf16.msra.mxu0 %v10920_v39 }
0x2d81   : > { %v10546_v53 = vpop.f32.mrb[66].mxu0 }
0x2d82   : > { %v8371_v49 = vpop.f32.mrb[67].mxu0 }
0x2dfb   : > { %v10557_v19 = vpop.f32.mrb[68].mxu0 }
0x2dfc   : > { %v8537_v50 = vadd.f32 %v10557_v19, %v12666_v26  ;;  %v8531_v51 = vpop.f32.mrb[69].mxu0  ;;  %v9523_v19 = vld [vmem:[%s12847_s18 + $0x68] sm:$0xff] }
0x2dfd   : > { %v8532_v63 = vadd.f32 %v12666_v26, %v8531_v51  ;;  %v9524_v51 = vld [vmem:[%s12847_s18 + $0x70] sm:$0xff] }
0x2dfe   : > { %v8551_v15 = vadd.f32 %v8537_v50, %v12393_v40 }
0x2dff   : > { %v8550_v58 = vadd.f32 %v8532_v63, %v12391_v45  ;;  %v9525_v63 = vld [vmem:[%s12847_s18 + $0x78] sm:$0xff] }
0x2e00   : > { %v8561_v52 = vsel %vm1072_vm2, %v8551_v15, 0.0 }
0x2e01   : > { %8562 = vadd.xlane.f32.xlu1 %v8561_v52  ;;  %v8558_v5 = vsel %vm1072_vm2, %v8550_v58, 0.0 }
0x2e02   : > { %8559 = vadd.xlane.f32.xlu0 %v8558_v5 }
0x2e12   : > { %8390 = vrot.lane.b32.xlu1 %v12568_v20, %s12854_s1 }
0x2e16   : > { %8404 = vrot.lane.b32.xlu1 %v12618_v1, %s12855_s3 }
0x2e1a   : > { %8406 = vrot.lane.b32.xlu1 %v12616_v18, %s12855_s3  ;;  %v9508_v18 = vld [vmem:[%s12844_s0 + $0x20] sm:$0xff]  ;;  %s972_s3 = scalar_lea.vmem %s11582_s4, %s12860_s10 }
0x2e1b   : > { %v10912_v29 = vpack.c.bf16 %v9509_v46, %v9508_v18 }
0x2e1d   : > { %10913 = vmatprep.subr.bf16.mxu1 %v10912_v29 }
0x2e1e   : > { %8422 = vrot.lane.b32.xlu1 %v10546_v53, %s12856_s27  ;;  %10915 = vmatpush3.bf16.msra.mxu1 %v10912_v29  ;;  %v10924_v53 = vpack.c.bf16 %v9521_v27, %v9520_v41 }
0x2e1f   : > { %10917 = vmatprep.subr.bf16.mxu1 %v10916_v37 }
0x2e20   : > { %10925 = vmatprep.subr.bf16.mxu0 %v10924_v53 }
0x2e21   : > { %10927 = vmatpush3.bf16.msra.mxu0 %v10924_v53 }
0x2e22   : > { %10919 = vmatpush3.bf16.msra.mxu1 %v10916_v37 }
0x2e8e   : > { %v8563_v45 = vpop.xlane.xlu1 %8562 }
0x2e8f   : > { %v8571_v40 = vmul.f32 0.03125, %v8563_v45  ;;  %v8560_v6 = vpop.xlane.xlu0 %8559 }
0x2e90   : > { %v8570_v23 = vmul.f32 0.03125, %v8560_v6 }
0x2e91   : > { %v8575_v12 = vsub.f32 %v8551_v15, %v8571_v40  ;;  %v10932_v15 = vpack.c.bf16 %v9525_v63, %v9524_v51 }
0x2e92   : > { %v8574_v44 = vsub.f32 %v8550_v58, %v8570_v23  ;;  %v8391_v8 = vpop.permute.xlu1 %8390 }
0x2e93   : > { %v8579_v25 = vmul.f32 %v8575_v12, %v8575_v12  ;;  %v8431_v35 = vsel %vm1192_vm5, %v12516_v42, %v8391_v8 }
0x2e94   : > { %v8578_v59 = vmul.f32 %v8574_v44, %v8574_v44 }
0x2e95   : > { %v8585_v1 = vsel %vm1072_vm2, %v8579_v25, 0.0 }
0x2e96   : > { %v8582_v20 = vsel %vm1072_vm2, %v8578_v59, 0.0  ;;  %v8405_v14 = vpop.permute.xlu1 %8404 }
0x2e97   : > { %8583 = vadd.xlane.f32.xlu0 %v8582_v20 }
0x2e9a   : > { %v8407_v3 = vpop.permute.xlu1 %8406 }
0x2e9b   : > { %8586 = vadd.xlane.f32.xlu0 %v8585_v1  ;;  %v8435_v56 = vsel %vm984_vm0, %v8431_v35, %v8407_v3 }
0x2e9e   : > { %v8423_v55 = vpop.permute.xlu1 %8422 }
0x2e9f   : > { %v8439_v32 = vsel %vm6380_vm7, %v8435_v56, %v8423_v55 }
0x2eb1   : > { %8388 = vrot.lane.b32.xlu0 %v12570_v30, %s12854_s1 }
0x2eb5   : > { %8420 = vrot.lane.b32.xlu0 %v8371_v49, %s12856_s27  ;;  %v9522_v49 = vld [vmem:[%s12847_s18 + $0x60] sm:$0xff] }
0x2eb6   : > { %v10928_v50 = vpack.c.bf16 %v9523_v19, %v9522_v49 }
0x2eb8   : > { %10929 = vmatprep.subr.bf16.mxu0 %v10928_v50 }
0x2eb9   : > { %10931 = vmatpush3.bf16.msra.mxu0 %v10928_v50 }
0x2eba   : > { %10933 = vmatprep.subr.bf16.mxu0 %v10932_v15 }
0x2ebd   : > { %10935 = vmatpush3.bf16.msra.mxu0 %v10932_v15 }
0x2f24   : > { %v8584_v57 = vpop.xlane.xlu0 %8583 }
0x2f25   : > { %v8594_v9 = vmul.f32 0.03125, %v8584_v57 }
0x2f27   : > { %v8598_v33 = vadd.f32 1e-12, %v8594_v9 }
0x2f28   : > { %v8587_v10 = vpop.xlane.xlu0 %8586 }
0x2f29   : > { %11344 = vrsqrt.f32 %v8598_v33  ;;  %v8595_v30 = vmul.f32 0.03125, %v8587_v10 }
0x2f2b   : > { %v8599_v54 = vadd.f32 1e-12, %v8595_v30 }
0x2f2c   : > { %v8389_v13 = vpop.permute.xlu0 %8388 }
0x2f2d   : > { %11346 = vrsqrt.f32 %v8599_v54  ;;  %v8430_v0 = vsel %vm1192_vm5, %v12518_v22, %v8389_v13  ;;  %v12701_v22 = vld [vmem:[%s12845_s26 + $0x1] ss:$0 sm:$0xff] }
0x2f2e   : > { %v8434_v16 = vsel %vm984_vm0, %v8430_v0, %v8405_v14 }
0x2f30   : > { %v8421_v34 = vpop.permute.xlu0 %8420 }
0x2f31   : > { %v8438_v2 = vsel %vm6380_vm7, %v8434_v16, %v8421_v34 }
0x2f32   : > { %10558 = vmatprep.mubr.msk.f32.mxu0 %vm1072_vm2, %v8438_v2 }
0x2f33   : > { %v11345_v60 = vpop.eup %11344  ;;  %10559 = vmatmul.mubr.msk.f32.gmra.mrb[70].mxu0 %vm1072_vm2, %v8439_v32 }
0x2f34   : > { %v8606_v42 = vmul.f32 %v11345_v60, %v8574_v44  ;;  %v12739_v44 = vld [vmem:[%s12848_s16 + $0x1] ss:$0 sm:$0xff] }
0x2f36   : > { %v8616_v24 = vmul.f32 %v12701_v22, %v8606_v42 }
0x2f37   : > { %v11347_v31 = vpop.eup %11346 }
0x2f38   : > { %v8607_v4 = vmul.f32 %v11347_v31, %v8575_v12  ;;  %v12708_v47 = vadd.f32 %v12704_v36, %v8616_v24 }
0x2f3a   : > { %v8617_v38 = vmul.f32 %v12701_v22, %v8607_v4  ;;  %10569 = vmatprep.mubr.msk.f32.mxu1 %vm1072_vm2, %v12708_v47 }
0x2f3c   : > { %v12714_v7 = vadd.f32 %v12704_v36, %v8617_v38 }
0x2f3e   : > { %10570 = vmatmul.mubr.msk.f32.vlgmr.msra.gmra.mrb[68].mxu1 %vm1072_vm2, %v12714_v7 }
0x3006   : > { %v10560_v58 = vpop.f32.mrb[70].mxu0 }
0x3007   : > { %v8547_v52 = vadd.f32 %v10560_v58, %v12666_v26  ;;  %v8541_v5 = vpop.f32.mrb[71].mxu0 }
0x3008   : > { %v8542_v45 = vadd.f32 %v12666_v26, %v8541_v5 }
0x3009   : > { %v12729_v40 = vadd.f32 %v8547_v52, %v12407_v62 }
0x300a   : > { %v12732_v6 = vadd.f32 %v8542_v45, %v12405_v61 }
0x300b   : > { %v8567_v23 = vsel %vm1072_vm2, %v12729_v40, 0.0 }
0x300c   : > { %8568 = vadd.xlane.f32.xlu1 %v8567_v23  ;;  %v8564_v12 = vsel %vm1072_vm2, %v12732_v6, 0.0 }
0x300d   : > { %8565 = vadd.xlane.f32.xlu0 %v8564_v12 }
0x3011   : > { %v10571_v59 = vpop.f32.mrb[68].mxu1 }
0x3012   : > { %v8727_v20 = vadd.f32 %v10571_v59, %v12739_v44  ;;  %v8721_v26 = vpop.f32.mrb[69].mxu1 }
0x3013   : > { %v8722_v62 = vadd.f32 %v12739_v44, %v8721_v26 }
0x3014   : > { %v8745_v25 = vmul.f32 0.70710677, %v8727_v20  ;;  %v8741_v5 = vmul.f32 0.5, %v8727_v20 }
0x3015   : > { %v8744_v1 = vmul.f32 0.70710677, %v8722_v62  ;;  %v8740_v58 = vmul.f32 0.5, %v8722_v62 }
0x3016   : > { %v8757_v61 = vand.u32 2147483647, %v8745_v25  ;;  %vm8749_vm0 = vcmp.ge.f32.partialorder %v8745_v25, 0.0 }
0x3017   : > { %v8756_v18 = vand.u32 2147483647, %v8744_v1  ;;  %vm8748_vm5 = vcmp.ge.f32.partialorder %v8744_v1, 0.0  ;;  %v8753_v49 = vsel %vm8749_vm0, 1.0, %v11428_v21 }
0x3018   : > { %v8761_v46 = vmul.f32 0.3275911, %v8757_v61  ;;  %v8813_v37 = vsub.f32 0.0, %v8757_v61  ;;  %v8752_v51 = vsel %vm8748_vm5, 1.0, %v11428_v21 }
0x3019   : > { %v8760_v29 = vmul.f32 0.3275911, %v8756_v18  ;;  %v8812_v8 = vsub.f32 0.0, %v8756_v18 }
0x301a   : > { %v8765_v17 = vadd.f32 1.0, %v8761_v46  ;;  %v8817_v57 = vmul.f32 %v8813_v37, %v8757_v61 }
0x301b   : > { %v8764_v48 = vadd.f32 1.0, %v8760_v29  ;;  %v8816_v10 = vmul.f32 %v8812_v8, %v8756_v18  ;;  %v9527_v29 = vld [vmem:[%s12849_s15 + $0x1] ss:$0 sm:$0xff] }
0x301c   : > { %11348 = vrcp.f32 %v8765_v17  ;;  %v8822_v54 = vmul.f32 1.442695, %v8817_v57 }
0x301d   : > { %11350 = vrcp.f32 %v8764_v48  ;;  %v8820_v55 = vmul.f32 1.442695, %v8816_v10 }
0x301e   : > { %11352 = vpow2.f32 %v8822_v54 }
0x301f   : > { %11354 = vpow2.f32 %v8820_v55 }
0x3026   : > { %v11349_v14 = vpop.eup %11348 }
0x3027   : > { %v11351_v9 = vpop.eup %11350  ;;  %v8777_v33 = vmul.f32 1.0614054, %v11349_v14 }
0x3028   : > { %v8776_v3 = vmul.f32 1.0614054, %v11351_v9  ;;  %v11353_v11 = vpop.eup %11352 }
0x3029   : > { %v8781_v30 = vadd.f32 -1.4531521, %v8777_v33  ;;  %v11355_v39 = vpop.eup %11354 }
0x302a   : > { %v8780_v13 = vadd.f32 -1.4531521, %v8776_v3 }
0x302b   : > { %v8785_v0 = vmul.f32 %v11349_v14, %v8781_v30 }
0x302c   : > { %v8784_v35 = vmul.f32 %v11351_v9, %v8780_v13 }
0x302d   : > { %v8789_v16 = vadd.f32 1.4214138, %v8785_v0 }
0x302e   : > { %v8788_v34 = vadd.f32 1.4214138, %v8784_v35 }
0x302f   : > { %v8793_v56 = vmul.f32 %v11349_v14, %v8789_v16 }
0x3030   : > { %v8792_v2 = vmul.f32 %v11351_v9, %v8788_v34 }
0x3031   : > { %v8797_v32 = vadd.f32 -0.28449672, %v8793_v56 }
0x3032   : > { %v8796_v60 = vadd.f32 -0.28449672, %v8792_v2 }
0x3033   : > { %v8801_v42 = vmul.f32 %v11349_v14, %v8797_v32 }
0x3034   : > { %v8800_v24 = vmul.f32 %v11351_v9, %v8796_v60 }
0x3035   : > { %v8805_v31 = vadd.f32 0.2548296, %v8801_v42 }
0x3036   : > { %v8804_v4 = vadd.f32 0.2548296, %v8800_v24 }
0x3037   : > { %v8809_v38 = vmul.f32 %v11349_v14, %v8805_v31 }
0x3038   : > { %v8808_v28 = vmul.f32 %v11351_v9, %v8804_v4 }
0x3039   : > { %v8829_v41 = vmul.f32 %v11353_v11, %v8809_v38  ;;  %v9009_v38 = vld [vmem:[#allocation5] sm:$0x1]  ;;  %v11430_v11 = vmov 0  }
0x303a   : > { %v8828_v27 = vmul.f32 %v11355_v39, %v8808_v28  ;;  %11171 = vset.pattern.permute.xlu0 %v11430_v11 }
0x303b   : > { %v8833_v53 = vsub.f32 1.0, %v8829_v41 }
0x303c   : > { %v8832_v19 = vsub.f32 1.0, %v8828_v27 }
0x303d   : > { %v8837_v50 = vmul.f32 %v8833_v53, %v8753_v49 }
0x303e   : > { %v8836_v63 = vmul.f32 %v8832_v19, %v8752_v51 }
0x303f   : > { %v8841_v15 = vadd.f32 1.0, %v8837_v50 }
0x3040   : > { %v8840_v52 = vadd.f32 1.0, %v8836_v63 }
0x3041   : > { %v8845_v23 = vmul.f32 %v8841_v15, %v8741_v5 }
0x3042   : > { %v8844_v45 = vmul.f32 %v8840_v52, %v8740_v58 }
0x3044   : > { %10591 = vmatprep.mubr.msk.f32.mxu0 %vm6802_vm12, %v8844_v45 }
0x3045   : > { %10592 = vmatmul.mubr.msk.f32.vlgmr.msra.gmra.mrb[72].mxu0 %vm6802_vm12, %v8845_v23 }
0x3099   : > { %v8569_v12 = vpop.xlane.xlu1 %8568 }
0x309a   : > { %v8573_v59 = vmul.f32 0.03125, %v8569_v12  ;;  %v8566_v26 = vpop.xlane.xlu0 %8565 }
0x309b   : > { %v8572_v25 = vmul.f32 0.03125, %v8566_v26 }
0x309c   : > { %v8577_v1 = vsub.f32 %v12729_v40, %v8573_v59 }
0x309d   : > { %v8576_v61 = vsub.f32 %v12732_v6, %v8572_v25 }
0x309e   : > { %v8581_v46 = vmul.f32 %v8577_v1, %v8577_v1 }
0x309f   : > { %v8580_v18 = vmul.f32 %v8576_v61, %v8576_v61 }
0x30a0   : > { %v8591_v20 = vsel %vm1072_vm2, %v8581_v46, 0.0 }
0x30a1   : > { %v8588_v62 = vsel %vm1072_vm2, %v8580_v18, 0.0 }
0x30a2   : > { %8589 = vadd.xlane.f32.xlu0 %v8588_v62 }
0x30a6   : > { %8592 = vadd.xlane.f32.xlu0 %v8591_v20 }
0x3118   : > { %v10593_v17 = vpop.f32.mrb[72].mxu0 }
0x3119   : > { %v8949_v48 = vadd.f32 %v10593_v17, %v9527_v29  ;;  %v8943_v37 = vpop.f32.mrb[73].mxu0 }
0x311a   : > { %v8944_v8 = vadd.f32 %v9527_v29, %v8943_v37 }
0x311b   : > { %v8961_v14 = vadd.f32 %v8949_v48, %v12714_v7 }
0x311c   : > { %v8960_v57 = vadd.f32 %v8944_v8, %v12708_v47 }
0x311d   : > { %v8969_v40 = vsel %vm1072_vm2, %v8961_v14, 0.0 }
0x311e   : > { %8970 = vadd.xlane.f32.xlu1 %v8969_v40  ;;  %v8966_v6 = vsel %vm1072_vm2, %v8960_v57, 0.0 }
0x311f   : > { %8967 = vadd.xlane.f32.xlu0 %v8966_v6 }
0x312f   : > { %v8590_v9 = vpop.xlane.xlu0 %8589 }
0x3130   : > { %v8596_v33 = vmul.f32 0.03125, %v8590_v9 }
0x3132   : > { %v8600_v10 = vadd.f32 1e-12, %v8596_v33 }
0x3133   : > { %v8593_v3 = vpop.xlane.xlu0 %8592 }
0x3134   : > { %11356 = vrsqrt.f32 %v8600_v10  ;;  %v8597_v30 = vmul.f32 0.03125, %v8593_v3 }
0x3136   : > { %v8601_v54 = vadd.f32 1e-12, %v8597_v30 }
0x3138   : > { %11358 = vrsqrt.f32 %v8601_v54 }
0x313e   : > { %v11357_v13 = vpop.eup %11356 }
0x313f   : > { %v8608_v0 = vmul.f32 %v11357_v13, %v8576_v61 }
0x3141   : > { %v8618_v7 = vmul.f32 %v12701_v22, %v8608_v0 }
0x3142   : > { %v11359_v55 = vpop.eup %11358 }
0x3143   : > { %v8628_v47 = vadd.f32 %v12704_v36, %v8618_v7  ;;  %v8609_v35 = vmul.f32 %v11359_v55, %v8577_v1 }
0x3145   : > { %10572 = vmatprep.mubr.msk.f32.mxu1 %vm1072_vm2, %v8628_v47  ;;  %v8619_v16 = vmul.f32 %v12701_v22, %v8609_v35 }
0x3147   : > { %v8629_v34 = vadd.f32 %v12704_v36, %v8619_v16 }
0x3149   : > { %10573 = vmatmul.mubr.msk.f32.gmra.mrb[70].mxu1 %vm1072_vm2, %v8629_v34 }
0x314a   : > { %10601 = vmatprep.mubr.msk.f32.mxu1 %vm11418_vm4, %v11417_v43  ;;  %v11429_v43 = vmov 0.0|0.0  }
0x314b   : > { %10936 = vmatprep.subr.bf16.mxu1 %v11429_v43 }
0x31ab   : > { %v8971_v56 = vpop.xlane.xlu1 %8970 }
0x31ac   : > { %v8973_v2 = vmul.f32 0.03125, %v8971_v56  ;;  %v8968_v32 = vpop.xlane.xlu0 %8967 }
0x31ad   : > { %v8972_v60 = vmul.f32 0.03125, %v8968_v32 }
0x31ae   : > { %v12764_v42 = vsub.f32 %v8961_v14, %v8973_v2 }
0x31af   : > { %v12766_v24 = vsub.f32 %v8960_v57, %v8972_v60 }
0x31b0   : > { %v8977_v31 = vmul.f32 %v12764_v42, %v12764_v42 }
0x31b1   : > { %v8976_v22 = vmul.f32 %v12766_v24, %v12766_v24 }
0x31b2   : > { %v8981_v36 = vsel %vm1072_vm2, %v8977_v31, 0.0 }
0x31b3   : > { %8982 = vadd.xlane.f32.xlu1 %v8981_v36  ;;  %v8978_v4 = vsel %vm1072_vm2, %v8976_v22, 0.0 }
0x31b4   : > { %8979 = vadd.xlane.f32.xlu0 %v8978_v4 }
0x31ca   : > { %9012 = vperm.xlu0 %11171, %v9009_v38  }
0x321c   : > { %v10574_v28 = vpop.f32.mrb[70].mxu1 }
0x321d   : > { %v12775_v39 = vadd.f32 %v10574_v28, %v12739_v44  ;;  %v8731_v41 = vpop.f32.mrb[71].mxu1  ;;  %v9534_v28 = vld [vmem:[%s12850_s11 + $0x1] ss:$0 sm:$0xff] }
0x321e   : > { %v8732_v27 = vadd.f32 %v12739_v44, %v8731_v41 }
0x321f   : > { %v8747_v53 = vmul.f32 0.70710677, %v12775_v39  ;;  %v8743_v4 = vmul.f32 0.5, %v12775_v39 }
0x3220   : > { %v8746_v49 = vmul.f32 0.70710677, %v8732_v27  ;;  %v8742_v22 = vmul.f32 0.5, %v8732_v27 }
0x3221   : > { %v8759_v19 = vand.u32 2147483647, %v8747_v53  ;;  %vm8751_vm4 = vcmp.ge.f32.partialorder %v8747_v53, 0.0 }
0x3222   : > { %v8758_v50 = vand.u32 2147483647, %v8746_v49  ;;  %vm8750_vm13 = vcmp.ge.f32.partialorder %v8746_v49, 0.0  ;;  %v8755_v34 = vsel %vm8751_vm4, 1.0, %v11428_v21  ;;  %v9535_v49 = vld [vmem:[%s11569_s17 + $0x1] ss:$0 sm:$0xff] }
0x3223   : > { %v8763_v51 = vmul.f32 0.3275911, %v8759_v19  ;;  %v8815_v52 = vsub.f32 0.0, %v8759_v19  ;;  %v8754_v32 = vsel %vm8750_vm13, 1.0, %v11428_v21 }
0x3224   : > { %v8762_v63 = vmul.f32 0.3275911, %v8758_v50  ;;  %v8814_v5 = vsub.f32 0.0, %v8758_v50 }
0x3225   : > { %v8767_v15 = vadd.f32 1.0, %v8763_v51  ;;  %v8819_v23 = vmul.f32 %v8815_v52, %v8759_v19 }
0x3226   : > { %v8766_v58 = vadd.f32 1.0, %v8762_v63  ;;  %v8818_v26 = vmul.f32 %v8814_v5, %v8758_v50  ;;  %v9008_v63 = vld [vmem:[%s11574_s30] sm:$0x1] }
0x3227   : > { %11360 = vrcp.f32 %v8767_v15  ;;  %v8826_v1 = vmul.f32 1.442695, %v8819_v23 }
0x3228   : > { %11362 = vrcp.f32 %v8766_v58  ;;  %v8824_v62 = vmul.f32 1.442695, %v8818_v26  ;;  %v9015_v58 = vlaneseq }
0x3229   : > { %11364 = vpow2.f32 %v8826_v1 }
0x322a   : > { %11366 = vpow2.f32 %v8824_v62  ;;  %v9016_v52 = vshrl.u32 %v9015_v58, 7 }
0x3231   : > { %v11361_v45 = vpop.eup %11360 }
0x3232   : > { %v11363_v12 = vpop.eup %11362  ;;  %v8779_v59 = vmul.f32 1.0614054, %v11361_v45 }
0x3233   : > { %v8778_v25 = vmul.f32 1.0614054, %v11363_v12  ;;  %v11365_v54 = vpop.eup %11364 }
0x3234   : > { %v8783_v44 = vadd.f32 -1.4531521, %v8779_v59  ;;  %v11367_v7 = vpop.eup %11366 }
0x3235   : > { %v8782_v61 = vadd.f32 -1.4531521, %v8778_v25 }
0x3236   : > { %v8787_v18 = vmul.f32 %v11361_v45, %v8783_v44 }
0x3237   : > { %v8786_v46 = vmul.f32 %v11363_v12, %v8782_v61 }
0x3238   : > { %v8791_v20 = vadd.f32 1.4214138, %v8787_v18 }
0x3239   : > { %v8790_v29 = vadd.f32 1.4214138, %v8786_v46 }
0x323a   : > { %v8795_v17 = vmul.f32 %v11361_v45, %v8791_v20 }
0x323b   : > { %v8794_v48 = vmul.f32 %v11363_v12, %v8790_v29 }
0x323c   : > { %v8799_v37 = vadd.f32 -0.28449672, %v8795_v17 }
0x323d   : > { %v8798_v8 = vadd.f32 -0.28449672, %v8794_v48 }
0x323e   : > { %v8803_v14 = vmul.f32 %v11361_v45, %v8799_v37 }
0x323f   : > { %v8802_v57 = vmul.f32 %v11363_v12, %v8798_v8 }
0x3240   : > { %v8807_v40 = vadd.f32 0.2548296, %v8803_v14  ;;  %v8983_v6 = vpop.xlane.xlu1 %8982 }
0x3241   : > { %v8806_v9 = vadd.f32 0.2548296, %v8802_v57  ;;  %v8985_v33 = vmul.f32 0.03125, %v8983_v6  ;;  %v8980_v10 = vpop.xlane.xlu0 %8979 }
0x3242   : > { %v8811_v3 = vmul.f32 %v11361_v45, %v8807_v40  ;;  %v8984_v30 = vmul.f32 0.03125, %v8980_v10 }
0x3243   : > { %v8810_v13 = vmul.f32 %v11363_v12, %v8806_v9  ;;  %v8987_v0 = vadd.f32 1e-12, %v8985_v33 }
0x3244   : > { %v8831_v55 = vmul.f32 %v11365_v54, %v8811_v3  ;;  %v8986_v47 = vadd.f32 1e-12, %v8984_v30 }
0x3245   : > { %v8830_v35 = vmul.f32 %v11367_v7, %v8810_v13  ;;  %11368 = vrsqrt.f32 %v8987_v0 }
0x3246   : > { %v8835_v16 = vsub.f32 1.0, %v8831_v55  ;;  %11370 = vrsqrt.f32 %v8986_v47 }
0x3247   : > { %v8834_v56 = vsub.f32 1.0, %v8830_v35 }
0x3248   : > { %v8839_v2 = vmul.f32 %v8835_v16, %v8755_v34 }
0x3249   : > { %v8838_v60 = vmul.f32 %v8834_v56, %v8754_v32  ;;  %v9013_v5 = vpop.permute.xlu0 %9012 }
0x324a   : > { %v8843_v31 = vadd.f32 1.0, %v8839_v2 }
0x324b   : > { %v8842_v36 = vadd.f32 1.0, %v8838_v60 }
0x324c   : > { %v8847_v38 = vmul.f32 %v8843_v31, %v8743_v4 }
0x324d   : > { %v8846_v43 = vmul.f32 %v8842_v36, %v8742_v22 }
0x324f   : > { %v11369_v11 = vpop.eup %11368  ;;  %10594 = vmatprep.mubr.msk.f32.mxu0 %vm6802_vm12, %v8846_v43 }
0x3250   : > { %v11371_v41 = vpop.eup %11370  ;;  %v8991_v53 = vmul.f32 %v11369_v11, %v12764_v42  ;;  %10595 = vmatmul.mubr.msk.f32.gmra.mrb[74].mxu0 %vm6802_vm12, %v8847_v38 }
0x3251   : > { %v8990_v21 = vmul.f32 %v11371_v41, %v12766_v24  ;;  %v9017_v24 = vsub.s32 0, %v9016_v52 }
0x3252   : > { %v8999_v19 = vmul.f32 %v9534_v28, %v8991_v53 }
0x3253   : > { %v8998_v27 = vmul.f32 %v9534_v28, %v8990_v21  ;;  %v9018_v45 = vrot.slane %v9013_v5, %v9017_v24 }
0x3254   : > { %v9007_v39 = vadd.f32 %v9535_v49, %v8999_v19 }
0x3255   : > { %v9006_v50 = vadd.f32 %v9535_v49, %v8998_v27 }
0x3257   : > { %v10937_v51 = vpack.c.bf16 %v9007_v39, %v9006_v50 }
0x3259   : > { %10939 = vmatpush3.bf16.xpose.msk.msra.mxu1 %vm10938_vm14, %v10937_v51 }
0x3260   : > { %10602 = vmatmul.mubr.msk.f32.vlgmr.msra.gmra.mrb[72].mxu1 %vm1072_vm2, %v9008_v63 }
0x3323   : > { %v10596_v42 = vpop.f32.mrb[74].mxu0 }
0x3324   : > { %v8953_v15 = vpop.f32.mrb[75].mxu0 }
0x3333   : > { %v9094_v23 = vpop.f32.mrb[72].mxu1 }
0x3334   : > { %v9095_v12 = vadd.f32 %v9094_v23, %v9018_v45  ;;  %v10603_v59 = vpop.f32.mrb[73].mxu1 }
0x3336   : > { %9099 = vst.msk [vmem:[%s972_s3] sm:$0x1] %vm9098_vm15, %v9095_v12 }
0x3337 PF: > { %s71_s7 = sadd.s32 1, %s11386_s7  }
0x3338   : > { %p68_p5 = scmp.ge.s32.totalorder %s71_s7, 4  }
0x333a   :  { %70 = sbr.rel (!%p68_p5) target bundleno = 51 (0x33), region = 238 }

</bundles_post_ra>
